<compile_context>
chip_gen: v7x
topology: tpu7x:2x2x1
jax: 0.10.0
libtpu: 0.0.40
codegen_flags: <defaults>
</compile_context>

<pallas_src>
import math

import jax
import jax.numpy as jnp
from jax.experimental import pallas as pl
from jax.experimental.pallas import tpu as pltpu

INPUT_DIM = 20
BN_EPS = 1e-5
_FEATS = (300, 150, 50, 10)   # hidden1..hidden4 output widths


def _pad8(n):
    return ((n + 7) // 8) * 8


# --- BN-parameter slab layout: [g1 g2 g3 g4 | be1 be2 be3 be4 | bo]; each
#     segment padded to a multiple of 8 rows so in-kernel slices start on a
#     sublane-tile boundary.  One DMA instead of nine tiny ones.
_G_OFF = []
_BE_OFF = []
_off = 0
for _f in _FEATS:
    _G_OFF.append(_off)
    _off += _pad8(_f)
for _f in _FEATS:
    _BE_OFF.append(_off)
    _off += _pad8(_f)
_BO_OFF = _off
_off += 8
_SLAB_ROWS = _off


def _sigmoid(z):
    # sigmoid(z) = 0.5*tanh(0.5*z) + 0.5 : exact identity, stays on the EUP
    # transcendental slot instead of a full-precision VPU divide.
    return 0.5 * jnp.tanh(0.5 * z) + 0.5


def discriminator_kernel(
    x_ref,                                   # (20, B) f32, feature-major input
    fc1a_ref, fc1b_ref,                      # gating branch weights (out,in) bf16
    w1_ref, w2_ref, w3_ref, w4_ref,          # hidden weights (out,in) bf16
    wo_ref,                                  # output head weight (1, 10) f32
    slab_ref,                                # packed gamma/beta/bo (_SLAB_ROWS,1) f32
    o_ref,                                   # (1, B) f32 output (lane-dense)
):
    B = x_ref.shape[1]
    inv_b = 1.0 / B

    xT = x_ref[...]                                        # (20, B) f32

    # Ones column for MXU-offloaded batch sums; hoisted (built once, reused by
    # every layer -- JAX does not CSE broadcasts).
    ones_b = jnp.ones((B, 1), jnp.float32)

    # ---- fc_1 gating branch: Linear(20->10, no bias) -> ReLU ->
    #      Linear(10->20, no bias) -> Sigmoid; then x = x * gate.
    h = jnp.dot(fc1a_ref[...], xT.astype(jnp.bfloat16),
                preferred_element_type=jnp.float32)        # (10, B) f32
    h = jnp.maximum(h, 0.0)
    gate = _sigmoid(jnp.dot(fc1b_ref[...], h.astype(jnp.bfloat16),
                            preferred_element_type=jnp.float32))   # (20, B)
    h = (xT * gate).astype(jnp.bfloat16)                   # (20, B) bf16

    def lin_bn_relu(h_in, w_ref, li, out_dtype):
        # Linear (pre-BN bias dropped: exactly cancelled by training-mode BN
        # mean subtraction), training-mode BatchNorm1d (biased batch variance,
        # eps=1e-5), ReLU, fused output cast.
        F = _FEATS[li]
        z = jnp.dot(w_ref[...], h_in,
                    preferred_element_type=jnp.float32)     # (F, B) f32
        # Batch moments via the (otherwise idle) MXU: one K=B matmul each.
        s1 = jnp.dot(z, ones_b, preferred_element_type=jnp.float32)      # (F,1)
        s2 = jnp.dot(z * z, ones_b, preferred_element_type=jnp.float32)  # (F,1)
        mean = s1 * inv_b
        # One-pass biased variance; clamp guards tiny negative rounding error.
        var = jnp.maximum(s2 * inv_b - mean * mean, 0.0)
        gamma = slab_ref[_G_OFF[li]:_G_OFF[li] + F, :]       # (F, 1)
        beta = slab_ref[_BE_OFF[li]:_BE_OFF[li] + F, :]      # (F, 1)
        scale = gamma * jax.lax.rsqrt(var + BN_EPS)
        shift = beta - mean * scale
        # Fused BN affine + ReLU + pack for the next layer's matmul.
        return jnp.maximum(z * scale + shift, 0.0).astype(out_dtype)

    h = lin_bn_relu(h, w1_ref, 0, jnp.bfloat16)   # (300, B)
    h = lin_bn_relu(h, w2_ref, 1, jnp.bfloat16)   # (150, B)
    h = lin_bn_relu(h, w3_ref, 2, jnp.bfloat16)   # (50,  B)
    h = lin_bn_relu(h, w4_ref, 3, jnp.float32)    # (10,  B) f32 for the head

    # ---- output head: (1,10) @ (10,B) -> lane-dense (1,B) logits row.
    bo = slab_ref[_BO_OFF:_BO_OFF + 1, :]          # (1, 1)
    logits = jnp.dot(wo_ref[...], h, preferred_element_type=jnp.float32) + bo
    o_ref[...] = _sigmoid(logits)


def _vmem_limit_bytes():
    # ~75% of physical VMEM, capped at 100 MiB: 96 MiB on v5e/v6e (128 MiB
    # physical), 48 MiB on v7x (64 MiB physical).  Fallback: 48 MiB.
    try:
        cap = int(pltpu.get_tpu_info().vmem_capacity_bytes)
    except Exception:
        cap = 64 * 1024 * 1024
    return max(32 * 1024 * 1024, min(100 * 1024 * 1024, (cap * 3) // 4))


def discriminator_forward(x, params):
    B = x.shape[0]
    # Whole-batch kernel (exact full-batch training-mode BN statistics).
    # Feature-major f32 activations peak around ~4-5 KiB/row, so B up to a few
    # thousand fits comfortably under the VMEM limit below on all generations.
    # TODO(synk): for larger B, or to use both v7x TensorCores, split the batch
    # across cores with a cross-core partial-(sum, sumsq) exchange
    # (core_map + VMEM_SHARED); not implemented here.
    assert B <= 4096, "whole-batch BN kernel: batch must fit in VMEM"

    xT = x.astype(jnp.float32).T          # (20, B): layout plumbing only
    args = (
        xT,
        params["fc1a"], params["fc1b"],
        params["w1"], params["w2"], params["w3"], params["w4"],
        params["wo"], params["bn_slab"],
    )

    # Advisory cost estimate so XLA can schedule around the custom call.
    matmul_flops = 2 * B * (INPUT_DIM * 10 + 10 * INPUT_DIM + INPUT_DIM * 300
                            + 300 * 150 + 150 * 50 + 50 * 10 + 10 * 1)
    stats_flops = 4 * B * sum(_FEATS)        # two K=B moment matmuls per layer
    transcendentals = B * (INPUT_DIM + 1) + sum(_FEATS)
    bytes_accessed = sum(int(a.size) * a.dtype.itemsize for a in args) + B * 4

    out = pl.pallas_call(
        discriminator_kernel,
        out_shape=jax.ShapeDtypeStruct((1, B), jnp.float32),
        in_specs=[pl.BlockSpec(memory_space=pltpu.MemorySpace.VMEM)] * len(args),
        out_specs=pl.BlockSpec(memory_space=pltpu.MemorySpace.VMEM),
        compiler_params=pltpu.CompilerParams(
            vmem_limit_bytes=_vmem_limit_bytes()),
        cost_estimate=pl.CostEstimate(
            flops=matmul_flops + stats_flops,
            transcendentals=transcendentals,
            bytes_accessed=bytes_accessed),
    )(*args)
    return out[0]    # (B,) probabilities — torch's squeeze(-1)


def _uniform(key, shape, fan_in):
    """torch.nn.Linear default init: U(-1/sqrt(fan_in), 1/sqrt(fan_in))."""
    bound = 1.0 / math.sqrt(fan_in)
    return jax.random.uniform(key, shape, jnp.float32, -bound, bound)


def _pack_slab(gammas, betas, bo):
    slab = jnp.zeros((_SLAB_ROWS, 1), jnp.float32)
    for off, v in zip(_G_OFF, gammas):
        slab = slab.at[off:off + v.shape[0], 0].set(v)
    for off, v in zip(_BE_OFF, betas):
        slab = slab.at[off:off + v.shape[0], 0].set(v)
    slab = slab.at[_BO_OFF, 0].set(bo.reshape(()))
    return slab


def make_params(seed=0):
    keys = jax.random.split(jax.random.PRNGKey(seed), 8)
    p = {}
    # fc_1 gating branch (bias=False); weights stored (out, in), bf16 for MXU.
    p["fc1a"] = _uniform(keys[0], (10, INPUT_DIM), INPUT_DIM).astype(jnp.bfloat16)
    p["fc1b"] = _uniform(keys[1], (INPUT_DIM, 10), 10).astype(jnp.bfloat16)
    # Hidden layers: weights only, stored (out, in).  Pre-BN linear biases are
    # NOT materialized — training-mode BN mean subtraction cancels them exactly
    # (document this convention when loading torch checkpoints).  gamma=1, beta=0.
    fan_ins = (INPUT_DIM,) + _FEATS[:-1]
    gammas, betas = [], []
    for i, (fi, fo) in enumerate(zip(fan_ins, _FEATS), start=1):
        p[f"w{i}"] = _uniform(keys[1 + i], (fo, fi), fi).astype(jnp.bfloat16)
        gammas.append(jnp.ones((fo,), jnp.float32))
        betas.append(jnp.zeros((fo,), jnp.float32))
    # Output head Linear(10 -> 1): weight (1, 10) f32; bias packed in the slab.
    p["wo"] = _uniform(keys[6], (1, 10), 10)
    bo = _uniform(keys[7], (1,), 10)
    p["bn_slab"] = _pack_slab(gammas, betas, bo)
    # NOTE: self.fc_2 from __init__ is never used in forward(); not materialized.
    return p


if __name__ == "__main__":
    B = 8
    x = jax.random.normal(jax.random.PRNGKey(0), (B, INPUT_DIM), jnp.float32)
    params = make_params(seed=0)

    out = jax.jit(discriminator_forward)(x, params)
    out = jax.block_until_ready(out)
    assert out.shape == (B,), out.shape
    assert bool(jnp.all(jnp.isfinite(out)))
    assert bool(jnp.all((out >= 0.0) & (out <= 1.0)))
    print("KERNEL_OK")
</pallas_src>

<mosaic_0001>
module attributes {stable_mosaic.version = 11 : i64} {
  func.func @discriminator_kernel(%arg0: memref<20x8xf32, #tpu.memory_space<vmem>>, %arg1: memref<10x20xbf16, #tpu.memory_space<vmem>>, %arg2: memref<20x10xbf16, #tpu.memory_space<vmem>>, %arg3: memref<300x20xbf16, #tpu.memory_space<vmem>>, %arg4: memref<150x300xbf16, #tpu.memory_space<vmem>>, %arg5: memref<50x150xbf16, #tpu.memory_space<vmem>>, %arg6: memref<10x50xbf16, #tpu.memory_space<vmem>>, %arg7: memref<1x10xf32, #tpu.memory_space<vmem>>, %arg8: memref<1064x1xf32, #tpu.memory_space<vmem>>, %arg9: memref<1x8xf32, #tpu.memory_space<vmem>>) attributes {dimension_semantics = [], scalar_prefetch = 0 : i64, scratch_operands = 0 : i64, tpu.core_type = #tpu.core_type<tc>} {
    %c0 = arith.constant 0 : index
    %c0_0 = arith.constant 0 : index
    %0 = vector.load %arg0[%c0, %c0_0] : memref<20x8xf32, #tpu.memory_space<vmem>>, vector<20x8xf32>
    %cst = arith.constant 1.000000e+00 : f32
    %1 = vector.broadcast %cst : f32 to vector<8x1xf32>
    %c0_1 = arith.constant 0 : index
    %c0_2 = arith.constant 0 : index
    %2 = vector.load %arg1[%c0_1, %c0_2] : memref<10x20xbf16, #tpu.memory_space<vmem>>, vector<10x20xbf16>
    %3 = arith.truncf %0 : vector<20x8xf32> to vector<20x8xbf16>
    %cst_3 = arith.constant dense<0.000000e+00> : vector<10x8xf32>
    %4 = tpu.matmul %2, %3, %cst_3 {dimension_numbers = #tpu.dot_dimension_numbers<[1], [0], [0], [1], [0, 0, 1, 1], [], []>} : vector<10x20xbf16>, vector<20x8xbf16>, vector<10x8xf32> -> vector<10x8xf32>
    %cst_4 = arith.constant 0.000000e+00 : f32
    %5 = vector.broadcast %cst_4 : f32 to vector<10x8xf32>
    %6 = arith.maximumf %4, %5 : vector<10x8xf32>
    %c0_5 = arith.constant 0 : index
    %c0_6 = arith.constant 0 : index
    %7 = vector.load %arg2[%c0_5, %c0_6] : memref<20x10xbf16, #tpu.memory_space<vmem>>, vector<20x10xbf16>
    %8 = arith.truncf %6 : vector<10x8xf32> to vector<10x8xbf16>
    %cst_7 = arith.constant dense<0.000000e+00> : vector<20x8xf32>
    %9 = tpu.matmul %7, %8, %cst_7 {dimension_numbers = #tpu.dot_dimension_numbers<[1], [0], [0], [1], [0, 0, 1, 1], [], []>} : vector<20x10xbf16>, vector<10x8xbf16>, vector<20x8xf32> -> vector<20x8xf32>
    %cst_8 = arith.constant 5.000000e-01 : f32
    %10 = vector.broadcast %cst_8 : f32 to vector<20x8xf32>
    %11 = arith.mulf %10, %9 : vector<20x8xf32>
    %12 = math.tanh %11 : vector<20x8xf32>
    %cst_9 = arith.constant 5.000000e-01 : f32
    %13 = vector.broadcast %cst_9 : f32 to vector<20x8xf32>
    %14 = arith.mulf %13, %12 : vector<20x8xf32>
    %cst_10 = arith.constant 5.000000e-01 : f32
    %15 = vector.broadcast %cst_10 : f32 to vector<20x8xf32>
    %16 = arith.addf %14, %15 : vector<20x8xf32>
    %17 = arith.mulf %0, %16 : vector<20x8xf32>
    %18 = arith.truncf %17 : vector<20x8xf32> to vector<20x8xbf16>
    %c0_11 = arith.constant 0 : index
    %c0_12 = arith.constant 0 : index
    %19 = vector.load %arg3[%c0_11, %c0_12] : memref<300x20xbf16, #tpu.memory_space<vmem>>, vector<300x20xbf16>
    %cst_13 = arith.constant dense<0.000000e+00> : vector<300x8xf32>
    %20 = tpu.matmul %19, %18, %cst_13 {dimension_numbers = #tpu.dot_dimension_numbers<[1], [0], [0], [1], [0, 0, 1, 1], [], []>} : vector<300x20xbf16>, vector<20x8xbf16>, vector<300x8xf32> -> vector<300x8xf32>
    %cst_14 = arith.constant dense<0.000000e+00> : vector<300x1xf32>
    %21 = tpu.matmul %20, %1, %cst_14 {dimension_numbers = #tpu.dot_dimension_numbers<[1], [0], [0], [1], [0, 0, 1, 1], [], []>} : vector<300x8xf32>, vector<8x1xf32>, vector<300x1xf32> -> vector<300x1xf32>
    %22 = arith.mulf %20, %20 : vector<300x8xf32>
    %cst_15 = arith.constant dense<0.000000e+00> : vector<300x1xf32>
    %23 = tpu.matmul %22, %1, %cst_15 {dimension_numbers = #tpu.dot_dimension_numbers<[1], [0], [0], [1], [0, 0, 1, 1], [], []>} : vector<300x8xf32>, vector<8x1xf32>, vector<300x1xf32> -> vector<300x1xf32>
    %cst_16 = arith.constant 1.250000e-01 : f32
    %24 = vector.broadcast %cst_16 : f32 to vector<300x1xf32>
    %25 = arith.mulf %21, %24 : vector<300x1xf32>
    %cst_17 = arith.constant 1.250000e-01 : f32
    %26 = vector.broadcast %cst_17 : f32 to vector<300x1xf32>
    %27 = arith.mulf %23, %26 : vector<300x1xf32>
    %28 = arith.mulf %25, %25 : vector<300x1xf32>
    %29 = arith.subf %27, %28 : vector<300x1xf32>
    %cst_18 = arith.constant 0.000000e+00 : f32
    %30 = vector.broadcast %cst_18 : f32 to vector<300x1xf32>
    %31 = arith.maximumf %29, %30 : vector<300x1xf32>
    %c0_19 = arith.constant 0 : index
    %c0_20 = arith.constant 0 : index
    %32 = vector.load %arg8[%c0_19, %c0_20] : memref<1064x1xf32, #tpu.memory_space<vmem>>, vector<300x1xf32>
    %c528 = arith.constant 528 : index
    %c0_21 = arith.constant 0 : index
    %33 = vector.load %arg8[%c528, %c0_21] : memref<1064x1xf32, #tpu.memory_space<vmem>>, vector<300x1xf32>
    %cst_22 = arith.constant 9.99999974E-6 : f32
    %34 = vector.broadcast %cst_22 : f32 to vector<300x1xf32>
    %35 = arith.addf %31, %34 : vector<300x1xf32>
    %36 = math.rsqrt %35 : vector<300x1xf32>
    %37 = arith.mulf %32, %36 : vector<300x1xf32>
    %38 = arith.mulf %25, %37 : vector<300x1xf32>
    %39 = arith.subf %33, %38 : vector<300x1xf32>
    %40 = vector.broadcast %37 : vector<300x1xf32> to vector<300x8xf32>
    %41 = arith.mulf %20, %40 : vector<300x8xf32>
    %42 = vector.broadcast %39 : vector<300x1xf32> to vector<300x8xf32>
    %43 = arith.addf %41, %42 : vector<300x8xf32>
    %cst_23 = arith.constant 0.000000e+00 : f32
    %44 = vector.broadcast %cst_23 : f32 to vector<300x8xf32>
    %45 = arith.maximumf %43, %44 : vector<300x8xf32>
    %46 = arith.truncf %45 : vector<300x8xf32> to vector<300x8xbf16>
    %c0_24 = arith.constant 0 : index
    %c0_25 = arith.constant 0 : index
    %47 = vector.load %arg4[%c0_24, %c0_25] : memref<150x300xbf16, #tpu.memory_space<vmem>>, vector<150x300xbf16>
    %cst_26 = arith.constant dense<0.000000e+00> : vector<150x8xf32>
    %48 = tpu.matmul %47, %46, %cst_26 {dimension_numbers = #tpu.dot_dimension_numbers<[1], [0], [0], [1], [0, 0, 1, 1], [], []>} : vector<150x300xbf16>, vector<300x8xbf16>, vector<150x8xf32> -> vector<150x8xf32>
    %cst_27 = arith.constant dense<0.000000e+00> : vector<150x1xf32>
    %49 = tpu.matmul %48, %1, %cst_27 {dimension_numbers = #tpu.dot_dimension_numbers<[1], [0], [0], [1], [0, 0, 1, 1], [], []>} : vector<150x8xf32>, vector<8x1xf32>, vector<150x1xf32> -> vector<150x1xf32>
    %50 = arith.mulf %48, %48 : vector<150x8xf32>
    %cst_28 = arith.constant dense<0.000000e+00> : vector<150x1xf32>
    %51 = tpu.matmul %50, %1, %cst_28 {dimension_numbers = #tpu.dot_dimension_numbers<[1], [0], [0], [1], [0, 0, 1, 1], [], []>} : vector<150x8xf32>, vector<8x1xf32>, vector<150x1xf32> -> vector<150x1xf32>
    %cst_29 = arith.constant 1.250000e-01 : f32
    %52 = vector.broadcast %cst_29 : f32 to vector<150x1xf32>
    %53 = arith.mulf %49, %52 : vector<150x1xf32>
    %cst_30 = arith.constant 1.250000e-01 : f32
    %54 = vector.broadcast %cst_30 : f32 to vector<150x1xf32>
    %55 = arith.mulf %51, %54 : vector<150x1xf32>
    %56 = arith.mulf %53, %53 : vector<150x1xf32>
    %57 = arith.subf %55, %56 : vector<150x1xf32>
    %cst_31 = arith.constant 0.000000e+00 : f32
    %58 = vector.broadcast %cst_31 : f32 to vector<150x1xf32>
    %59 = arith.maximumf %57, %58 : vector<150x1xf32>
    %c304 = arith.constant 304 : index
    %c0_32 = arith.constant 0 : index
    %60 = vector.load %arg8[%c304, %c0_32] : memref<1064x1xf32, #tpu.memory_space<vmem>>, vector<150x1xf32>
    %c832 = arith.constant 832 : index
    %c0_33 = arith.constant 0 : index
    %61 = vector.load %arg8[%c832, %c0_33] : memref<1064x1xf32, #tpu.memory_space<vmem>>, vector<150x1xf32>
    %cst_34 = arith.constant 9.99999974E-6 : f32
    %62 = vector.broadcast %cst_34 : f32 to vector<150x1xf32>
    %63 = arith.addf %59, %62 : vector<150x1xf32>
    %64 = math.rsqrt %63 : vector<150x1xf32>
    %65 = arith.mulf %60, %64 : vector<150x1xf32>
    %66 = arith.mulf %53, %65 : vector<150x1xf32>
    %67 = arith.subf %61, %66 : vector<150x1xf32>
    %68 = vector.broadcast %65 : vector<150x1xf32> to vector<150x8xf32>
    %69 = arith.mulf %48, %68 : vector<150x8xf32>
    %70 = vector.broadcast %67 : vector<150x1xf32> to vector<150x8xf32>
    %71 = arith.addf %69, %70 : vector<150x8xf32>
    %cst_35 = arith.constant 0.000000e+00 : f32
    %72 = vector.broadcast %cst_35 : f32 to vector<150x8xf32>
    %73 = arith.maximumf %71, %72 : vector<150x8xf32>
    %74 = arith.truncf %73 : vector<150x8xf32> to vector<150x8xbf16>
    %c0_36 = arith.constant 0 : index
    %c0_37 = arith.constant 0 : index
    %75 = vector.load %arg5[%c0_36, %c0_37] : memref<50x150xbf16, #tpu.memory_space<vmem>>, vector<50x150xbf16>
    %cst_38 = arith.constant dense<0.000000e+00> : vector<50x8xf32>
    %76 = tpu.matmul %75, %74, %cst_38 {dimension_numbers = #tpu.dot_dimension_numbers<[1], [0], [0], [1], [0, 0, 1, 1], [], []>} : vector<50x150xbf16>, vector<150x8xbf16>, vector<50x8xf32> -> vector<50x8xf32>
    %cst_39 = arith.constant dense<0.000000e+00> : vector<50x1xf32>
    %77 = tpu.matmul %76, %1, %cst_39 {dimension_numbers = #tpu.dot_dimension_numbers<[1], [0], [0], [1], [0, 0, 1, 1], [], []>} : vector<50x8xf32>, vector<8x1xf32>, vector<50x1xf32> -> vector<50x1xf32>
    %78 = arith.mulf %76, %76 : vector<50x8xf32>
    %cst_40 = arith.constant dense<0.000000e+00> : vector<50x1xf32>
    %79 = tpu.matmul %78, %1, %cst_40 {dimension_numbers = #tpu.dot_dimension_numbers<[1], [0], [0], [1], [0, 0, 1, 1], [], []>} : vector<50x8xf32>, vector<8x1xf32>, vector<50x1xf32> -> vector<50x1xf32>
    %cst_41 = arith.constant 1.250000e-01 : f32
    %80 = vector.broadcast %cst_41 : f32 to vector<50x1xf32>
    %81 = arith.mulf %77, %80 : vector<50x1xf32>
    %cst_42 = arith.constant 1.250000e-01 : f32
    %82 = vector.broadcast %cst_42 : f32 to vector<50x1xf32>
    %83 = arith.mulf %79, %82 : vector<50x1xf32>
    %84 = arith.mulf %81, %81 : vector<50x1xf32>
    %85 = arith.subf %83, %84 : vector<50x1xf32>
    %cst_43 = arith.constant 0.000000e+00 : f32
    %86 = vector.broadcast %cst_43 : f32 to vector<50x1xf32>
    %87 = arith.maximumf %85, %86 : vector<50x1xf32>
    %c456 = arith.constant 456 : index
    %c0_44 = arith.constant 0 : index
    %88 = vector.load %arg8[%c456, %c0_44] : memref<1064x1xf32, #tpu.memory_space<vmem>>, vector<50x1xf32>
    %c984 = arith.constant 984 : index
    %c0_45 = arith.constant 0 : index
    %89 = vector.load %arg8[%c984, %c0_45] : memref<1064x1xf32, #tpu.memory_space<vmem>>, vector<50x1xf32>
    %cst_46 = arith.constant 9.99999974E-6 : f32
    %90 = vector.broadcast %cst_46 : f32 to vector<50x1xf32>
    %91 = arith.addf %87, %90 : vector<50x1xf32>
    %92 = math.rsqrt %91 : vector<50x1xf32>
    %93 = arith.mulf %88, %92 : vector<50x1xf32>
    %94 = arith.mulf %81, %93 : vector<50x1xf32>
    %95 = arith.subf %89, %94 : vector<50x1xf32>
    %96 = vector.broadcast %93 : vector<50x1xf32> to vector<50x8xf32>
    %97 = arith.mulf %76, %96 : vector<50x8xf32>
    %98 = vector.broadcast %95 : vector<50x1xf32> to vector<50x8xf32>
    %99 = arith.addf %97, %98 : vector<50x8xf32>
    %cst_47 = arith.constant 0.000000e+00 : f32
    %100 = vector.broadcast %cst_47 : f32 to vector<50x8xf32>
    %101 = arith.maximumf %99, %100 : vector<50x8xf32>
    %102 = arith.truncf %101 : vector<50x8xf32> to vector<50x8xbf16>
    %c0_48 = arith.constant 0 : index
    %c0_49 = arith.constant 0 : index
    %103 = vector.load %arg6[%c0_48, %c0_49] : memref<10x50xbf16, #tpu.memory_space<vmem>>, vector<10x50xbf16>
    %cst_50 = arith.constant dense<0.000000e+00> : vector<10x8xf32>
    %104 = tpu.matmul %103, %102, %cst_50 {dimension_numbers = #tpu.dot_dimension_numbers<[1], [0], [0], [1], [0, 0, 1, 1], [], []>} : vector<10x50xbf16>, vector<50x8xbf16>, vector<10x8xf32> -> vector<10x8xf32>
    %cst_51 = arith.constant dense<0.000000e+00> : vector<10x1xf32>
    %105 = tpu.matmul %104, %1, %cst_51 {dimension_numbers = #tpu.dot_dimension_numbers<[1], [0], [0], [1], [0, 0, 1, 1], [], []>} : vector<10x8xf32>, vector<8x1xf32>, vector<10x1xf32> -> vector<10x1xf32>
    %106 = arith.mulf %104, %104 : vector<10x8xf32>
    %cst_52 = arith.constant dense<0.000000e+00> : vector<10x1xf32>
    %107 = tpu.matmul %106, %1, %cst_52 {dimension_numbers = #tpu.dot_dimension_numbers<[1], [0], [0], [1], [0, 0, 1, 1], [], []>} : vector<10x8xf32>, vector<8x1xf32>, vector<10x1xf32> -> vector<10x1xf32>
    %cst_53 = arith.constant 1.250000e-01 : f32
    %108 = vector.broadcast %cst_53 : f32 to vector<10x1xf32>
    %109 = arith.mulf %105, %108 : vector<10x1xf32>
    %cst_54 = arith.constant 1.250000e-01 : f32
    %110 = vector.broadcast %cst_54 : f32 to vector<10x1xf32>
    %111 = arith.mulf %107, %110 : vector<10x1xf32>
    %112 = arith.mulf %109, %109 : vector<10x1xf32>
    %113 = arith.subf %111, %112 : vector<10x1xf32>
    %cst_55 = arith.constant 0.000000e+00 : f32
    %114 = vector.broadcast %cst_55 : f32 to vector<10x1xf32>
    %115 = arith.maximumf %113, %114 : vector<10x1xf32>
    %c512 = arith.constant 512 : index
    %c0_56 = arith.constant 0 : index
    %116 = vector.load %arg8[%c512, %c0_56] : memref<1064x1xf32, #tpu.memory_space<vmem>>, vector<10x1xf32>
    %c1040 = arith.constant 1040 : index
    %c0_57 = arith.constant 0 : index
    %117 = vector.load %arg8[%c1040, %c0_57] : memref<1064x1xf32, #tpu.memory_space<vmem>>, vector<10x1xf32>
    %cst_58 = arith.constant 9.99999974E-6 : f32
    %118 = vector.broadcast %cst_58 : f32 to vector<10x1xf32>
    %119 = arith.addf %115, %118 : vector<10x1xf32>
    %120 = math.rsqrt %119 : vector<10x1xf32>
    %121 = arith.mulf %116, %120 : vector<10x1xf32>
    %122 = arith.mulf %109, %121 : vector<10x1xf32>
    %123 = arith.subf %117, %122 : vector<10x1xf32>
    %124 = vector.broadcast %121 : vector<10x1xf32> to vector<10x8xf32>
    %125 = arith.mulf %104, %124 : vector<10x8xf32>
    %126 = vector.broadcast %123 : vector<10x1xf32> to vector<10x8xf32>
    %127 = arith.addf %125, %126 : vector<10x8xf32>
    %cst_59 = arith.constant 0.000000e+00 : f32
    %128 = vector.broadcast %cst_59 : f32 to vector<10x8xf32>
    %129 = arith.maximumf %127, %128 : vector<10x8xf32>
    %c1056 = arith.constant 1056 : index
    %c0_60 = arith.constant 0 : index
    %130 = vector.load %arg8[%c1056, %c0_60] : memref<1064x1xf32, #tpu.memory_space<vmem>>, vector<1x1xf32>
    %c0_61 = arith.constant 0 : index
    %c0_62 = arith.constant 0 : index
    %131 = vector.load %arg7[%c0_61, %c0_62] : memref<1x10xf32, #tpu.memory_space<vmem>>, vector<1x10xf32>
    %cst_63 = arith.constant dense<0.000000e+00> : vector<1x8xf32>
    %132 = tpu.matmul %131, %129, %cst_63 {dimension_numbers = #tpu.dot_dimension_numbers<[1], [0], [0], [1], [0, 0, 1, 1], [], []>} : vector<1x10xf32>, vector<10x8xf32>, vector<1x8xf32> -> vector<1x8xf32>
    %133 = vector.broadcast %130 : vector<1x1xf32> to vector<1x8xf32>
    %134 = arith.addf %132, %133 : vector<1x8xf32>
    %cst_64 = arith.constant 5.000000e-01 : f32
    %135 = vector.broadcast %cst_64 : f32 to vector<1x8xf32>
    %136 = arith.mulf %135, %134 : vector<1x8xf32>
    %137 = math.tanh %136 : vector<1x8xf32>
    %cst_65 = arith.constant 5.000000e-01 : f32
    %138 = vector.broadcast %cst_65 : f32 to vector<1x8xf32>
    %139 = arith.mulf %138, %137 : vector<1x8xf32>
    %cst_66 = arith.constant 5.000000e-01 : f32
    %140 = vector.broadcast %cst_66 : f32 to vector<1x8xf32>
    %141 = arith.addf %139, %140 : vector<1x8xf32>
    %c0_67 = arith.constant 0 : index
    %c0_68 = arith.constant 0 : index
    %142 = vector.load %arg9[%c0_67, %c0_68] : memref<1x8xf32, #tpu.memory_space<vmem>>, vector<1x8xf32>
    tpu.vector_store %arg9[%c0_67, %c0_68], %141 {strides = array<i32>} : memref<1x8xf32, #tpu.memory_space<vmem>>, vector<1x8xf32>,
    return
  }
}

</mosaic_0001>

<bundles_post_ra>
// kernel: discriminator_forward.1
= control target key start
LH: loop header
LB: loop body
LE: loop exit
PB: predicated region body
PF: predicated region fallthrough
CT: control target
= control target key end

     0   :  { %vm50_vm0 = vcmask 1041408   ;;  %v7914_v3 = vmov 0.0   ;;  %vm5791_vm1 = vmmov 0   ;;  %vm46_vm2 = vcmask 162816   ;;  %s7902_s0 = inlined_call_operand.vmem [shape: f32[20,8], index: 0, kind: input, shape index: {}]   ;;  %s7903_s1 = inlined_call_operand.vmem [shape: bf16[10,20], index: 1, kind: input, shape index: {}]   ;;  %s7904_s2 = inlined_call_operand.vmem [shape: bf16[20,10], index: 2, kind: input, shape index: {}]   ;;  %s7905_s3 = inlined_call_operand.vmem [shape: bf16[300,20], index: 3, kind: input, shape index: {}]   ;;  %s7906_s4 = inlined_call_operand.vmem [shape: bf16[150,300], index: 4, kind: input, shape index: {}]   ;;  %s7907_s5 = inlined_call_operand.vmem [shape: bf16[50,150], index: 5, kind: input, shape index: {}]   ;;  %s7908_s6 = inlined_call_operand.vmem [shape: bf16[10,50], index: 6, kind: input, shape index: {}]   ;;  %s7909_s7 = inlined_call_operand.vmem [shape: f32[1,10], index: 7, kind: input, shape index: {}]   ;;  %s7910_s8 = inlined_call_operand.vmem [shape: f32[1064,1], index: 8, kind: input, shape index: {}]   ;;  %s7911_s9 = inlined_call_operand.hbm [shape: f32[1,8], index: 9, kind: output, shape index: {}]  }
   0x1   :  { %v34_v0 = vld [vmem:[%s7902_s0] sm:$0xff]  ;;  %v35_v1 = vld [vmem:[%s7902_s0 + $0x8] sm:$0xff]  ;;  %v36_v2 = vld [vmem:[%s7902_s0 + $0x10] sm:$0xf]  ;;  %5107 = vmatprep.subr.bf16.mxu0 %v7914_v3  ;;  %5111 = vmatprep.mubr.msk.bf16.mxu0 %vm5791_vm1, %v7914_v3 }
   0x2   :  { %v39_v4 = vpack.c.bf16 %v35_v1, %v34_v0  ;;  %v40_v5 = vpack.c.bf16 %v36_v2, %v36_v2  ;;  %v5553_v7 = vld [vmem:[%s7903_s1] sm:$0x1f]  }
   0x4   :  { %5108 = vmatpush3.bf16.msra.mxu0 %v39_v4  ;;  %v52_v6 = vsel %vm50_vm0, %v40_v5, 0 }
   0x5   :  { %5109 = vmatprep.subr.bf16.mxu0 %v7914_v3 }
   0x8   :  { %5110 = vmatpush3.bf16.msra.mxu0 %v52_v6 }
   0xb   :  { %5112 = vmatmul.mubr.msk.bf16.vlgmr.msra.gmra.mrb[0].mxu0 %vm46_vm2, %v5553_v7 }
   0xc   :  { %14 = vsyncpa [#allocation3], 0  ;;  %v5554_v8 = vld [vmem:[%s7904_s2] sm:$0xff]   ;;  %vm109_vm3 = vcmask 80896   ;;  %vm116_vm4 = vcmask 1044480   ;;  %v5557_v41 = vld [vmem:[%s7905_s3 + $0x8] sm:$0xff]  }
   0xd   :  { %5117 = vmatprep.mubr.msk.bf16.mxu1 %vm109_vm3, %v5554_v8  ;;  %v5555_v17 = vld [vmem:[%s7904_s2 + $0x8] ss:$0 sps:$4 sm:$0x33]   ;;  %v5556_v40 = vld [vmem:[%s7905_s3] sm:$0xff]   ;;  %v5558_v42 = vld [vmem:[%s7905_s3 + $0x10] sm:$0xff]   ;;  %v7912_v52 = vmov 1.0  }
   0xe   :  { %v5559_v43 = vld [vmem:[%s7905_s3 + $0x18] sm:$0xff]   ;;  %v5560_v44 = vld [vmem:[%s7905_s3 + $0x20] sm:$0xff]   ;;  %v5561_v45 = vld [vmem:[%s7905_s3 + $0x28] sm:$0xff]   ;;  %5201 = vmatprep.subr.mxu0 %v7912_v52  ;;  %vm563_vm5 = vcmask 64512   ;;  %vm2492_vm6 = vcmask 359424   ;;  %vm2523_vm7 = vcmask 1045504  }
   0xf   :  { %v5562_v46 = vld [vmem:[%s7905_s3 + $0x30] sm:$0xff]   ;;  %v5563_v47 = vld [vmem:[%s7905_s3 + $0x38] sm:$0xff]   ;;  %v5564_v48 = vld [vmem:[%s7905_s3 + $0x40] sm:$0xff]   ;;  %5202 = vmatpush3.msra.mxu0 %v7912_v52  ;;  %vm3729_vm8 = vcmask 179200   ;;  %vm3742_vm9 = vcmask 1042432   ;;  %vm4249_vm10 = vcmask 1040384  }
  0x10   :  { %v5565_v49 = vld [vmem:[%s7905_s3 + $0x48] sm:$0xff]   ;;  %v5566_v50 = vld [vmem:[%s7905_s3 + $0x50] sm:$0xff]   ;;  %v5567_v51 = vld [vmem:[%s7905_s3 + $0x58] sm:$0xff]   ;;  %5260 = vmatprep.subr.mxu0 %v7912_v52  ;;  %vm4245_vm11 = vcmask 408576   ;;  %vm5795_vm12 = vmmov 1   ;;  %s5796_s17 = smov [#allocation2]  }
  0x11   :  { %v5568_v53 = vld [vmem:[%s7905_s3 + $0x60] sm:$0xff]   ;;  %v5569_v54 = vld [vmem:[%s7905_s3 + $0x68] sm:$0xff]   ;;  %v5570_v55 = vld [vmem:[%s7905_s3 + $0x70] sm:$0xff]   ;;  %s4603_s1 = sshll.u32 %s5796_s17, 4  ;;  %vm4595_vm14 = vcmask 57344   ;;  %s4604_s1 = int_to_ptr.vmem [resolvable:$true] %s4603_s1 }
  0x12   :  { %v5571_v56 = vld [vmem:[%s7905_s3 + $0x78] sm:$0xff]   ;;  %v5572_v57 = vld [vmem:[%s7905_s3 + $0x80] sm:$0xff]   ;;  %v5573_v58 = vld [vmem:[%s7905_s3 + $0x88] sm:$0xff]   ;;  %s5770_s18 = scalar_lea.vmem %s4604_s1, 32  ;;  %p5771_p1 = scmp.lt.s32.totalorder %s4604_s1, %s4604_s1 }
  0x13   :  { %v5574_v59 = vld [vmem:[%s7905_s3 + $0x90] sm:$0x3f]   ;;  %vm5540_vm13 = vmpackc.low %vm50_vm0, %vm5795_vm12 }
  0xde   :  { %v88_v9 = vpop.f32.mrb[0].mxu0 }
  0xdf   :  { %v5113_v10 = vpop.f32.mrb[1].mxu0  ;;  %v95_v12 = vmax.f32 %v88_v9, 0.0 }
  0xe0   :  { %v91_v11 = vpop.f32.mrb[2].mxu0 }
  0xe1   :  { %v96_v13 = vmax.f32 %v91_v11, 0.0  ;;  %v5114_v14 = vpop.f32.mrb[3].mxu0 }
  0xe3   :  { %v100_v15 = vpack.c.bf16 %v96_v13, %v95_v12 }
  0xe5   :  { %5542 = vmatprep.subr.msk.bf16.mxu1 %vm116_vm4, %v100_v15  ;;  %v118_v16 = vsel %vm116_vm4, %v100_v15, 0 }
  0xe6   :  { %5116 = vmatpush3.bf16.msra.mxu1 %v118_v16 }
  0xe7   :  { %5121 = vmatprep.subr.bf16.mxu1 %v7914_v3 }
  0xe9   :  { %5118 = vmatmul.mubr.msk.bf16.vlgmr.msra.gmra.mrb[0].mxu1 %vm109_vm3, %v5555_v17 }
  0xea   :  { %5125 = vmatprep.mubr.msk.bf16.mxu1 %vm5791_vm1, %v7914_v3 }
 0x1bc   :  { %v5119_v18 = vpop.f32.mrb[0].mxu1 }
 0x1bd   :  { %v170_v19 = vmul.f32 0.5, %v5119_v18  ;;  %v154_v20 = vpop.f32.mrb[1].mxu1 }
 0x1be   :  { %v168_v21 = vmul.f32 0.5, %v154_v20  ;;  %v5120_v22 = vpop.f32.mrb[2].mxu1 }
 0x1bf   :  { %5626 = vtanh.f32 %v170_v19  ;;  %v157_v23 = vpop.f32.mrb[3].mxu1 }
 0x1c0   :  { %5628 = vtanh.f32 %v168_v21  ;;  %v169_v24 = vmul.f32 0.5, %v157_v23 }
 0x1c2   :  { %5630 = vtanh.f32 %v169_v24 }
 0x1c9   :  { %v5627_v25 = vpop.eup %5626 }
 0x1ca   :  { %v5629_v26 = vpop.eup %5628  ;;  %v176_v27 = vmul.f32 0.5, %v5627_v25 }
 0x1cb   :  { %v174_v28 = vmul.f32 0.5, %v5629_v26 }
 0x1cc   :  { %v5631_v29 = vpop.eup %5630  ;;  %v179_v30 = vadd.f32 0.5, %v176_v27 }
 0x1cd   :  { %v177_v31 = vadd.f32 0.5, %v174_v28  ;;  %v175_v32 = vmul.f32 0.5, %v5631_v29 }
 0x1ce   :  { %v182_v34 = vmul.f32 %v179_v30, %v36_v2 }
 0x1cf   :  { %v178_v33 = vadd.f32 0.5, %v175_v32  ;;  %v180_v35 = vmul.f32 %v177_v31, %v34_v0 }
 0x1d0   :  { %v184_v38 = vpack.c.bf16 %v182_v34, %v182_v34 }
 0x1d1   :  { %v181_v36 = vmul.f32 %v178_v33, %v35_v1 }
 0x1d2   :  { %v376_v39 = vsel %vm50_vm0, %v184_v38, 0 }
 0x1d3   :  { %v183_v37 = vpack.c.bf16 %v181_v36, %v180_v35 }
 0x1d5   :  { %5122 = vmatpush3.bf16.msra.mxu1 %v183_v37 }
 0x1d6   :  { %5123 = vmatprep.subr.bf16.mxu1 %v7914_v3 }
 0x1d9   :  { %5124 = vmatpush3.bf16.msra.mxu1 %v376_v39 }
 0x1dc   :  { %5126 = vmatmul.mubr.msk.bf16.vlgmr.msra.gmra.mrb[4].mxu1 %vm46_vm2, %v5556_v40 }
 0x1dd   :  { %5129 = vmatprep.mubr.msk.bf16.mxu1 %vm5791_vm1, %v7914_v3 }
 0x1e4   :  { %5130 = vmatmul.mubr.msk.bf16.gmra.mrb[8].mxu1 %vm46_vm2, %v5557_v41 }
 0x1e5   :  { %5133 = vmatprep.mubr.msk.bf16.mxu1 %vm5791_vm1, %v7914_v3 }
 0x1ec   :  { %5134 = vmatmul.mubr.msk.bf16.gmra.mrb[12].mxu1 %vm46_vm2, %v5558_v42 }
 0x1ed   :  { %5137 = vmatprep.mubr.msk.bf16.mxu1 %vm5791_vm1, %v7914_v3 }
 0x1f4   :  { %5138 = vmatmul.mubr.msk.bf16.gmra.mrb[16].mxu1 %vm46_vm2, %v5559_v43 }
 0x1f5   :  { %5141 = vmatprep.mubr.msk.bf16.mxu1 %vm5791_vm1, %v7914_v3 }
 0x1fc   :  { %5142 = vmatmul.mubr.msk.bf16.gmra.mrb[20].mxu1 %vm46_vm2, %v5560_v44 }
 0x1fd   :  { %5145 = vmatprep.mubr.msk.bf16.mxu1 %vm5791_vm1, %v7914_v3 }
 0x204   :  { %5146 = vmatmul.mubr.msk.bf16.gmra.mrb[24].mxu1 %vm46_vm2, %v5561_v45 }
 0x205   :  { %5149 = vmatprep.mubr.msk.bf16.mxu1 %vm5791_vm1, %v7914_v3 }
 0x20c   :  { %5150 = vmatmul.mubr.msk.bf16.gmra.mrb[28].mxu1 %vm46_vm2, %v5562_v46 }
 0x20d   :  { %5153 = vmatprep.mubr.msk.bf16.mxu1 %vm5791_vm1, %v7914_v3 }
 0x214   :  { %5154 = vmatmul.mubr.msk.bf16.gmra.mrb[32].mxu1 %vm46_vm2, %v5563_v47 }
 0x215   :  { %5157 = vmatprep.mubr.msk.bf16.mxu1 %vm5791_vm1, %v7914_v3 }
 0x21c   :  { %5158 = vmatmul.mubr.msk.bf16.gmra.mrb[36].mxu1 %vm46_vm2, %v5564_v48 }
 0x21d   :  { %5161 = vmatprep.mubr.msk.bf16.mxu1 %vm5791_vm1, %v7914_v3 }
 0x224   :  { %5162 = vmatmul.mubr.msk.bf16.gmra.mrb[40].mxu1 %vm46_vm2, %v5565_v49 }
 0x225   :  { %5165 = vmatprep.mubr.msk.bf16.mxu1 %vm5791_vm1, %v7914_v3 }
 0x22c   :  { %5166 = vmatmul.mubr.msk.bf16.gmra.mrb[44].mxu1 %vm46_vm2, %v5566_v50 }
 0x22d   :  { %5169 = vmatprep.mubr.msk.bf16.mxu1 %vm5791_vm1, %v7914_v3 }
 0x234   :  { %5170 = vmatmul.mubr.msk.bf16.gmra.mrb[48].mxu1 %vm46_vm2, %v5567_v51 }
 0x235   :  { %5173 = vmatprep.mubr.msk.bf16.mxu1 %vm5791_vm1, %v7914_v3 }
 0x23c   :  { %5174 = vmatmul.mubr.msk.bf16.gmra.mrb[52].mxu1 %vm46_vm2, %v5568_v53 }
 0x23d   :  { %5177 = vmatprep.mubr.msk.bf16.mxu1 %vm5791_vm1, %v7914_v3 }
 0x244   :  { %5178 = vmatmul.mubr.msk.bf16.gmra.mrb[56].mxu1 %vm46_vm2, %v5569_v54 }
 0x245   :  { %5181 = vmatprep.mubr.msk.bf16.mxu1 %vm5791_vm1, %v7914_v3 }
 0x24c   :  { %5182 = vmatmul.mubr.msk.bf16.gmra.mrb[60].mxu1 %vm46_vm2, %v5570_v55 }
 0x24d   :  { %5185 = vmatprep.mubr.msk.bf16.mxu1 %vm5791_vm1, %v7914_v3 }
 0x254   :  { %5186 = vmatmul.mubr.msk.bf16.gmra.mrb[64].mxu1 %vm46_vm2, %v5571_v56 }
 0x255   :  { %5189 = vmatprep.mubr.msk.bf16.mxu1 %vm5791_vm1, %v7914_v3 }
 0x25c   :  { %5190 = vmatmul.mubr.msk.bf16.gmra.mrb[68].mxu1 %vm46_vm2, %v5572_v57 }
 0x25d   :  { %5193 = vmatprep.mubr.msk.bf16.mxu1 %vm5791_vm1, %v7914_v3 }
 0x264   :  { %5194 = vmatmul.mubr.msk.bf16.gmra.mrb[72].mxu1 %vm46_vm2, %v5573_v58 }
 0x265   :  { %5197 = vmatprep.mubr.msk.bf16.mxu1 %vm5791_vm1, %v7914_v3 }
 0x26c   :  { %5198 = vmatmul.mubr.msk.bf16.gmra.mrb[76].mxu1 %vm46_vm2, %v5574_v59 }
 0x2af   :  { %v5993_v60 = vpop.f32.mrb[4].mxu1 }
 0x2b0   :  { %7971 = vst [vmem:[#allocation5_spill] sm:$0xff] %v5993_v60  ;;  %v5127_v61 = vpop.f32.mrb[5].mxu1  ;;  %5203 = vmatprep.mubr.msk.f32.mxu0 %vm563_vm5, %v5993_v60 }
 0x2b1   :  { %v5997_v62 = vpop.f32.mrb[6].mxu1 }
 0x2b2   :  { %7972 = vst [vmem:[#allocation6_spill] sm:$0xff] %v5997_v62  ;;  %v5128_v63 = vpop.f32.mrb[7].mxu1  ;;  %5204 = vmatmul.mubr.msk.f32.vlgmr.msra.gmra.mrb[4].mxu0 %vm563_vm5, %v5997_v62 }
 0x2b3   :  { %5261 = vmatpush3.msra.mxu0 %v7912_v52 }
 0x2b7   :  { %v6002_v0 = vpop.f32.mrb[8].mxu1 }
 0x2b8   :  { %7973 = vst [vmem:[#allocation7_spill] sm:$0xff] %v6002_v0  ;;  %v5131_v1 = vpop.f32.mrb[9].mxu1  ;;  %5206 = vmatprep.mubr.msk.f32.mxu0 %vm563_vm5, %v6002_v0 }
 0x2b9   :  { %v6006_v2 = vpop.f32.mrb[10].mxu1 }
 0x2ba   :  { %7974 = vst [vmem:[#allocation8_spill] sm:$0xff] %v6006_v2  ;;  %v5132_v4 = vpop.f32.mrb[11].mxu1  ;;  %5207 = vmatmul.mubr.msk.f32.gmra.mrb[6].mxu0 %vm563_vm5, %v6006_v2 }
 0x2bf   :  { %v6010_v5 = vpop.f32.mrb[12].mxu1 }
 0x2c0   :  { %7975 = vst [vmem:[#allocation9_spill] sm:$0xff] %v6010_v5  ;;  %v5135_v6 = vpop.f32.mrb[13].mxu1  ;;  %5209 = vmatprep.mubr.msk.f32.mxu0 %vm563_vm5, %v6010_v5 }
 0x2c1   :  { %v6014_v7 = vpop.f32.mrb[14].mxu1 }
 0x2c2   :  { %7976 = vst [vmem:[#allocation10_spill] sm:$0xff] %v6014_v7  ;;  %v5136_v8 = vpop.f32.mrb[15].mxu1  ;;  %5210 = vmatmul.mubr.msk.f32.gmra.mrb[8].mxu0 %vm563_vm5, %v6014_v7 }
 0x2c7   :  { %v6018_v9 = vpop.f32.mrb[16].mxu1 }
 0x2c8   :  { %7977 = vst [vmem:[#allocation11_spill] sm:$0xff] %v6018_v9  ;;  %v5139_v10 = vpop.f32.mrb[17].mxu1  ;;  %5212 = vmatprep.mubr.msk.f32.mxu0 %vm563_vm5, %v6018_v9 }
 0x2c9   :  { %v6022_v11 = vpop.f32.mrb[18].mxu1 }
 0x2ca   :  { %7978 = vst [vmem:[#allocation12_spill] sm:$0xff] %v6022_v11  ;;  %v5140_v12 = vpop.f32.mrb[19].mxu1  ;;  %5213 = vmatmul.mubr.msk.f32.gmra.mrb[10].mxu0 %vm563_vm5, %v6022_v11 }
 0x2cf   :  { %v6026_v13 = vpop.f32.mrb[20].mxu1 }
 0x2d0   :  { %7979 = vst [vmem:[#allocation13_spill] sm:$0xff] %v6026_v13  ;;  %v5143_v14 = vpop.f32.mrb[21].mxu1  ;;  %5215 = vmatprep.mubr.msk.f32.mxu0 %vm563_vm5, %v6026_v13 }
 0x2d1   :  { %v6030_v15 = vpop.f32.mrb[22].mxu1 }
 0x2d2   :  { %7980 = vst [vmem:[#allocation14_spill] sm:$0xff] %v6030_v15  ;;  %v5144_v16 = vpop.f32.mrb[23].mxu1  ;;  %5216 = vmatmul.mubr.msk.f32.gmra.mrb[12].mxu0 %vm563_vm5, %v6030_v15 }
 0x2d7   :  { %v6034_v17 = vpop.f32.mrb[24].mxu1 }
 0x2d8   :  { %7981 = vst [vmem:[#allocation15_spill] sm:$0xff] %v6034_v17  ;;  %v5147_v18 = vpop.f32.mrb[25].mxu1  ;;  %5218 = vmatprep.mubr.msk.f32.mxu0 %vm563_vm5, %v6034_v17 }
 0x2d9   :  { %v6038_v19 = vpop.f32.mrb[26].mxu1 }
 0x2da   :  { %7982 = vst [vmem:[#allocation16_spill] sm:$0xff] %v6038_v19  ;;  %v5148_v20 = vpop.f32.mrb[27].mxu1  ;;  %5219 = vmatmul.mubr.msk.f32.gmra.mrb[14].mxu0 %vm563_vm5, %v6038_v19 }
 0x2df   :  { %v6042_v21 = vpop.f32.mrb[28].mxu1 }
 0x2e0   :  { %7983 = vst [vmem:[#allocation17_spill] sm:$0xff] %v6042_v21  ;;  %v5151_v22 = vpop.f32.mrb[29].mxu1  ;;  %5221 = vmatprep.mubr.msk.f32.mxu0 %vm563_vm5, %v6042_v21 }
 0x2e1   :  { %v6046_v23 = vpop.f32.mrb[30].mxu1  ;;  %v933_v22 = vmul.f32 %v5993_v60, %v5993_v60 }
 0x2e2   :  { %7984 = vst [vmem:[#allocation18_spill] sm:$0xff] %v6046_v23  ;;  %v5152_v24 = vpop.f32.mrb[31].mxu1  ;;  %5222 = vmatmul.mubr.msk.f32.gmra.mrb[16].mxu0 %vm563_vm5, %v6046_v23 }
 0x2e7   :  { %v6050_v25 = vpop.f32.mrb[32].mxu1 }
 0x2e8   :  { %7985 = vst [vmem:[#allocation19_spill] sm:$0xff] %v6050_v25  ;;  %v5155_v26 = vpop.f32.mrb[33].mxu1  ;;  %5224 = vmatprep.mubr.msk.f32.mxu0 %vm563_vm5, %v6050_v25 }
 0x2e9   :  { %v6054_v27 = vpop.f32.mrb[34].mxu1 }
 0x2ea   :  { %7986 = vst [vmem:[#allocation20_spill] sm:$0xff] %v6054_v27  ;;  %v5156_v28 = vpop.f32.mrb[35].mxu1  ;;  %5225 = vmatmul.mubr.msk.f32.gmra.mrb[18].mxu0 %vm563_vm5, %v6054_v27 }
 0x2eb   :  { %v934_v28 = vmul.f32 %v5997_v62, %v5997_v62 }
 0x2ef   :  { %v6058_v29 = vpop.f32.mrb[36].mxu1 }
 0x2f0   :  { %7987 = vst [vmem:[#allocation21_spill] sm:$0xff] %v6058_v29  ;;  %v5159_v30 = vpop.f32.mrb[37].mxu1  ;;  %5227 = vmatprep.mubr.msk.f32.mxu0 %vm563_vm5, %v6058_v29 }
 0x2f1   :  { %v6062_v31 = vpop.f32.mrb[38].mxu1  ;;  %v935_v30 = vmul.f32 %v6002_v0, %v6002_v0 }
 0x2f2   :  { %7988 = vst [vmem:[#allocation22_spill] sm:$0xff] %v6062_v31  ;;  %v5160_v32 = vpop.f32.mrb[39].mxu1  ;;  %5228 = vmatmul.mubr.msk.f32.gmra.mrb[20].mxu0 %vm563_vm5, %v6062_v31 }
 0x2f3   :  { %v936_v32 = vmul.f32 %v6006_v2, %v6006_v2 }
 0x2f7   :  { %v6066_v33 = vpop.f32.mrb[40].mxu1 }
 0x2f8   :  { %7989 = vst [vmem:[#allocation23_spill] sm:$0xff] %v6066_v33  ;;  %v5163_v34 = vpop.f32.mrb[41].mxu1  ;;  %5230 = vmatprep.mubr.msk.f32.mxu0 %vm563_vm5, %v6066_v33 }
 0x2f9   :  { %v6070_v35 = vpop.f32.mrb[42].mxu1  ;;  %v937_v34 = vmul.f32 %v6010_v5, %v6010_v5 }
 0x2fa   :  { %7990 = vst [vmem:[#allocation24_spill] sm:$0xff] %v6070_v35  ;;  %v5164_v36 = vpop.f32.mrb[43].mxu1  ;;  %5231 = vmatmul.mubr.msk.f32.gmra.mrb[22].mxu0 %vm563_vm5, %v6070_v35 }
 0x2fb   :  { %v938_v36 = vmul.f32 %v6014_v7, %v6014_v7 }
 0x2ff   :  { %v6074_v37 = vpop.f32.mrb[44].mxu1 }
 0x300   :  { %7991 = vst [vmem:[#allocation25_spill] sm:$0xff] %v6074_v37  ;;  %v5167_v38 = vpop.f32.mrb[45].mxu1  ;;  %5233 = vmatprep.mubr.msk.f32.mxu0 %vm563_vm5, %v6074_v37 }
 0x301   :  { %v6078_v39 = vpop.f32.mrb[46].mxu1  ;;  %v939_v38 = vmul.f32 %v6018_v9, %v6018_v9 }
 0x302   :  { %7992 = vst [vmem:[#allocation26_spill] sm:$0xff] %v6078_v39  ;;  %v5168_v40 = vpop.f32.mrb[47].mxu1  ;;  %5234 = vmatmul.mubr.msk.f32.gmra.mrb[24].mxu0 %vm563_vm5, %v6078_v39 }
 0x303   :  { %v940_v40 = vmul.f32 %v6022_v11, %v6022_v11 }
 0x307   :  { %v6082_v41 = vpop.f32.mrb[48].mxu1 }
 0x308   :  { %7993 = vst [vmem:[#allocation27_spill] sm:$0xff] %v6082_v41  ;;  %v5171_v42 = vpop.f32.mrb[49].mxu1  ;;  %5236 = vmatprep.mubr.msk.f32.mxu0 %vm563_vm5, %v6082_v41 }
 0x309   :  { %v6086_v43 = vpop.f32.mrb[50].mxu1  ;;  %v941_v42 = vmul.f32 %v6026_v13, %v6026_v13 }
 0x30a   :  { %7994 = vst [vmem:[#allocation28_spill] sm:$0xff] %v6086_v43  ;;  %v5172_v44 = vpop.f32.mrb[51].mxu1  ;;  %5237 = vmatmul.mubr.msk.f32.gmra.mrb[26].mxu0 %vm563_vm5, %v6086_v43 }
 0x30b   :  { %v942_v44 = vmul.f32 %v6030_v15, %v6030_v15 }
 0x30f   :  { %v6090_v45 = vpop.f32.mrb[52].mxu1 }
 0x310   :  { %7995 = vst [vmem:[#allocation29_spill] sm:$0xff] %v6090_v45  ;;  %v5175_v46 = vpop.f32.mrb[53].mxu1  ;;  %5239 = vmatprep.mubr.msk.f32.mxu0 %vm563_vm5, %v6090_v45 }
 0x311   :  { %v6094_v47 = vpop.f32.mrb[54].mxu1  ;;  %v943_v46 = vmul.f32 %v6034_v17, %v6034_v17 }
 0x312   :  { %7996 = vst [vmem:[#allocation30_spill] sm:$0xff] %v6094_v47  ;;  %v5176_v48 = vpop.f32.mrb[55].mxu1  ;;  %5240 = vmatmul.mubr.msk.f32.gmra.mrb[28].mxu0 %vm563_vm5, %v6094_v47 }
 0x313   :  { %v944_v48 = vmul.f32 %v6038_v19, %v6038_v19 }
 0x317   :  { %v6098_v49 = vpop.f32.mrb[56].mxu1 }
 0x318   :  { %7997 = vst [vmem:[#allocation31_spill] sm:$0xff] %v6098_v49  ;;  %v5179_v50 = vpop.f32.mrb[57].mxu1  ;;  %5242 = vmatprep.mubr.msk.f32.mxu0 %vm563_vm5, %v6098_v49 }
 0x319   :  { %v6102_v51 = vpop.f32.mrb[58].mxu1  ;;  %v945_v50 = vmul.f32 %v6042_v21, %v6042_v21 }
 0x31a   :  { %7998 = vst [vmem:[#allocation32_spill] sm:$0xff] %v6102_v51  ;;  %v5180_v53 = vpop.f32.mrb[59].mxu1  ;;  %5243 = vmatmul.mubr.msk.f32.gmra.mrb[30].mxu0 %vm563_vm5, %v6102_v51 }
 0x31b   :  { %v946_v53 = vmul.f32 %v6046_v23, %v6046_v23 }
 0x31f   :  { %v6106_v54 = vpop.f32.mrb[60].mxu1 }
 0x320   :  { %7999 = vst [vmem:[#allocation33_spill] sm:$0xff] %v6106_v54  ;;  %v5183_v55 = vpop.f32.mrb[61].mxu1  ;;  %5245 = vmatprep.mubr.msk.f32.mxu0 %vm563_vm5, %v6106_v54 }
 0x321   :  { %v6110_v56 = vpop.f32.mrb[62].mxu1  ;;  %v947_v55 = vmul.f32 %v6050_v25, %v6050_v25 }
 0x322   :  { %8000 = vst [vmem:[#allocation34_spill] sm:$0xff] %v6110_v56  ;;  %v5184_v57 = vpop.f32.mrb[63].mxu1  ;;  %5246 = vmatmul.mubr.msk.f32.gmra.mrb[32].mxu0 %vm563_vm5, %v6110_v56 }
 0x323   :  { %v948_v57 = vmul.f32 %v6054_v27, %v6054_v27 }
 0x327   :  { %v6114_v58 = vpop.f32.mrb[64].mxu1 }
 0x328   :  { %8001 = vst [vmem:[#allocation35_spill] sm:$0xff] %v6114_v58  ;;  %v5187_v59 = vpop.f32.mrb[65].mxu1  ;;  %5248 = vmatprep.mubr.msk.f32.mxu0 %vm563_vm5, %v6114_v58 }
 0x329   :  { %v6118_v61 = vpop.f32.mrb[66].mxu1  ;;  %v949_v59 = vmul.f32 %v6058_v29, %v6058_v29 }
 0x32a   :  { %8002 = vst [vmem:[#allocation36_spill] sm:$0xff] %v6118_v61  ;;  %v5188_v63 = vpop.f32.mrb[67].mxu1  ;;  %5249 = vmatmul.mubr.msk.f32.gmra.mrb[34].mxu0 %vm563_vm5, %v6118_v61 }
 0x32b   :  { %v950_v63 = vmul.f32 %v6062_v31, %v6062_v31 }
 0x32f   :  { %v6122_v1 = vpop.f32.mrb[68].mxu1 }
 0x330   :  { %8003 = vst [vmem:[#allocation37_spill] sm:$0xff] %v6122_v1  ;;  %v5191_v4 = vpop.f32.mrb[69].mxu1  ;;  %5251 = vmatprep.mubr.msk.f32.mxu0 %vm563_vm5, %v6122_v1 }
 0x331   :  { %v6126_v6 = vpop.f32.mrb[70].mxu1  ;;  %v951_v4 = vmul.f32 %v6066_v33, %v6066_v33 }
 0x332   :  { %8004 = vst [vmem:[#allocation38_spill] sm:$0xff] %v6126_v6  ;;  %v5192_v8 = vpop.f32.mrb[71].mxu1  ;;  %5252 = vmatmul.mubr.msk.f32.gmra.mrb[36].mxu0 %vm563_vm5, %v6126_v6 }
 0x333   :  { %v952_v8 = vmul.f32 %v6070_v35, %v6070_v35 }
 0x337   :  { %v6130_v10 = vpop.f32.mrb[72].mxu1 }
 0x338   :  { %8005 = vst [vmem:[#allocation39_spill] sm:$0xff] %v6130_v10  ;;  %v5195_v12 = vpop.f32.mrb[73].mxu1  ;;  %5254 = vmatprep.mubr.msk.f32.mxu0 %vm563_vm5, %v6130_v10 }
 0x339   :  { %v6134_v14 = vpop.f32.mrb[74].mxu1  ;;  %v953_v12 = vmul.f32 %v6074_v37, %v6074_v37 }
 0x33a   :  { %8006 = vst [vmem:[#allocation40_spill] sm:$0xff] %v6134_v14  ;;  %v5196_v16 = vpop.f32.mrb[75].mxu1  ;;  %5255 = vmatmul.mubr.msk.f32.gmra.mrb[38].mxu0 %vm563_vm5, %v6134_v14 }
 0x33b   :  { %v954_v16 = vmul.f32 %v6078_v39, %v6078_v39 }
 0x33f   :  { %v6138_v18 = vpop.f32.mrb[76].mxu1 }
 0x340   :  { %8007 = vst [vmem:[#allocation41_spill] sm:$0xff] %v6138_v18  ;;  %v5199_v20 = vpop.f32.mrb[77].mxu1  ;;  %5257 = vmatprep.mubr.msk.f32.mxu0 %vm563_vm5, %v6138_v18 }
 0x341   :  { %v6144_v24 = vpop.f32.mrb[78].mxu1  ;;  %v955_v20 = vmul.f32 %v6082_v41, %v6082_v41 }
 0x342   :  { %8008 = vst [vmem:[#allocation42_spill] sm:$0xff] %v6144_v24  ;;  %v5200_v26 = vpop.f32.mrb[79].mxu1  ;;  %5258 = vmatmul.mubr.msk.f32.gmra.mrb[40].mxu0 %vm563_vm5, %v6144_v24 }
 0x343   :  { %5262 = vmatprep.mubr.msk.f32.mxu0 %vm563_vm5, %v933_v22  ;;  %v956_v22 = vmul.f32 %v6086_v43, %v6086_v43  ;;  %v957_v26 = vmul.f32 %v6090_v45, %v6090_v45 }
 0x346   :  { %5263 = vmatmul.mubr.msk.f32.vlgmr.msra.gmra.mrb[42].mxu0 %vm563_vm5, %v934_v28  ;;  %v958_v28 = vmul.f32 %v6094_v47, %v6094_v47 }
 0x347   :  { %5265 = vmatprep.mubr.msk.f32.mxu0 %vm563_vm5, %v935_v30  ;;  %v959_v30 = vmul.f32 %v6098_v49, %v6098_v49 }
 0x34a   :  { %5266 = vmatmul.mubr.msk.f32.gmra.mrb[44].mxu0 %vm563_vm5, %v936_v32  ;;  %v960_v32 = vmul.f32 %v6102_v51, %v6102_v51 }
 0x34b   :  { %5268 = vmatprep.mubr.msk.f32.mxu0 %vm563_vm5, %v937_v34  ;;  %v961_v34 = vmul.f32 %v6106_v54, %v6106_v54 }
 0x34e   :  { %5269 = vmatmul.mubr.msk.f32.gmra.mrb[46].mxu0 %vm563_vm5, %v938_v36  ;;  %v962_v36 = vmul.f32 %v6110_v56, %v6110_v56 }
 0x34f   :  { %5271 = vmatprep.mubr.msk.f32.mxu0 %vm563_vm5, %v939_v38  ;;  %v963_v38 = vmul.f32 %v6114_v58, %v6114_v58 }
 0x352   :  { %5272 = vmatmul.mubr.msk.f32.gmra.mrb[48].mxu0 %vm563_vm5, %v940_v40  ;;  %v964_v40 = vmul.f32 %v6118_v61, %v6118_v61 }
 0x353   :  { %5274 = vmatprep.mubr.msk.f32.mxu0 %vm563_vm5, %v941_v42  ;;  %v965_v42 = vmul.f32 %v6122_v1, %v6122_v1 }
 0x356   :  { %5275 = vmatmul.mubr.msk.f32.gmra.mrb[50].mxu0 %vm563_vm5, %v942_v44  ;;  %v966_v44 = vmul.f32 %v6126_v6, %v6126_v6 }
 0x357   :  { %5277 = vmatprep.mubr.msk.f32.mxu0 %vm563_vm5, %v943_v46  ;;  %v967_v46 = vmul.f32 %v6130_v10, %v6130_v10 }
 0x35a   :  { %5278 = vmatmul.mubr.msk.f32.gmra.mrb[52].mxu0 %vm563_vm5, %v944_v48 }
 0x35b   :  { %5280 = vmatprep.mubr.msk.f32.mxu0 %vm563_vm5, %v945_v50 }
 0x35e   :  { %5281 = vmatmul.mubr.msk.f32.gmra.mrb[54].mxu0 %vm563_vm5, %v946_v53  ;;  %v968_v53 = vmul.f32 %v6134_v14, %v6134_v14 }
 0x35f   :  { %5283 = vmatprep.mubr.msk.f32.mxu0 %vm563_vm5, %v947_v55  ;;  %v969_v55 = vmul.f32 %v6138_v18, %v6138_v18 }
 0x362   :  { %5284 = vmatmul.mubr.msk.f32.gmra.mrb[56].mxu0 %vm563_vm5, %v948_v57  ;;  %v970_v57 = vmul.f32 %v6144_v24, %v6144_v24 }
 0x363   :  { %5286 = vmatprep.mubr.msk.f32.mxu0 %vm563_vm5, %v949_v59 }
 0x366   :  { %5287 = vmatmul.mubr.msk.f32.gmra.mrb[58].mxu0 %vm563_vm5, %v950_v63 }
 0x367   :  { %5289 = vmatprep.mubr.msk.f32.mxu0 %vm563_vm5, %v951_v4 }
 0x36a   :  { %5290 = vmatmul.mubr.msk.f32.gmra.mrb[60].mxu0 %vm563_vm5, %v952_v8 }
 0x36b   :  { %5292 = vmatprep.mubr.msk.f32.mxu0 %vm563_vm5, %v953_v12 }
 0x36e   :  { %5293 = vmatmul.mubr.msk.f32.gmra.mrb[62].mxu0 %vm563_vm5, %v954_v16 }
 0x36f   :  { %5295 = vmatprep.mubr.msk.f32.mxu0 %vm563_vm5, %v955_v20 }
 0x372   :  { %5296 = vmatmul.mubr.msk.f32.gmra.mrb[64].mxu0 %vm563_vm5, %v956_v22 }
 0x373   :  { %5298 = vmatprep.mubr.msk.f32.mxu0 %vm563_vm5, %v957_v26 }
 0x376   :  { %5299 = vmatmul.mubr.msk.f32.gmra.mrb[66].mxu0 %vm563_vm5, %v958_v28 }
 0x377   :  { %5301 = vmatprep.mubr.msk.f32.mxu0 %vm563_vm5, %v959_v30  ;;  %v7917_v30 = vmov 0  }
 0x378   :  { %5551 = vset.pattern.permute.xlu1 %v7917_v30  ;;  %5552 = vset.pattern.permute.xlu0 %v7917_v30 }
 0x37a   :  { %5302 = vmatmul.mubr.msk.f32.gmra.mrb[68].mxu0 %vm563_vm5, %v960_v32 }
 0x37b   :  { %5304 = vmatprep.mubr.msk.f32.mxu0 %vm563_vm5, %v961_v34 }
 0x37e   :  { %5305 = vmatmul.mubr.msk.f32.gmra.mrb[70].mxu0 %vm563_vm5, %v962_v36 }
 0x37f   :  { %5307 = vmatprep.mubr.msk.f32.mxu0 %vm563_vm5, %v963_v38 }
 0x382   :  { %5308 = vmatmul.mubr.msk.f32.gmra.mrb[72].mxu0 %vm563_vm5, %v964_v40 }
 0x383   :  { %5310 = vmatprep.mubr.msk.f32.mxu0 %vm563_vm5, %v965_v42 }
 0x385   :  { %v5205_v48 = vpop.f32.mrb[4].mxu0 }
 0x386   :  { %v744_v50 = vpop.f32.mrb[5].mxu0  ;;  %5311 = vmatmul.mubr.msk.f32.gmra.mrb[74].mxu0 %vm563_vm5, %v966_v44  ;;  %v6292_v49 = vmul.f32 0.125, %v5205_v48 }
 0x387   :  { %5313 = vmatprep.mubr.msk.f32.mxu0 %vm563_vm5, %v967_v46  ;;  %v6294_v51 = vmul.f32 0.125, %v744_v50 }
 0x388   :  { %v1417_v48 = vmul.f32 %v6292_v49, %v6292_v49 }
 0x389   :  { %v1416_v50 = vmul.f32 %v6294_v51, %v6294_v51 }
 0x38a   :  { %5314 = vmatmul.mubr.msk.f32.gmra.mrb[76].mxu0 %vm563_vm5, %v968_v53 }
 0x38b   :  { %5316 = vmatprep.mubr.msk.f32.mxu0 %vm563_vm5, %v969_v55 }
 0x38d   :  { %v5208_v59 = vpop.f32.mrb[6].mxu0 }
 0x38e   :  { %v754_v63 = vpop.f32.mrb[7].mxu0  ;;  %5317 = vmatmul.mubr.msk.f32.gmra.mrb[78].mxu0 %vm563_vm5, %v970_v57  ;;  %v6296_v45 = vmul.f32 0.125, %v5208_v59 }
 0x38f   :  { %v6298_v47 = vmul.f32 0.125, %v754_v63 }
 0x395   :  { %v5211_v4 = vpop.f32.mrb[8].mxu0 }
 0x396   :  { %v764_v8 = vpop.f32.mrb[9].mxu0  ;;  %v6300_v41 = vmul.f32 0.125, %v5211_v4 }
 0x397   :  { %v6302_v43 = vmul.f32 0.125, %v764_v8  ;;  %v1419_v8 = vmul.f32 %v6296_v45, %v6296_v45 }
 0x398   :  { %v6330_v29 = vmul.f32 %v6300_v41, %v6300_v41 }
 0x399   :  { %v6340_v25 = vmul.f32 %v6302_v43, %v6302_v43 }
 0x39d   :  { %v5214_v12 = vpop.f32.mrb[10].mxu0 }
 0x39e   :  { %v774_v16 = vpop.f32.mrb[11].mxu0  ;;  %v6304_v37 = vmul.f32 0.125, %v5214_v12  ;;  %v1418_v12 = vmul.f32 %v6298_v47, %v6298_v47 }
 0x39f   :  { %v6306_v39 = vmul.f32 0.125, %v774_v16 }
 0x3a5   :  { %v5217_v20 = vpop.f32.mrb[12].mxu0 }
 0x3a6   :  { %v784_v22 = vpop.f32.mrb[13].mxu0  ;;  %v6314_v59 = vmul.f32 0.125, %v5217_v20 }
 0x3a7   :  { %v6316_v63 = vmul.f32 0.125, %v784_v22 }
 0x3ad   :  { %v5220_v26 = vpop.f32.mrb[14].mxu0 }
 0x3ae   :  { %v794_v28 = vpop.f32.mrb[15].mxu0  ;;  %v6324_v16 = vmul.f32 0.125, %v5220_v26  ;;  %v6344_v26 = vmul.f32 %v6304_v37, %v6304_v37 }
 0x3af   :  { %v6326_v35 = vmul.f32 0.125, %v794_v28  ;;  %v6348_v28 = vmul.f32 %v6306_v39, %v6306_v39 }
 0x3b0   :  { %v6364_v17 = vmul.f32 %v6324_v16, %v6324_v16 }
 0x3b5   :  { %v5223_v32 = vpop.f32.mrb[16].mxu0 }
 0x3b6   :  { %v804_v34 = vpop.f32.mrb[17].mxu0  ;;  %v6332_v20 = vmul.f32 0.125, %v5223_v32 }
 0x3b7   :  { %v6334_v22 = vmul.f32 0.125, %v804_v34  ;;  %v6354_v34 = vmul.f32 %v6314_v59, %v6314_v59 }
 0x3b8   :  { %v6374_v11 = vmul.f32 %v6332_v20, %v6332_v20 }
 0x3bd   :  { %v5226_v36 = vpop.f32.mrb[18].mxu0 }
 0x3be   :  { %v814_v38 = vpop.f32.mrb[19].mxu0  ;;  %v6336_v31 = vmul.f32 0.125, %v5226_v36  ;;  %v6358_v36 = vmul.f32 %v6316_v63, %v6316_v63 }
 0x3bf   :  { %v6350_v27 = vmul.f32 0.125, %v814_v38  ;;  %v6368_v38 = vmul.f32 %v6326_v35, %v6326_v35 }
 0x3c1   :  { %8011 = vst [vmem:[#allocation45_spill] sm:$0xff] %v6350_v27  ;;  %v6386_v7 = vmul.f32 %v6350_v27, %v6350_v27 }
 0x3c5   :  { %v5229_v40 = vpop.f32.mrb[20].mxu0 }
 0x3c6   :  { %v824_v42 = vpop.f32.mrb[21].mxu0  ;;  %v6360_v23 = vmul.f32 0.125, %v5229_v40  ;;  %v6378_v40 = vmul.f32 %v6334_v22, %v6334_v22 }
 0x3c7   :  { %v6370_v15 = vmul.f32 0.125, %v824_v42 }
 0x3c8   :  { %v6394_v0 = vmul.f32 %v6360_v23, %v6360_v23 }
 0x3c9   :  { %8012 = vst [vmem:[#allocation46_spill] sm:$0xff] %v6370_v15 }
 0x3cd   :  { %v5232_v44 = vpop.f32.mrb[22].mxu0 }
 0x3ce   :  { %v834_v46 = vpop.f32.mrb[23].mxu0  ;;  %v6388_v42 = vmul.f32 0.125, %v5232_v44 }
 0x3d0   :  { %8013 = vst [vmem:[#allocation47_spill] sm:$0xff] %v6388_v42 }
 0x3d5   :  { %v5235_v53 = vpop.f32.mrb[24].mxu0 }
 0x3d6   :  { %v6262_v55 = vpop.f32.mrb[25].mxu0  ;;  %v6396_v62 = vmul.f32 0.125, %v5235_v53 }
 0x3d7   :  { %v6403_v44 = vmul.f32 0.125, %v6262_v55 }
 0x3d8   :  { %8015 = vst [vmem:[#allocation49_spill] sm:$0xff] %v6396_v62 }
 0x3d9   :  { %8016 = vst [vmem:[#allocation50_spill] sm:$0xff] %v6403_v44 }
 0x3dd   :  { %v6264_v57 = vpop.f32.mrb[26].mxu0 }
 0x3de   :  { %v6266_v52 = vpop.f32.mrb[27].mxu0 }
 0x3e5   :  { %v6268_v3 = vpop.f32.mrb[28].mxu0 }
 0x3e6   :  { %v6270_v18 = vpop.f32.mrb[29].mxu0 }
 0x3ed   :  { %v6272_v30 = vpop.f32.mrb[30].mxu0 }
 0x3ee   :  { %v6274_v24 = vpop.f32.mrb[31].mxu0 }
 0x3f5   :  { %v6276_v10 = vpop.f32.mrb[32].mxu0 }
 0x3f6   :  { %v6278_v14 = vpop.f32.mrb[33].mxu0 }
 0x3fd   :  { %v6280_v1 = vpop.f32.mrb[34].mxu0 }
 0x3fe   :  { %v6282_v6 = vpop.f32.mrb[35].mxu0 }
 0x405   :  { %v6284_v58 = vpop.f32.mrb[36].mxu0 }
 0x406   :  { %v6286_v61 = vpop.f32.mrb[37].mxu0 }
 0x40d   :  { %v6288_v54 = vpop.f32.mrb[38].mxu0 }
 0x40e   :  { %v6290_v56 = vpop.f32.mrb[39].mxu0 }
 0x415   :  { %v6308_v33 = vpop.f32.mrb[40].mxu0 }
 0x416   :  { %8009 = vst [vmem:[#allocation43_spill] sm:$0xff] %v6308_v33  ;;  %v6318_v4 = vpop.f32.mrb[41].mxu0 }
 0x417   :  { %8010 = vst [vmem:[#allocation44_spill] sm:$0xff] %v6318_v4 }
 0x419   :  { %v5264_v32 = vpop.f32.mrb[42].mxu0 }
 0x41a   :  { %v1379_v21 = vmul.f32 0.125, %v5264_v32  ;;  %v1151_v19 = vpop.f32.mrb[43].mxu0  ;;  %v6382_v32 = vmul.f32 %v6336_v31, %v6336_v31 }
 0x41b   :  { %v1378_v13 = vmul.f32 0.125, %v1151_v19  ;;  %v6390_v19 = vmul.f32 0.125, %v834_v46 }
 0x41c   :  { %v1455_v9 = vsub.f32 %v1379_v21, %v1417_v48  ;;  %v6400_v21 = vmul.f32 %v6370_v15, %v6370_v15 }
 0x41d   :  { %8014 = vst [vmem:[#allocation48_spill] sm:$0xff] %v6390_v19  ;;  %v1454_v5 = vsub.f32 %v1378_v13, %v1416_v50  ;;  %v5267_v2 = vpop.f32.mrb[44].mxu0  ;;  %v6406_v13 = vmul.f32 0.125, %v6264_v57  ;;  %v6409_v50 = vmul.f32 0.125, %v6266_v52 }
 0x41e   :  { %v1493_v60 = vmax.f32 %v1455_v9, 0.0  ;;  %v1381_v4 = vmul.f32 0.125, %v5267_v2  ;;  %v1161_v33 = vpop.f32.mrb[45].mxu0  ;;  %v6413_v2 = vmul.f32 %v6388_v42, %v6388_v42  ;;  %v6417_v9 = vmul.f32 %v6390_v19, %v6390_v19 }
 0x41f   :  { %v1492_v46 = vmax.f32 %v1454_v5, 0.0  ;;  %v1380_v48 = vmul.f32 0.125, %v1161_v33  ;;  %8017 = vst [vmem:[#allocation51_spill] sm:$0xff] %v6406_v13  ;;  %8018 = vst [vmem:[#allocation52_spill] sm:$0xff] %v6409_v50  ;;  %v6421_v33 = vmul.f32 %v6396_v62, %v6396_v62 }
 0x420   :  { %v1607_v53 = vadd.f32 1e-05, %v1493_v60  ;;  %v1457_v27 = vsub.f32 %v1381_v4, %v1419_v8  ;;  %v6425_v4 = vmul.f32 %v6403_v44, %v6403_v44 }
 0x421   :  { %v1606_v55 = vadd.f32 1e-05, %v1492_v46  ;;  %v1456_v15 = vsub.f32 %v1380_v48, %v1418_v12  ;;  %v5270_v5 = vpop.f32.mrb[46].mxu0  ;;  %v6429_v46 = vmul.f32 %v6406_v13, %v6406_v13  ;;  %v6433_v12 = vmul.f32 %v6409_v50, %v6409_v50 }
 0x422   :  { %5632 = vrsqrt.f32 %v1607_v53  ;;  %v1495_v52 = vmax.f32 %v1457_v27, 0.0  ;;  %v1383_v57 = vmul.f32 0.125, %v5270_v5  ;;  %v1171_v60 = vpop.f32.mrb[47].mxu0  ;;  %v6437_v53 = vmul.f32 0.125, %v6268_v3 }
 0x423   :  { %5634 = vrsqrt.f32 %v1606_v55  ;;  %v1494_v8 = vmax.f32 %v1456_v15, 0.0  ;;  %v1382_v42 = vmul.f32 0.125, %v1171_v60  ;;  %v6440_v5 = vmul.f32 0.125, %v6270_v18 }
 0x424   :  { %v1609_v48 = vadd.f32 1e-05, %v1495_v52  ;;  %v1459_v27 = vsub.f32 %v1383_v57, %v6330_v29  ;;  %8019 = vst [vmem:[#allocation53_spill] sm:$0xff] %v6437_v53  ;;  %v6444_v13 = vmul.f32 0.125, %v6272_v30  ;;  %v6447_v52 = vmul.f32 0.125, %v6274_v24 }
 0x425   :  { %8020 = vst [vmem:[#allocation54_spill] sm:$0xff] %v6440_v5  ;;  %v1608_v55 = vadd.f32 1e-05, %v1494_v8  ;;  %v1458_v15 = vsub.f32 %v1382_v42, %v6340_v25  ;;  %v5273_v60 = vpop.f32.mrb[48].mxu0  ;;  %v6450_v18 = vmul.f32 0.125, %v6276_v10  ;;  %v6453_v57 = vmul.f32 0.125, %v6278_v14 }
 0x426   :  { %8021 = vst [vmem:[#allocation55_spill] sm:$0xff] %v6444_v13  ;;  %5636 = vrsqrt.f32 %v1609_v48  ;;  %v1497_v44 = vmax.f32 %v1459_v27, 0.0  ;;  %v1385_v50 = vmul.f32 0.125, %v5273_v60  ;;  %v1181_v62 = vpop.f32.mrb[49].mxu0  ;;  %8022 = vst [vmem:[#allocation56_spill] sm:$0xff] %v6447_v52  ;;  %v6458_v42 = vmul.f32 %v6437_v53, %v6437_v53 }
 0x427   :  { %5638 = vrsqrt.f32 %v1608_v55  ;;  %v1496_v3 = vmax.f32 %v1458_v15, 0.0  ;;  %v1384_v29 = vmul.f32 0.125, %v1181_v62  ;;  %8023 = vst [vmem:[#allocation57_spill] sm:$0xff] %v6450_v18  ;;  %8024 = vst [vmem:[#allocation58_spill] sm:$0xff] %v6453_v57  ;;  %v6462_v24 = vmul.f32 %v6440_v5, %v6440_v5  ;;  %v1530_v15 = vld [vmem:[%s7910_s8] sm:$0xff] }
 0x428   :  { %v1611_v25 = vadd.f32 1e-05, %v1497_v44  ;;  %v1461_v30 = vsub.f32 %v1385_v50, %v6344_v26  ;;  %v6467_v10 = vmul.f32 %v6444_v13, %v6444_v13  ;;  %v1531_v50 = vld [vmem:[%s7910_s8 + $0x8] sm:$0xff]  ;;  %v6474_v27 = vmul.f32 %v6447_v52, %v6447_v52 }
 0x429   :  { %v1610_v8 = vadd.f32 1e-05, %v1496_v3  ;;  %v1460_v62 = vsub.f32 %v1384_v29, %v6348_v28  ;;  %v5276_v48 = vpop.f32.mrb[50].mxu0  ;;  %v6481_v3 = vmul.f32 %v6450_v18, %v6450_v18  ;;  %v6485_v29 = vmul.f32 %v6453_v57, %v6453_v57 }
 0x42a   :  { %5640 = vrsqrt.f32 %v1611_v25  ;;  %v1499_v14 = vmax.f32 %v1461_v30, 0.0  ;;  %v1387_v44 = vmul.f32 0.125, %v5276_v48  ;;  %v1191_v26 = vpop.f32.mrb[51].mxu0 }
 0x42b   :  { %5642 = vrsqrt.f32 %v1610_v8  ;;  %v1498_v55 = vmax.f32 %v1460_v62, 0.0  ;;  %v1386_v28 = vmul.f32 0.125, %v1191_v26  ;;  %v6489_v8 = vmul.f32 0.125, %v6280_v1 }
 0x42c   :  { %v5633_v60 = vpop.eup %5632  ;;  %v1613_v25 = vadd.f32 1e-05, %v1499_v14  ;;  %v1463_v30 = vsub.f32 %v1387_v44, %v6354_v34  ;;  %v1533_v14 = vld [vmem:[%s7910_s8 + $0x18] sm:$0xff] }
 0x42d   :  { %v5635_v48 = vpop.eup %5634  ;;  %8025 = vst [vmem:[#allocation59_spill] sm:$0xff] %v6489_v8  ;;  %v1612_v62 = vadd.f32 1e-05, %v1498_v55  ;;  %v1462_v26 = vsub.f32 %v1386_v28, %v6358_v36  ;;  %v5279_v52 = vpop.f32.mrb[52].mxu0  ;;  %v1683_v13 = vmul.f32 %v5633_v60, %v1531_v50  ;;  %v1568_v36 = vld [vmem:[%s7910_s8 + $0x210] sm:$0xff]  ;;  %v6500_v55 = vmul.f32 0.125, %v6282_v6 }
 0x42e   :  { %5644 = vrsqrt.f32 %v1613_v25  ;;  %v1501_v5 = vmax.f32 %v1463_v30, 0.0  ;;  %v1389_v18 = vmul.f32 0.125, %v5279_v52  ;;  %v1201_v53 = vpop.f32.mrb[53].mxu0  ;;  %v1682_v19 = vmul.f32 %v5635_v48, %v1530_v15  ;;  %v1569_v6 = vld [vmem:[%s7910_s8 + $0x218] sm:$0xff] }
 0x42f   :  { %5646 = vrsqrt.f32 %v1612_v62  ;;  %v1500_v34 = vmax.f32 %v1462_v26, 0.0  ;;  %v1388_v44 = vmul.f32 0.125, %v1201_v53  ;;  %1803 = vperm.xlu1 %5551, %v1683_v13   ;;  %v1721_v1 = vmul.f32 %v1683_v13, %v6292_v49  ;;  %v1532_v53 = vld [vmem:[%s7910_s8 + $0x10] sm:$0xff]  ;;  %v1535_v62 = vld [vmem:[%s7910_s8 + $0x28] sm:$0xff] }
 0x430   :  { %v5637_v50 = vpop.eup %5636  ;;  %v1615_v52 = vadd.f32 1e-05, %v1501_v5  ;;  %v1465_v28 = vsub.f32 %v1389_v18, %v6364_v17  ;;  %v1720_v15 = vmul.f32 %v1682_v19, %v6294_v51  ;;  %v6509_v49 = vmul.f32 %v6489_v8, %v6489_v8 }
 0x431   :  { %v5639_v60 = vpop.eup %5638  ;;  %v1614_v13 = vadd.f32 1e-05, %v1500_v34  ;;  %v1464_v25 = vsub.f32 %v1388_v44, %v6368_v38  ;;  %v5282_v30 = vpop.f32.mrb[54].mxu0  ;;  %v1685_v17 = vmul.f32 %v5637_v50, %v1533_v14  ;;  %v1759_v14 = vsub.f32 %v1569_v6, %v1721_v1 }
 0x432   :  { %5648 = vrsqrt.f32 %v1615_v52  ;;  %v1503_v51 = vmax.f32 %v1465_v28, 0.0  ;;  %v1391_v5 = vmul.f32 0.125, %v5282_v30  ;;  %v1211_v18 = vpop.f32.mrb[55].mxu0  ;;  %v1758_v48 = vsub.f32 %v1568_v36, %v1720_v15 }
 0x433   :  { %5650 = vrsqrt.f32 %v1614_v13  ;;  %v1502_v26 = vmax.f32 %v1464_v25, 0.0  ;;  %v1390_v34 = vmul.f32 0.125, %v1211_v18  ;;  %1798 = vperm.xlu1 %5551, %v1682_v19   ;;  %v1684_v38 = vmul.f32 %v5639_v60, %v1532_v53  ;;  %v1534_v19 = vld [vmem:[%s7910_s8 + $0x20] sm:$0xff] }
 0x434   :  { %v5641_v44 = vpop.eup %5640  ;;  %v1617_v8 = vadd.f32 1e-05, %v1503_v51  ;;  %v1467_v57 = vsub.f32 %v1391_v5, %v6374_v11  ;;  %2026 = vperm.xlu0 %5552, %v1758_v48   ;;  %v6520_v50 = vmul.f32 %v1685_v17, %v6296_v45  ;;  %v6531_v11 = vmul.f32 %v6500_v55, %v6500_v55 }
 0x435   :  { %v5643_v52 = vpop.eup %5642  ;;  %v1616_v36 = vadd.f32 1e-05, %v1502_v26  ;;  %v1466_v28 = vsub.f32 %v1390_v34, %v6378_v40  ;;  %v5285_v15 = vpop.f32.mrb[56].mxu0  ;;  %v1722_v13 = vmul.f32 %v1684_v38, %v6298_v47  ;;  %v6527_v53 = vmul.f32 %v5641_v44, %v1535_v62  ;;  %v1570_v40 = vld [vmem:[%s7910_s8 + $0x220] sm:$0xff]  ;;  %v1537_v47 = vld [vmem:[%s7910_s8 + $0x38] sm:$0xff]  ;;  %v1571_v44 = vld [vmem:[%s7910_s8 + $0x228] sm:$0xff] }
 0x436   :  { %5652 = vrsqrt.f32 %v1617_v8  ;;  %v1505_v45 = vmax.f32 %v1467_v57, 0.0  ;;  %v1393_v1 = vmul.f32 0.125, %v5285_v15  ;;  %v1221_v60 = vpop.f32.mrb[57].mxu0  ;;  %v6540_v25 = vmul.f32 0.125, %v6284_v58 }
 0x437   :  { %5654 = vrsqrt.f32 %v1616_v36  ;;  %v1504_v30 = vmax.f32 %v1466_v28, 0.0  ;;  %v1392_v6 = vmul.f32 0.125, %v1221_v60  ;;  %2031 = vperm.xlu1 %5551, %v1759_v14   ;;  %v1686_v5 = vmul.f32 %v5643_v52, %v1534_v19 }
 0x438   :  { %v5645_v51 = vpop.eup %5644  ;;  %v1619_v8 = vadd.f32 1e-05, %v1505_v45  ;;  %v1469_v57 = vsub.f32 %v1393_v1, %v6382_v32  ;;  %1808 = vperm.xlu0 %5552, %v1684_v38   ;;  %v6545_v18 = vmul.f32 %v6527_v53, %v6300_v41  ;;  %v1760_v34 = vsub.f32 %v1570_v40, %v1722_v13  ;;  %v1536_v32 = vld [vmem:[%s7910_s8 + $0x30] sm:$0xff] }
 0x439   :  { %v5647_v48 = vpop.eup %5646  ;;  %v1618_v62 = vadd.f32 1e-05, %v1504_v30  ;;  %v1468_v26 = vsub.f32 %v1392_v6, %v6386_v7  ;;  %v5288_v58 = vpop.f32.mrb[58].mxu0  ;;  %v6554_v38 = vmul.f32 %v5645_v51, %v1537_v47  ;;  %v1724_v36 = vmul.f32 %v1686_v5, %v6302_v43  ;;  %v1539_v7 = vld [vmem:[%s7910_s8 + $0x48] sm:$0xff] }
 0x43a   :  { %5656 = vrsqrt.f32 %v1619_v8  ;;  %v1507_v14 = vmax.f32 %v1469_v57, 0.0  ;;  %v1395_v41 = vmul.f32 0.125, %v5288_v58  ;;  %v1231_v52 = vpop.f32.mrb[59].mxu0  ;;  %v6561_v28 = vmul.f32 0.125, %v6286_v61  ;;  %v1572_v61 = vld [vmem:[%s7910_s8 + $0x230] sm:$0xff] }
 0x43b   :  { %5658 = vrsqrt.f32 %v1618_v62  ;;  %v1506_v15 = vmax.f32 %v1468_v26, 0.0  ;;  %v1394_v13 = vmul.f32 0.125, %v1231_v52  ;;  %1813 = vperm.xlu1 %5551, %v1685_v17   ;;  %v1761_v60 = vsub.f32 %v1571_v44, %v6520_v50 }
 0x43c   :  { %v5649_v19 = vpop.eup %5648  ;;  %v1621_v45 = vadd.f32 1e-05, %v1507_v14  ;;  %v1471_v1 = vsub.f32 %v1395_v41, %v6394_v0  ;;  %2036 = vperm.xlu0 %5552, %v1760_v34   ;;  %v6565_v40 = vmul.f32 %v5647_v48, %v1536_v32  ;;  %v6573_v17 = vmul.f32 %v6554_v38, %v6304_v37  ;;  %v1538_v0 = vld [vmem:[%s7910_s8 + $0x40] sm:$0xff]  ;;  %v1541_v48 = vld [vmem:[%s7910_s8 + $0x58] sm:$0xff] }
 0x43d   :  { %v5651_v43 = vpop.eup %5650  ;;  %v1620_v47 = vadd.f32 1e-05, %v1506_v15  ;;  %v1470_v30 = vsub.f32 %v1394_v13, %v6400_v21  ;;  %v5291_v6 = vpop.f32.mrb[60].mxu0  ;;  %v6578_v50 = vmul.f32 %v5649_v19, %v1539_v7  ;;  %v6589_v37 = vmul.f32 %v6540_v25, %v6540_v25  ;;  %v1573_v15 = vld [vmem:[%s7910_s8 + $0x238] sm:$0xff] }
 0x43e   :  { %5660 = vrsqrt.f32 %v1621_v45  ;;  %v1509_v51 = vmax.f32 %v1471_v1, 0.0  ;;  %v1397_v8 = vmul.f32 0.125, %v5291_v6  ;;  %v1241_v57 = vpop.f32.mrb[61].mxu0  ;;  %v6582_v21 = vmul.f32 %v6565_v40, %v6306_v39  ;;  %v1543_v1 = vld [vmem:[%s7910_s8 + $0x68] sm:$0xff] }
 0x43f   :  { %5662 = vrsqrt.f32 %v1620_v47  ;;  %v1508_v62 = vmax.f32 %v1470_v30, 0.0  ;;  %v1396_v26 = vmul.f32 0.125, %v1241_v57  ;;  %2041 = vperm.xlu1 %5551, %v1761_v60   ;;  %v1762_v32 = vsub.f32 %v1572_v61, %v1724_v36  ;;  %v1574_v61 = vld [vmem:[%s7910_s8 + $0x240] sm:$0xff] }
 0x440   :  { %v5653_v58 = vpop.eup %5652  ;;  %v1623_v34 = vadd.f32 1e-05, %v1509_v51  ;;  %v1473_v44 = vsub.f32 %v1397_v8, %v6413_v2  ;;  %1818 = vperm.xlu0 %5552, %v1686_v5   ;;  %v6592_v39 = vmul.f32 %v5651_v43, %v1538_v0  ;;  %v6600_v13 = vmul.f32 %v6578_v50, %v6314_v59  ;;  %v1540_v2 = vld [vmem:[%s7910_s8 + $0x50] sm:$0xff] }
 0x441   :  { %v5655_v14 = vpop.eup %5654  ;;  %v1622_v41 = vadd.f32 1e-05, %v1508_v62  ;;  %v1472_v52 = vsub.f32 %v1396_v26, %v6417_v9  ;;  %v5294_v7 = vpop.f32.mrb[62].mxu0  ;;  %v6605_v5 = vmul.f32 %v5653_v58, %v1541_v48  ;;  %v6616_v59 = vmul.f32 %v6561_v28, %v6561_v28 }
 0x442   :  { %5664 = vrsqrt.f32 %v1623_v34  ;;  %v1511_v36 = vmax.f32 %v1473_v44, 0.0  ;;  %v1399_v19 = vmul.f32 0.125, %v5294_v7  ;;  %v1251_v45 = vpop.f32.mrb[63].mxu0  ;;  %v6609_v9 = vmul.f32 %v6592_v39, %v6316_v63 }
 0x443   :  { %5666 = vrsqrt.f32 %v1622_v41  ;;  %v1510_v60 = vmax.f32 %v1472_v52, 0.0  ;;  %v1398_v43 = vmul.f32 0.125, %v1251_v45  ;;  %1823 = vperm.xlu1 %5551, %v6527_v53   ;;  %v1763_v63 = vsub.f32 %v1573_v15, %v6545_v18 }
 0x444   :  { %v5657_v47 = vpop.eup %5656  ;;  %v1625_v30 = vadd.f32 1e-05, %v1511_v36  ;;  %v1475_v6 = vsub.f32 %v1399_v19, %v6421_v33  ;;  %2046 = vperm.xlu0 %5552, %v1762_v32   ;;  %v6624_v0 = vmul.f32 %v5655_v14, %v1540_v2  ;;  %v6629_v53 = vmul.f32 %v6605_v5, %v6324_v16  ;;  %v1542_v33 = vld [vmem:[%s7910_s8 + $0x60] sm:$0xff]  ;;  %v1575_v19 = vld [vmem:[%s7910_s8 + $0x248] sm:$0xff] }
 0x445   :  { %v5659_v51 = vpop.eup %5658  ;;  %v1624_v8 = vadd.f32 1e-05, %v1510_v60  ;;  %v1474_v57 = vsub.f32 %v1398_v43, %v6425_v4  ;;  %v5297_v48 = vpop.f32.mrb[64].mxu0  ;;  %v6634_v18 = vmul.f32 %v5657_v47, %v1543_v1  ;;  %v1545_v4 = vld [vmem:[%s7910_s8 + $0x78] sm:$0xff]  ;;  %v6644_v16 = vmul.f32 0.125, %v6288_v54  ;;  %v1547_v43 = vld [vmem:[%s7910_s8 + $0x88] sm:$0xff] }
 0x446   :  { %5668 = vrsqrt.f32 %v1625_v30  ;;  %v1513_v62 = vmax.f32 %v1475_v6, 0.0  ;;  %v1401_v26 = vmul.f32 0.125, %v5297_v48  ;;  %v1261_v58 = vpop.f32.mrb[65].mxu0  ;;  %v6638_v34 = vmul.f32 %v6624_v0, %v6326_v35  ;;  %v1546_v6 = vld [vmem:[%s7910_s8 + $0x80] sm:$0xff] }
 0x447   :  { %v1512_v44 = vmax.f32 %v1474_v57, 0.0  ;;  %v1400_v32 = vmul.f32 0.125, %v1261_v58  ;;  %2051 = vperm.xlu1 %5551, %v1763_v63   ;;  %v1764_v14 = vsub.f32 %v1574_v61, %v6582_v21  ;;  %5670 = vrsqrt.f32 %v1624_v8 }
 0x448   :  { %v5661_v41 = vpop.eup %5660  ;;  %v1627_v52 = vadd.f32 1e-05, %v1513_v62  ;;  %v1477_v7 = vsub.f32 %v1401_v26, %v6429_v46  ;;  %1828 = vperm.xlu0 %5552, %v6565_v40   ;;  %v6649_v35 = vmul.f32 %v5659_v51, %v1542_v33  ;;  %v6657_v21 = vmul.f32 %v6634_v18, %v6332_v20  ;;  %v1544_v46 = vld [vmem:[%s7910_s8 + $0x70] sm:$0xff] }
 0x449   :  { %v5663_v15 = vpop.eup %5662  ;;  %v1626_v2 = vadd.f32 1e-05, %v1512_v44  ;;  %v1476_v36 = vsub.f32 %v1400_v32, %v6433_v12  ;;  %v5300_v54 = vpop.f32.mrb[66].mxu0  ;;  %v6662_v40 = vmul.f32 %v5661_v41, %v1545_v4  ;;  %v6672_v20 = vmul.f32 0.125, %v6290_v56 }
 0x44a   :  { %5672 = vrsqrt.f32 %v1627_v52  ;;  %v1515_v45 = vmax.f32 %v1477_v7, 0.0  ;;  %v1403_v1 = vmul.f32 0.125, %v5300_v54  ;;  %v1271_v60 = vpop.f32.mrb[67].mxu0  ;;  %v6666_v12 = vmul.f32 %v6649_v35, %v6334_v22 }
 0x44b   :  { %5674 = vrsqrt.f32 %v1626_v2  ;;  %v1514_v47 = vmax.f32 %v1476_v36, 0.0  ;;  %v1402_v30 = vmul.f32 0.125, %v1271_v60  ;;  %1833 = vperm.xlu1 %5551, %v6554_v38   ;;  %v1765_v51 = vsub.f32 %v1575_v19, %v6573_v17  ;;  %v1549_v17 = vld [vmem:[%s7910_s8 + $0x98] sm:$0xff] }
 0x44c   :  { %v5665_v63 = vpop.eup %5664  ;;  %v1629_v61 = vadd.f32 1e-05, %v1515_v45  ;;  %v1479_v22 = vsub.f32 %v1403_v1, %v6458_v42  ;;  %2056 = vperm.xlu0 %5552, %v1764_v14   ;;  %v6680_v8 = vmul.f32 %v5663_v15, %v1544_v46  ;;  %v6687_v38 = vmul.f32 %v6662_v40, %v6336_v31  ;;  %v1576_v31 = vld [vmem:[%s7910_s8 + $0x250] sm:$0xff]  ;;  %v8026_v15 = vld [vmem:[#allocation45_spill] sm:$0xff]  ;;  %v1577_v46 = vld [vmem:[%s7910_s8 + $0x258] sm:$0xff] }
 0x44d   :  { %v5667_v56 = vpop.eup %5666  ;;  %v1628_v57 = vadd.f32 1e-05, %v1514_v47  ;;  %v1478_v48 = vsub.f32 %v1402_v30, %v6462_v24  ;;  %v5303_v33 = vpop.f32.mrb[68].mxu0  ;;  %v6683_v62 = vmul.f32 %v5665_v63, %v1547_v43  ;;  %v6696_v24 = vmul.f32 %v6644_v16, %v6644_v16  ;;  %v1551_v30 = vld [vmem:[%s7910_s8 + $0xa8] sm:$0xff] }
 0x44e   :  { %5676 = vrsqrt.f32 %v1629_v61  ;;  %v1517_v26 = vmax.f32 %v1479_v22, 0.0  ;;  %v1405_v58 = vmul.f32 0.125, %v5303_v33  ;;  %v1281_v42 = vpop.f32.mrb[69].mxu0  ;;  %v6689_v4 = vmul.f32 %v5667_v56, %v1546_v6 }
 0x44f   :  { %5678 = vrsqrt.f32 %v1628_v57  ;;  %v1516_v44 = vmax.f32 %v1478_v48, 0.0  ;;  %v1404_v32 = vmul.f32 0.125, %v1281_v42  ;;  %2061 = vperm.xlu1 %5551, %v1765_v51   ;;  %v6705_v7 = vmul.f32 %v6683_v62, %v6360_v23  ;;  %v8028_v57 = vld [vmem:[#allocation47_spill] sm:$0xff] }
 0x450   :  { %v5669_v14 = vpop.eup %5668  ;;  %v1631_v41 = vadd.f32 1e-05, %v1517_v26  ;;  %v1481_v52 = vsub.f32 %v1405_v58, %v6467_v10  ;;  %1838 = vperm.xlu0 %5552, %v6592_v39   ;;  %v6709_v2 = vmul.f32 %v6680_v8, %v8026_v15  ;;  %v8027_v10 = vld [vmem:[#allocation46_spill] sm:$0xff]  ;;  %v1766_v47 = vsub.f32 %v1576_v31, %v6609_v9  ;;  %v1578_v15 = vld [vmem:[%s7910_s8 + $0x260] sm:$0xff] }
 0x451   :  { %v1630_v36 = vadd.f32 1e-05, %v1516_v44  ;;  %v1480_v54 = vsub.f32 %v1404_v32, %v6474_v27  ;;  %v5306_v19 = vpop.f32.mrb[70].mxu0  ;;  %v6715_v45 = vmul.f32 %v5669_v14, %v1549_v17  ;;  %v6719_v39 = vmul.f32 %v6689_v4, %v8027_v10  ;;  %v5671_v23 = vpop.eup %5670  ;;  %v1548_v27 = vld [vmem:[%s7910_s8 + $0x90] sm:$0xff] }
 0x452   :  { %5680 = vrsqrt.f32 %v1631_v41  ;;  %v1519_v1 = vmax.f32 %v1481_v52, 0.0  ;;  %v1407_v60 = vmul.f32 0.125, %v5306_v19  ;;  %v1291_v43 = vpop.f32.mrb[71].mxu0  ;;  %v6730_v6 = vmul.f32 %v6672_v20, %v6672_v20 }
 0x453   :  { %5682 = vrsqrt.f32 %v1630_v36  ;;  %v1518_v63 = vmax.f32 %v1480_v54, 0.0  ;;  %v1406_v61 = vmul.f32 0.125, %v1291_v43  ;;  %1843 = vperm.xlu1 %5551, %v6578_v50   ;;  %v1767_v56 = vsub.f32 %v1577_v46, %v6600_v13  ;;  %v8029_v50 = vld [vmem:[#allocation43_spill] sm:$0xff]  ;;  %v8030_v36 = vld [vmem:[#allocation48_spill] sm:$0xff] }
 0x454   :  { %v5673_v22 = vpop.eup %5672  ;;  %v1633_v51 = vadd.f32 1e-05, %v1519_v1  ;;  %v1483_v9 = vsub.f32 %v1407_v60, %v6481_v3  ;;  %2066 = vperm.xlu0 %5552, %v1766_v47   ;;  %v6737_v48 = vmul.f32 %v6715_v45, %v8028_v57  ;;  %v6740_v17 = vmul.f32 %v5671_v23, %v1548_v27  ;;  %v1550_v3 = vld [vmem:[%s7910_s8 + $0xa0] sm:$0xff]  ;;  %v1579_v57 = vld [vmem:[%s7910_s8 + $0x268] sm:$0xff] }
 0x455   :  { %v5675_v33 = vpop.eup %5674  ;;  %v1632_v26 = vadd.f32 1e-05, %v1518_v63  ;;  %v1482_v58 = vsub.f32 %v1406_v61, %v6485_v29  ;;  %v5309_v42 = vpop.f32.mrb[72].mxu0  ;;  %v6742_v44 = vmul.f32 %v5673_v22, %v1551_v30  ;;  %v6748_v32 = vmul.f32 0.125, %v8029_v50  ;;  %v1553_v29 = vld [vmem:[%s7910_s8 + $0xb8] sm:$0xff]  ;;  %v8031_v23 = vld [vmem:[#allocation49_spill] sm:$0xff] }
 0x456   :  { %5684 = vrsqrt.f32 %v1633_v51  ;;  %v1521_v13 = vmax.f32 %v1483_v9, 0.0  ;;  %v1409_v31 = vmul.f32 0.125, %v5309_v42  ;;  %v1301_v14 = vpop.f32.mrb[73].mxu0  ;;  %v6758_v54 = vmul.f32 %v6740_v17, %v8030_v36  ;;  %v8032_v47 = vld [vmem:[#allocation44_spill] sm:$0xff] }
 0x457   :  { %5686 = vrsqrt.f32 %v1632_v26  ;;  %v1520_v41 = vmax.f32 %v1482_v58, 0.0  ;;  %v1408_v52 = vmul.f32 0.125, %v1301_v14  ;;  %2071 = vperm.xlu1 %5551, %v1767_v56   ;;  %v6764_v1 = vmul.f32 %v6742_v44, %v8031_v23  ;;  %v8033_v58 = vld [vmem:[#allocation50_spill] sm:$0xff] }
 0x458   :  { %v5677_v19 = vpop.eup %5676  ;;  %v1635_v46 = vadd.f32 1e-05, %v1521_v13  ;;  %v1485_v10 = vsub.f32 %v1409_v31, %v6509_v49  ;;  %1848 = vperm.xlu0 %5552, %v6624_v0   ;;  %v6766_v60 = vmul.f32 %v5675_v33, %v1550_v3  ;;  %v6769_v27 = vmul.f32 0.125, %v8032_v47  ;;  %v1552_v49 = vld [vmem:[%s7910_s8 + $0xb0] sm:$0xff] }
 0x459   :  { %v5679_v43 = vpop.eup %5678  ;;  %v1634_v30 = vadd.f32 1e-05, %v1520_v41  ;;  %v1484_v63 = vsub.f32 %v1408_v52, %v6531_v11  ;;  %v5312_v61 = vpop.f32.mrb[74].mxu0  ;;  %v6772_v22 = vmul.f32 %v5677_v19, %v1553_v29  ;;  %v1768_v56 = vsub.f32 %v1578_v15, %v6638_v34  ;;  %v1555_v11 = vld [vmem:[%s7910_s8 + $0xc8] sm:$0xff]  ;;  %v8034_v13 = vld [vmem:[#allocation51_spill] sm:$0xff] }
 0x45a   :  { %5688 = vrsqrt.f32 %v1635_v46  ;;  %v1523_v0 = vmax.f32 %v1485_v10, 0.0  ;;  %v1411_v51 = vmul.f32 0.125, %v5312_v61  ;;  %v1311_v9 = vpop.f32.mrb[75].mxu0  ;;  %v6787_v42 = vmul.f32 %v6766_v60, %v8033_v58  ;;  %v1580_v47 = vld [vmem:[%s7910_s8 + $0x270] sm:$0xff] }
 0x45b   :  { %5690 = vrsqrt.f32 %v1634_v30  ;;  %v1522_v33 = vmax.f32 %v1484_v63, 0.0  ;;  %v1410_v26 = vmul.f32 0.125, %v1311_v9  ;;  %1853 = vperm.xlu1 %5551, %v6605_v5   ;;  %v6792_v31 = vmul.f32 %v6772_v22, %v8034_v13  ;;  %v8035_v30 = vld [vmem:[#allocation52_spill] sm:$0xff] }
 0x45c   :  { %v5681_v3 = vpop.eup %5680  ;;  %v1637_v50 = vadd.f32 1e-05, %v1523_v0  ;;  %v1487_v34 = vsub.f32 %v1411_v51, %v6589_v37  ;;  %2076 = vperm.xlu0 %5552, %v1768_v56   ;;  %v6794_v14 = vmul.f32 %v5679_v43, %v1552_v49  ;;  %v1769_v15 = vsub.f32 %v1579_v57, %v6629_v53  ;;  %v1554_v37 = vld [vmem:[%s7910_s8 + $0xc0] sm:$0xff] }
 0x45d   :  { %v5683_v29 = vpop.eup %5682  ;;  %v1636_v41 = vadd.f32 1e-05, %v1522_v33  ;;  %v1486_v52 = vsub.f32 %v1410_v26, %v6616_v59  ;;  %v5315_v5 = vpop.f32.mrb[76].mxu0  ;;  %v6798_v36 = vmul.f32 %v5681_v3, %v1555_v11  ;;  %v1453_v19 = vmul.f32 %v6748_v32, %v6748_v32  ;;  %v1557_v59 = vld [vmem:[%s7910_s8 + $0xd8] sm:$0xff]  ;;  %v8036_v51 = vld [vmem:[#allocation53_spill] sm:$0xff] }
 0x45e   :  { %5692 = vrsqrt.f32 %v1637_v50  ;;  %v1525_v46 = vmax.f32 %v1487_v34, 0.0  ;;  %v1413_v10 = vmul.f32 0.125, %v5315_v5  ;;  %v1321_v23 = vpop.f32.mrb[77].mxu0  ;;  %v6813_v63 = vmul.f32 %v6794_v14, %v8035_v30  ;;  %v8037_v5 = vld [vmem:[#allocation54_spill] sm:$0xff] }
 0x45f   :  { %5694 = vrsqrt.f32 %v1636_v41  ;;  %v1524_v43 = vmax.f32 %v1486_v52, 0.0  ;;  %v1412_v53 = vmul.f32 0.125, %v1321_v23  ;;  %2081 = vperm.xlu1 %5551, %v1769_v15   ;;  %v6819_v9 = vmul.f32 %v6798_v36, %v8036_v51  ;;  %v1561_v51 = vld [vmem:[%s7910_s8 + $0xf8] sm:$0xff] }
 0x460   :  { %v5685_v61 = vpop.eup %5684  ;;  %v1639_v49 = vadd.f32 1e-05, %v1525_v46  ;;  %v1489_v0 = vsub.f32 %v1413_v10, %v6696_v24  ;;  %1858 = vperm.xlu0 %5552, %v6649_v35   ;;  %v6821_v56 = vmul.f32 %v5683_v29, %v1554_v37  ;;  %v1452_v11 = vmul.f32 %v6769_v27, %v6769_v27  ;;  %v1556_v35 = vld [vmem:[%s7910_s8 + $0xd0] sm:$0xff]  ;;  %v1581_v29 = vld [vmem:[%s7910_s8 + $0x278] sm:$0xff] }
 0x461   :  { %v5687_v57 = vpop.eup %5686  ;;  %v1638_v33 = vadd.f32 1e-05, %v1524_v43  ;;  %v1488_v26 = vsub.f32 %v1412_v53, %v6730_v6  ;;  %v5318_v58 = vpop.f32.mrb[78].mxu0  ;;  %v6826_v3 = vmul.f32 %v5685_v61, %v1557_v59  ;;  %v1770_v13 = vsub.f32 %v1580_v47, %v6666_v12  ;;  %v1559_v6 = vld [vmem:[%s7910_s8 + $0xe8] sm:$0xff]  ;;  %v8038_v10 = vld [vmem:[#allocation55_spill] sm:$0xff]  ;;  %v1558_v43 = vld [vmem:[%s7910_s8 + $0xe0] sm:$0xff] }
 0x462   :  { %5696 = vrsqrt.f32 %v1639_v49  ;;  %v1527_v24 = vmax.f32 %v1489_v0, 0.0  ;;  %v1415_v50 = vmul.f32 0.125, %v5318_v58  ;;  %v1331_v34 = vpop.f32.mrb[79].mxu0  ;;  %v6841_v15 = vmul.f32 %v6821_v56, %v8037_v5  ;;  %v8039_v49 = vld [vmem:[#allocation56_spill] sm:$0xff] }
 0x463   :  { %5698 = vrsqrt.f32 %v1638_v33  ;;  %v1526_v41 = vmax.f32 %v1488_v26, 0.0  ;;  %v1414_v52 = vmul.f32 0.125, %v1331_v34  ;;  %1863 = vperm.xlu1 %5551, %v6634_v18   ;;  %v6845_v23 = vmul.f32 %v6826_v3, %v8038_v10  ;;  %v8040_v33 = vld [vmem:[#allocation57_spill] sm:$0xff]  ;;  %v1560_v26 = vld [vmem:[%s7910_s8 + $0xf0] sm:$0xff] }
 0x464   :  { %v5689_v37 = vpop.eup %5688  ;;  %v1641_v46 = vadd.f32 1e-05, %v1527_v24  ;;  %v1491_v12 = vsub.f32 %v1415_v50, %v1453_v19  ;;  %2086 = vperm.xlu0 %5552, %v1770_v13   ;;  %v6847_v59 = vmul.f32 %v5687_v57, %v1556_v35  ;;  %v1771_v30 = vsub.f32 %v1581_v29, %v6657_v21  ;;  %v8041_v13 = vld [vmem:[#allocation58_spill] sm:$0xff] }
 0x465   :  { %v5691_v53 = vpop.eup %5690  ;;  %v1640_v18 = vadd.f32 1e-05, %v1526_v41  ;;  %v1490_v47 = vsub.f32 %v1414_v52, %v1452_v11  ;;  %v6853_v61 = vmul.f32 %v5689_v37, %v1559_v6  ;;  %v1583_v6 = vld [vmem:[%s7910_s8 + $0x288] sm:$0xff]  ;;  %v1562_v37 = vld [vmem:[%s7910_s8 + $0x100] sm:$0xff] }
 0x466   :  { %5700 = vrsqrt.f32 %v1641_v46  ;;  %v1529_v19 = vmax.f32 %v1491_v12, 0.0  ;;  %v6857_v0 = vmul.f32 %v6847_v59, %v8039_v49  ;;  %v6866_v21 = vmul.f32 %v5691_v53, %v1558_v43  ;;  %v1563_v41 = vld [vmem:[%s7910_s8 + $0x108] sm:$0xff] }
 0x467   :  { %5702 = vrsqrt.f32 %v1640_v18  ;;  %v1528_v57 = vmax.f32 %v1490_v47, 0.0  ;;  %2091 = vperm.xlu1 %5551, %v1771_v30   ;;  %v6864_v11 = vmul.f32 %v6853_v61, %v8040_v33  ;;  %v1773_v43 = vsub.f32 %v1583_v6, %v6687_v38  ;;  %v1565_v47 = vld [vmem:[%s7910_s8 + $0x118] sm:$0xff]  ;;  %v1564_v38 = vld [vmem:[%s7910_s8 + $0x110] sm:$0xff] }
 0x468   :  { %v5693_v58 = vpop.eup %5692  ;;  %v1643_v35 = vadd.f32 1e-05, %v1529_v19  ;;  %1868 = vperm.xlu0 %5552, %v6680_v8   ;;  %v6876_v29 = vmul.f32 %v6866_v21, %v8041_v13  ;;  %v8042_v8 = vld [vmem:[#allocation59_spill] sm:$0xff] }
 0x469   :  { %v5695_v24 = vpop.eup %5694  ;;  %v1642_v50 = vadd.f32 1e-05, %v1528_v57  ;;  %v6872_v34 = vmul.f32 %v5693_v58, %v1561_v51 }
 0x46a   :  { %5704 = vrsqrt.f32 %v1643_v35  ;;  %v6884_v52 = vmul.f32 %v5695_v24, %v1560_v26  ;;  %v1567_v26 = vld [vmem:[%s7910_s8 + $0x128] sm:$0xf] }
 0x46b   :  { %5706 = vrsqrt.f32 %v1642_v50  ;;  %1873 = vperm.xlu1 %5551, %v6662_v40   ;;  %v6889_v5 = vmul.f32 %v6872_v34, %v8042_v8  ;;  %v1585_v40 = vld [vmem:[%s7910_s8 + $0x298] sm:$0xff] }
 0x46c   :  { %v5697_v46 = vpop.eup %5696  ;;  %1883 = vperm.xlu0 %5552, %v6683_v62   ;;  %v6897_v12 = vmul.f32 %v6884_v52, %v6500_v55  ;;  %v1582_v55 = vld [vmem:[%s7910_s8 + $0x280] sm:$0xff]  ;;  %v1775_v51 = vsub.f32 %v1585_v40, %v6705_v7 }
 0x46d   :  { %v5699_v10 = vpop.eup %5698  ;;  %v6900_v53 = vmul.f32 %v5697_v46, %v1563_v41  ;;  %v1772_v33 = vsub.f32 %v1582_v55, %v6709_v2  ;;  %v1566_v7 = vld [vmem:[%s7910_s8 + $0x120] sm:$0xff]  ;;  %v1603_v55 = vld [vmem:[%s7910_s8 + $0x328] sm:$0xff] }
 0x46e   :  { %v6905_v18 = vmul.f32 %v5699_v10, %v1562_v37  ;;  %v1600_v10 = vld [vmem:[%s7910_s8 + $0x310] sm:$0xff] }
 0x46f   :  { %2101 = vperm.xlu1 %5551, %v1773_v43   ;;  %v6915_v62 = vmul.f32 %v6900_v53, %v6540_v25  ;;  %v8044_v43 = vld [vmem:[#allocation6_spill] sm:$0xff] }
 0x470   :  { %v5701_v30 = vpop.eup %5700  ;;  %1878 = vperm.xlu0 %5552, %v6689_v4   ;;  %v6923_v19 = vmul.f32 %v6905_v18, %v6561_v28  ;;  %v1584_v4 = vld [vmem:[%s7910_s8 + $0x290] sm:$0xff] }
 0x471   :  { %v5703_v49 = vpop.eup %5702  ;;  %v6926_v57 = vmul.f32 %v5701_v30, %v1565_v47  ;;  %v1774_v50 = vsub.f32 %v1584_v4, %v6719_v39  ;;  %v1586_v39 = vld [vmem:[%s7910_s8 + $0x2a0] sm:$0xff] }
 0x472   :  { %v6929_v25 = vmul.f32 %v5703_v49, %v1564_v38 }
 0x473   :  { %2111 = vperm.xlu1 %5551, %v1775_v51   ;;  %v6939_v28 = vmul.f32 %v6926_v57, %v6644_v16  ;;  %v1587_v16 = vld [vmem:[%s7910_s8 + $0x2a8] sm:$0xff] }
 0x474   :  { %v5705_v2 = vpop.eup %5704  ;;  %2096 = vperm.xlu0 %5552, %v1772_v33   ;;  %v6946_v58 = vmul.f32 %v6929_v25, %v6672_v20  ;;  %v1777_v41 = vsub.f32 %v1587_v16, %v6737_v48  ;;  %v1588_v48 = vld [vmem:[%s7910_s8 + $0x2b0] sm:$0xff] }
 0x475   :  { %v5707_v35 = vpop.eup %5706  ;;  %v6948_v24 = vmul.f32 %v5705_v2, %v1567_v26  ;;  %v1793_v49 = vsub.f32 %v1603_v55, %v6939_v28  ;;  %v8045_v26 = vld [vmem:[#allocation7_spill] sm:$0xff]  ;;  %v8046_v2 = vld [vmem:[#allocation8_spill] sm:$0xff] }
 0x476   :  { %v6954_v13 = vmul.f32 %v5707_v35, %v1566_v7  ;;  %v1605_v28 = vld [vmem:[%s7910_s8 + $0x338] sm:$0xf] }
 0x477   :  { %1893 = vperm.xlu1 %5551, %v6715_v45   ;;  %v6959_v6 = vmul.f32 %v6948_v24, %v6748_v32  ;;  %v1776_v45 = vsub.f32 %v1586_v39, %v6758_v54  ;;  %v1589_v32 = vld [vmem:[%s7910_s8 + $0x2b8] sm:$0xff]  ;;  %v1591_v54 = vld [vmem:[%s7910_s8 + $0x2c8] sm:$0xff] }
 0x478   :  { %2106 = vperm.xlu0 %5552, %v1774_v50   ;;  %v6963_v20 = vmul.f32 %v6954_v13, %v6769_v27  ;;  %v1779_v27 = vsub.f32 %v1589_v32, %v6764_v1  ;;  %v1590_v1 = vld [vmem:[%s7910_s8 + $0x2c0] sm:$0xff] }
 0x47b   :  { %2121 = vperm.xlu1 %5551, %v1777_v41  }
 0x47c   :  { %1888 = vperm.xlu0 %5552, %v6740_v17   ;;  %v1778_v17 = vsub.f32 %v1588_v48, %v6787_v42  ;;  %v1593_v42 = vld [vmem:[%s7910_s8 + $0x2d8] sm:$0xff] }
 0x47f   :  { %1903 = vperm.xlu1 %5551, %v6742_v44   ;;  %v1781_v44 = vsub.f32 %v1591_v54, %v6792_v31  ;;  %v1592_v31 = vld [vmem:[%s7910_s8 + $0x2d0] sm:$0xff] }
 0x480   :  { %2116 = vperm.xlu0 %5552, %v1776_v45  }
 0x483   :  { %2131 = vperm.xlu1 %5551, %v1779_v27   ;;  %v1795_v27 = vsub.f32 %v1605_v28, %v6959_v6 }
 0x484   :  { %1898 = vperm.xlu0 %5552, %v6766_v60   ;;  %v1780_v60 = vsub.f32 %v1590_v1, %v6813_v63  ;;  %v1595_v63 = vld [vmem:[%s7910_s8 + $0x2e8] sm:$0xff] }
 0x485   :  { %v8048_v1 = vld [vmem:[#allocation10_spill] sm:$0xff] }
 0x487   :  { %1913 = vperm.xlu1 %5551, %v6772_v22   ;;  %v1783_v22 = vsub.f32 %v1593_v42, %v6819_v9  ;;  %v1594_v9 = vld [vmem:[%s7910_s8 + $0x2e0] sm:$0xff] }
 0x488   :  { %2126 = vperm.xlu0 %5552, %v1778_v17   ;;  %v8047_v17 = vld [vmem:[#allocation9_spill] sm:$0xff] }
 0x48b   :  { %2141 = vperm.xlu1 %5551, %v1781_v44  }
 0x48c   :  { %1908 = vperm.xlu0 %5552, %v6794_v14   ;;  %v1782_v14 = vsub.f32 %v1592_v31, %v6841_v15  ;;  %v1597_v15 = vld [vmem:[%s7910_s8 + $0x2f8] sm:$0xff] }
 0x48f   :  { %1923 = vperm.xlu1 %5551, %v6798_v36   ;;  %v1785_v36 = vsub.f32 %v1595_v63, %v6845_v23  ;;  %v1596_v23 = vld [vmem:[%s7910_s8 + $0x2f0] sm:$0xff] }
 0x490   :  { %2136 = vperm.xlu0 %5552, %v1780_v60  }
 0x493   :  { %2151 = vperm.xlu1 %5551, %v1783_v22  }
 0x494   :  { %1918 = vperm.xlu0 %5552, %v6821_v56   ;;  %v1784_v56 = vsub.f32 %v1594_v9, %v6857_v0  ;;  %v1599_v0 = vld [vmem:[%s7910_s8 + $0x308] sm:$0xff] }
 0x497   :  { %1933 = vperm.xlu1 %5551, %v6826_v3   ;;  %v1787_v3 = vsub.f32 %v1597_v15, %v6864_v11 }
 0x498   :  { %2146 = vperm.xlu0 %5552, %v1782_v14   ;;  %v5577_v14 = vld [vmem:[%s7906_s4 + $0x4] ss:$12 sps:$4 sm:$0xff]  }
 0x499   :  { %2559 = vmatprep.mubr.bf16.mxu1 %v5577_v14 }
 0x49b   :  { %2161 = vperm.xlu1 %5551, %v1785_v36  }
 0x49c   :  { %1928 = vperm.xlu0 %5552, %v6847_v59   ;;  %v1786_v59 = vsub.f32 %v1596_v23, %v6876_v29  ;;  %v8050_v23 = vld [vmem:[#allocation12_spill] sm:$0xff] }
 0x49f   :  { %1943 = vperm.xlu1 %5551, %v6853_v61   ;;  %v1789_v61 = vsub.f32 %v1599_v0, %v6889_v5 }
 0x4a0   :  { %2156 = vperm.xlu0 %5552, %v1784_v56  }
 0x4a3   :  { %2171 = vperm.xlu1 %5551, %v1787_v3  }
 0x4a4   :  { %1938 = vperm.xlu0 %5552, %v6866_v21   ;;  %v1601_v21 = vld [vmem:[%s7910_s8 + $0x318] sm:$0xff] }
 0x4a5   :  { %v1791_v29 = vsub.f32 %v1601_v21, %v6915_v62  ;;  %v5578_v21 = vld [vmem:[%s7906_s4 + $0x8] ss:$12 sps:$4 sm:$0xff]  }
 0x4a6   :  { %5325 = vmatprep.mubr.msk.bf16.mxu0 %vm2492_vm6, %v5578_v21 }
 0x4a7   :  { %1953 = vperm.xlu1 %5551, %v6872_v34   ;;  %v1598_v34 = vld [vmem:[%s7910_s8 + $0x300] sm:$0xff] }
 0x4a8   :  { %2166 = vperm.xlu0 %5552, %v1786_v59   ;;  %v1788_v37 = vsub.f32 %v1598_v34, %v6897_v12 }
 0x4ab   :  { %1963 = vperm.xlu1 %5551, %v6900_v53  }
 0x4ac   :  { %1948 = vperm.xlu0 %5552, %v6884_v52   ;;  %v8043_v52 = vld [vmem:[#allocation5_spill] sm:$0xff] }
 0x4ae   :  { %v1804_v11 = vpop.permute.xlu1 %1803 }
 0x4af   :  { %2181 = vperm.xlu1 %5551, %v1789_v61   ;;  %v1987_v53 = vmul.f32 %v1804_v11, %v8044_v43 }
 0x4b0   :  { %1958 = vperm.xlu0 %5552, %v6905_v18   ;;  %v1790_v18 = vsub.f32 %v1600_v10, %v6923_v19  ;;  %v1602_v19 = vld [vmem:[%s7910_s8 + $0x320] sm:$0xff]  ;;  %v8052_v10 = vld [vmem:[#allocation14_spill] sm:$0xff] }
 0x4b1   :  { %v1792_v16 = vsub.f32 %v1602_v19, %v6946_v58  ;;  %v1604_v58 = vld [vmem:[%s7910_s8 + $0x330] sm:$0xff] }
 0x4b2   :  { %v1799_v8 = vpop.permute.xlu1 %1798  ;;  %v1794_v22 = vsub.f32 %v1604_v58, %v6963_v20 }
 0x4b3   :  { %v1986_v46 = vmul.f32 %v1799_v8, %v8043_v52  ;;  %v2027_v5 = vpop.permute.xlu0 %2026  ;;  %2191 = vperm.xlu1 %5551, %v1791_v29   ;;  %v8051_v52 = vld [vmem:[#allocation13_spill] sm:$0xff] }
 0x4b4   :  { %2176 = vperm.xlu0 %5552, %v1788_v37  }
 0x4b5   :  { %v2214_v40 = vadd.f32 %v2027_v5, %v1986_v46 }
 0x4b6   :  { %v2032_v47 = vpop.permute.xlu1 %2031 }
 0x4b7   :  { %v2215_v12 = vadd.f32 %v2032_v47, %v1987_v53  ;;  %v1809_v62 = vpop.permute.xlu0 %1808  ;;  %1973 = vperm.xlu1 %5551, %v6926_v57   ;;  %v2252_v38 = vmax.f32 %v2214_v40, 0.0 }
 0x4b8   :  { %2186 = vperm.xlu0 %5552, %v1790_v18   ;;  %v1988_v4 = vmul.f32 %v1809_v62, %v8045_v26  ;;  %v8054_v26 = vld [vmem:[#allocation16_spill] sm:$0xff] }
 0x4b9   :  { %v2253_v30 = vmax.f32 %v2215_v12, 0.0 }
 0x4ba   :  { %v1814_v51 = vpop.permute.xlu1 %1813 }
 0x4bb   :  { %v7048_v33 = vpack.c.bf16 %v2253_v30, %v2252_v38  ;;  %v2037_v7 = vpop.permute.xlu0 %2036  ;;  %2201 = vperm.xlu1 %5551, %v1793_v49   ;;  %v1989_v57 = vmul.f32 %v1814_v51, %v8046_v2  ;;  %v8053_v30 = vld [vmem:[#allocation15_spill] sm:$0xff] }
 0x4bc   :  { %1968 = vperm.xlu0 %5552, %v6929_v25   ;;  %v2216_v35 = vadd.f32 %v2037_v7, %v1988_v4 }
 0x4be   :  { %v2042_v50 = vpop.permute.xlu1 %2041  ;;  %v2254_v45 = vmax.f32 %v2216_v35, 0.0 }
 0x4bf   :  { %v2217_v41 = vadd.f32 %v2042_v50, %v1989_v57  ;;  %v1819_v39 = vpop.permute.xlu0 %1818  ;;  %1983 = vperm.xlu1 %5551, %v6948_v24  }
 0x4c0   :  { %2196 = vperm.xlu0 %5552, %v1792_v16   ;;  %v1990_v54 = vmul.f32 %v1819_v39, %v8047_v17 }
 0x4c1   :  { %v2255_v32 = vmax.f32 %v2217_v41, 0.0  ;;  %v8055_v41 = vld [vmem:[#allocation17_spill] sm:$0xff] }
 0x4c2   :  { %v1824_v25 = vpop.permute.xlu1 %1823 }
 0x4c3   :  { %v7062_v48 = vpack.c.bf16 %v2255_v32, %v2254_v45  ;;  %v2047_v44 = vpop.permute.xlu0 %2046  ;;  %2211 = vperm.xlu1 %5551, %v1795_v27   ;;  %v1991_v24 = vmul.f32 %v1824_v25, %v8048_v1  ;;  %v8056_v32 = vld [vmem:[#allocation18_spill] sm:$0xff] }
 0x4c4   :  { %1978 = vperm.xlu0 %5552, %v6954_v13   ;;  %v2218_v60 = vadd.f32 %v2047_v44, %v1990_v54  ;;  %v8049_v13 = vld [vmem:[#allocation11_spill] sm:$0xff] }
 0x4c6   :  { %v2052_v42 = vpop.permute.xlu1 %2051  ;;  %v2256_v63 = vmax.f32 %v2218_v60, 0.0 }
 0x4c7   :  { %v2219_v6 = vadd.f32 %v2052_v42, %v1991_v24  ;;  %v1829_v31 = vpop.permute.xlu0 %1828 }
 0x4c8   :  { %2206 = vperm.xlu0 %5552, %v1794_v22   ;;  %v1992_v15 = vmul.f32 %v1829_v31, %v8049_v13  ;;  %v8057_v31 = vld [vmem:[#allocation20_spill] sm:$0xff] }
 0x4c9   :  { %v2257_v36 = vmax.f32 %v2219_v6, 0.0 }
 0x4ca   :  { %v1834_v9 = vpop.permute.xlu1 %1833 }
 0x4cb   :  { %v7074_v56 = vpack.c.bf16 %v2257_v36, %v2256_v63  ;;  %v2057_v3 = vpop.permute.xlu0 %2056  ;;  %v1993_v59 = vmul.f32 %v1834_v9, %v8050_v23  ;;  %v8058_v63 = vld [vmem:[#allocation19_spill] sm:$0xff] }
 0x4cc   :  { %v2220_v0 = vadd.f32 %v2057_v3, %v1992_v15  ;;  %v8059_v3 = vld [vmem:[#allocation22_spill] sm:$0xff] }
 0x4ce   :  { %v2062_v20 = vpop.permute.xlu1 %2061  ;;  %v2258_v34 = vmax.f32 %v2220_v0, 0.0 }
 0x4cf   :  { %v2221_v61 = vadd.f32 %v2062_v20, %v1993_v59  ;;  %v1839_v11 = vpop.permute.xlu0 %1838  ;;  %v8060_v20 = vld [vmem:[#allocation21_spill] sm:$0xff] }
 0x4d0   :  { %v1994_v46 = vmul.f32 %v1839_v11, %v8051_v52 }
 0x4d1   :  { %v2259_v29 = vmax.f32 %v2221_v61, 0.0 }
 0x4d2   :  { %v1844_v8 = vpop.permute.xlu1 %1843 }
 0x4d3   :  { %v7082_v37 = vpack.c.bf16 %v2259_v29, %v2258_v34  ;;  %v2067_v5 = vpop.permute.xlu0 %2066  ;;  %v1995_v43 = vmul.f32 %v1844_v8, %v8052_v10 }
 0x4d4   :  { %v2222_v53 = vadd.f32 %v2067_v5, %v1994_v46 }
 0x4d6   :  { %v2072_v40 = vpop.permute.xlu1 %2071  ;;  %v2260_v55 = vmax.f32 %v2222_v53, 0.0  ;;  %v8061_v53 = vld [vmem:[#allocation24_spill] sm:$0xff] }
 0x4d7   :  { %v2223_v47 = vadd.f32 %v2072_v40, %v1995_v43  ;;  %v1849_v18 = vpop.permute.xlu0 %1848 }
 0x4d8   :  { %v1996_v49 = vmul.f32 %v1849_v18, %v8053_v30 }
 0x4d9   :  { %v2261_v12 = vmax.f32 %v2223_v47, 0.0 }
 0x4da   :  { %v1854_v62 = vpop.permute.xlu1 %1853 }
 0x4db   :  { %v7086_v38 = vpack.c.bf16 %v2261_v12, %v2260_v55  ;;  %v2077_v51 = vpop.permute.xlu0 %2076  ;;  %v1997_v4 = vmul.f32 %v1854_v62, %v8054_v26  ;;  %v8062_v55 = vld [vmem:[#allocation23_spill] sm:$0xff] }
 0x4dc   :  { %v2224_v7 = vadd.f32 %v2077_v51, %v1996_v49 }
 0x4de   :  { %v2082_v19 = vpop.permute.xlu1 %2081  ;;  %v2262_v35 = vmax.f32 %v2224_v7, 0.0 }
 0x4df   :  { %v2225_v2 = vadd.f32 %v2082_v19, %v1997_v4  ;;  %v1859_v57 = vpop.permute.xlu0 %1858  ;;  %v8063_v19 = vld [vmem:[#allocation26_spill] sm:$0xff] }
 0x4e0   :  { %v1998_v39 = vmul.f32 %v1859_v57, %v8055_v41 }
 0x4e1   :  { %v2263_v50 = vmax.f32 %v2225_v2, 0.0 }
 0x4e2   :  { %v1864_v16 = vpop.permute.xlu1 %1863 }
 0x4e3   :  { %v7090_v28 = vpack.c.bf16 %v2263_v50, %v2262_v35  ;;  %v2087_v45 = vpop.permute.xlu0 %2086  ;;  %v1999_v27 = vmul.f32 %v1864_v16, %v8056_v32  ;;  %v8064_v50 = vld [vmem:[#allocation25_spill] sm:$0xff] }
 0x4e4   :  { %v2226_v25 = vadd.f32 %v2087_v45, %v1998_v39 }
 0x4e6   :  { %v2092_v17 = vpop.permute.xlu1 %2091  ;;  %v2264_v58 = vmax.f32 %v2226_v25, 0.0 }
 0x4e7   :  { %v2227_v54 = vadd.f32 %v2092_v17, %v1999_v27  ;;  %v1869_v44 = vpop.permute.xlu0 %1868  ;;  %v8065_v17 = vld [vmem:[#allocation28_spill] sm:$0xff] }
 0x4e8   :  { %v2000_v36 = vmul.f32 %v1869_v44, %v8058_v63 }
 0x4e9   :  { %v2265_v1 = vmax.f32 %v2227_v54, 0.0 }
 0x4ea   :  { %v1874_v24 = vpop.permute.xlu1 %1873 }
 0x4eb   :  { %v7094_v60 = vpack.c.bf16 %v2265_v1, %v2264_v58  ;;  %v1884_v42 = vpop.permute.xlu0 %1883  ;;  %v2001_v14 = vmul.f32 %v1874_v24, %v8057_v31  ;;  %v8066_v1 = vld [vmem:[#allocation27_spill] sm:$0xff] }
 0x4ec   :  { %v2003_v23 = vmul.f32 %v1884_v42, %v8059_v3  ;;  %v8068_v3 = vld [vmem:[#allocation29_spill] sm:$0xff] }
 0x4ee   :  { %v2102_v22 = vpop.permute.xlu1 %2101 }
 0x4ef   :  { %v1879_v6 = vpop.permute.xlu0 %1878  ;;  %v2229_v9 = vadd.f32 %v2102_v22, %v2001_v14 }
 0x4f0   :  { %v2002_v61 = vmul.f32 %v1879_v6, %v8060_v20 }
 0x4f1   :  { %v2267_v0 = vmax.f32 %v2229_v9, 0.0 }
 0x4f2   :  { %v2112_v13 = vpop.permute.xlu1 %2111 }
 0x4f3   :  { %v2097_v15 = vpop.permute.xlu0 %2096  ;;  %v2231_v11 = vadd.f32 %v2112_v13, %v2003_v23 }
 0x4f4   :  { %v2228_v59 = vadd.f32 %v2097_v15, %v2000_v36  ;;  %v8067_v36 = vld [vmem:[#allocation30_spill] sm:$0xff] }
 0x4f5   :  { %v2269_v46 = vmax.f32 %v2231_v11, 0.0 }
 0x4f6   :  { %v2266_v21 = vmax.f32 %v2228_v59, 0.0  ;;  %v1894_v34 = vpop.permute.xlu1 %1893 }
 0x4f7   :  { %v2107_v29 = vpop.permute.xlu0 %2106  ;;  %v2005_v40 = vmul.f32 %v1894_v34, %v8061_v53  ;;  %v8069_v34 = vld [vmem:[#allocation32_spill] sm:$0xff] }
 0x4f8   :  { %v7100_v8 = vpack.c.bf16 %v2267_v0, %v2266_v21  ;;  %v2230_v52 = vadd.f32 %v2107_v29, %v2002_v61 }
 0x4fa   :  { %v2268_v5 = vmax.f32 %v2230_v52, 0.0  ;;  %v2122_v10 = vpop.permute.xlu1 %2121 }
 0x4fb   :  { %v1889_v43 = vpop.permute.xlu0 %1888  ;;  %v2233_v18 = vadd.f32 %v2122_v10, %v2005_v40 }
 0x4fc   :  { %v2298_v47 = vpack.c.bf16 %v2269_v46, %v2268_v5  ;;  %v2004_v12 = vmul.f32 %v1889_v43, %v8062_v55  ;;  %v8070_v5 = vld [vmem:[#allocation31_spill] sm:$0xff] }
 0x4fd   :  { %v2271_v51 = vmax.f32 %v2233_v18, 0.0 }
 0x4fe   :  { %4948 = vmatprep.subr.bf16.mxu1 %v2298_v47  ;;  %v1904_v62 = vpop.permute.xlu1 %1903 }
 0x4ff   :  { %4949 = vmatpush3.bf16.msra.mxu1 %v7048_v33  ;;  %v2117_v30 = vpop.permute.xlu0 %2116  ;;  %v2007_v2 = vmul.f32 %v1904_v62, %v8063_v19 }
 0x500   :  { %v2232_v49 = vadd.f32 %v2117_v30, %v2004_v12  ;;  %v8071_v12 = vld [vmem:[#allocation34_spill] sm:$0xff] }
 0x502   :  { %v2270_v26 = vmax.f32 %v2232_v49, 0.0  ;;  %v2132_v4 = vpop.permute.xlu1 %2131 }
 0x503   :  { %v1899_v7 = vpop.permute.xlu0 %1898  ;;  %v2235_v35 = vadd.f32 %v2132_v4, %v2007_v2 }
 0x504   :  { %v2299_v57 = vpack.c.bf16 %v2271_v51, %v2270_v26  ;;  %v2006_v16 = vmul.f32 %v1899_v7, %v8064_v50  ;;  %v8072_v51 = vld [vmem:[#allocation33_spill] sm:$0xff] }
 0x505   :  { %v2273_v32 = vmax.f32 %v2235_v35, 0.0 }
 0x506   :  { %4950 = vmatprep.subr.bf16.mxu1 %v2299_v57  ;;  %v1914_v41 = vpop.permute.xlu1 %1913 }
 0x507   :  { %4951 = vmatpush3.bf16.msra.mxu1 %v7062_v48  ;;  %v2127_v39 = vpop.permute.xlu0 %2126  ;;  %v2009_v54 = vmul.f32 %v1914_v41, %v8065_v17 }
 0x508   :  { %v2234_v45 = vadd.f32 %v2127_v39, %v2006_v16  ;;  %v8073_v39 = vld [vmem:[#allocation36_spill] sm:$0xff] }
 0x50a   :  { %v2272_v33 = vmax.f32 %v2234_v45, 0.0  ;;  %v2142_v27 = vpop.permute.xlu1 %2141 }
 0x50b   :  { %v1909_v25 = vpop.permute.xlu0 %1908  ;;  %v2237_v58 = vadd.f32 %v2142_v27, %v2009_v54 }
 0x50c   :  { %v2300_v44 = vpack.c.bf16 %v2273_v32, %v2272_v33  ;;  %v2008_v24 = vmul.f32 %v1909_v25, %v8066_v1  ;;  %v8074_v32 = vld [vmem:[#allocation35_spill] sm:$0xff]  ;;  %v8076_v1 = vld [vmem:[#allocation37_spill] sm:$0xff] }
 0x50d   :  { %v2275_v31 = vmax.f32 %v2237_v58, 0.0 }
 0x50e   :  { %4952 = vmatprep.subr.bf16.mxu1 %v2300_v44  ;;  %v1924_v42 = vpop.permute.xlu1 %1923 }
 0x50f   :  { %4953 = vmatpush3.bf16.msra.mxu1 %v7074_v56  ;;  %v2137_v22 = vpop.permute.xlu0 %2136  ;;  %v2011_v9 = vmul.f32 %v1924_v42, %v8067_v36 }
 0x510   :  { %v2236_v6 = vadd.f32 %v2137_v22, %v2008_v24 }
 0x512   :  { %v2274_v48 = vmax.f32 %v2236_v6, 0.0  ;;  %v2152_v14 = vpop.permute.xlu1 %2151 }
 0x513   :  { %v1919_v63 = vpop.permute.xlu0 %1918  ;;  %v2239_v15 = vadd.f32 %v2152_v14, %v2011_v9  ;;  %v5575_v9 = vld [vmem:[%s7906_s4] ss:$12 sps:$4 sm:$0xff]  }
 0x514   :  { %v2301_v13 = vpack.c.bf16 %v2275_v31, %v2274_v48  ;;  %v2010_v23 = vmul.f32 %v1919_v63, %v8068_v3  ;;  %v8077_v3 = vld [vmem:[#allocation40_spill] sm:$0xff] }
 0x515   :  { %v2277_v61 = vmax.f32 %v2239_v15, 0.0  ;;  %v5580_v15 = vld [vmem:[%s7906_s4 + $0x1c] ss:$12 sps:$4 sm:$0xff]  }
 0x516   :  { %4954 = vmatprep.subr.bf16.mxu1 %v2301_v13  ;;  %v1934_v59 = vpop.permute.xlu1 %1933 }
 0x517   :  { %4955 = vmatpush3.bf16.msra.mxu1 %v7082_v37  ;;  %v2147_v0 = vpop.permute.xlu0 %2146  ;;  %v2013_v29 = vmul.f32 %v1934_v59, %v8069_v34  ;;  %v8080_v34 = vmov 1.0  }
 0x518   :  { %v2238_v20 = vadd.f32 %v2147_v0, %v2010_v23  ;;  %v8078_v0 = vmov 0.0  }
 0x51a   :  { %v2276_v56 = vmax.f32 %v2238_v20, 0.0  ;;  %v2162_v11 = vpop.permute.xlu1 %2161 }
 0x51b   :  { %v1929_v21 = vpop.permute.xlu0 %1928  ;;  %v2241_v46 = vadd.f32 %v2162_v11, %v2013_v29 }
 0x51c   :  { %v2302_v52 = vpack.c.bf16 %v2277_v61, %v2276_v56  ;;  %v2012_v10 = vmul.f32 %v1929_v21, %v8070_v5  ;;  %v8079_v61 = vld [vmem:[#allocation39_spill] sm:$0xff] }
 0x51d   :  { %v2279_v47 = vmax.f32 %v2241_v46, 0.0  ;;  %v5582_v46 = vld [vmem:[%s7906_s4 + $0x18] ss:$12 sps:$4 sm:$0xff]  }
 0x51e   :  { %4956 = vmatprep.subr.bf16.mxu1 %v2302_v52  ;;  %v1944_v43 = vpop.permute.xlu1 %1943 }
 0x51f   :  { %4957 = vmatpush3.bf16.msra.mxu1 %v7086_v38  ;;  %v2157_v53 = vpop.permute.xlu0 %2156  ;;  %v2015_v62 = vmul.f32 %v1944_v43, %v8071_v12  ;;  %v5583_v43 = vld [vmem:[%s7906_s4 + $0x34] ss:$12 sps:$4 sm:$0xff]  }
 0x520   :  { %v2240_v40 = vadd.f32 %v2157_v53, %v2012_v10  ;;  %v8081_v53 = vld [vmem:[#allocation42_spill] sm:$0xff] }
 0x522   :  { %v2278_v37 = vmax.f32 %v2240_v40, 0.0  ;;  %v2172_v18 = vpop.permute.xlu1 %2171 }
 0x523   :  { %v1939_v55 = vpop.permute.xlu0 %1938  ;;  %v2243_v49 = vadd.f32 %v2172_v18, %v2015_v62  ;;  %v8082_v18 = vld [vmem:[#allocation41_spill] sm:$0xff] }
 0x524   :  { %v2303_v30 = vpack.c.bf16 %v2279_v47, %v2278_v37  ;;  %v2014_v26 = vmul.f32 %v1939_v55, %v8072_v51  ;;  %v5585_v51 = vld [vmem:[%s7906_s4 + $0x30] ss:$12 sps:$4 sm:$0xff]  }
 0x525   :  { %v2281_v2 = vmax.f32 %v2243_v49, 0.0 }
 0x526   :  { %4958 = vmatprep.subr.bf16.mxu1 %v2303_v30  ;;  %v1954_v4 = vpop.permute.xlu1 %1953 }
 0x527   :  { %4959 = vmatpush3.bf16.msra.mxu1 %v7090_v28  ;;  %v2167_v7 = vpop.permute.xlu0 %2166  ;;  %v2017_v45 = vmul.f32 %v1954_v4, %v8073_v39  ;;  %v8075_v28 = vld [vmem:[#allocation38_spill] sm:$0xff] }
 0x528   :  { %v2242_v19 = vadd.f32 %v2167_v7, %v2014_v26  ;;  %v5588_v26 = vld [vmem:[%s7906_s4 + $0x4c] ss:$12 sps:$4 sm:$0xff]   ;;  %v5596_v39 = vld [vmem:[%s7906_s4 + $0x7c] ss:$12 sps:$4 sm:$0xff]  }
 0x52a   :  { %v2280_v38 = vmax.f32 %v2242_v19, 0.0  ;;  %v1964_v57 = vpop.permute.xlu1 %1963  ;;  %v5579_v19 = vld [vmem:[%s7906_s4 + $0x20] ss:$12 sps:$4 sm:$0xff]  }
 0x52b   :  { %v1949_v35 = vpop.permute.xlu0 %1948  ;;  %v2019_v54 = vmul.f32 %v1964_v57, %v8075_v28  ;;  %v5591_v57 = vld [vmem:[%s7906_s4 + $0x64] ss:$12 sps:$4 sm:$0xff]  }
 0x52c   :  { %v2304_v50 = vpack.c.bf16 %v2281_v2, %v2280_v38  ;;  %v2016_v33 = vmul.f32 %v1949_v35, %v8074_v32  ;;  %v5586_v2 = vld [vmem:[%s7906_s4 + $0x38] ss:$12 sps:$4 sm:$0xff]   ;;  %v5590_v38 = vld [vmem:[%s7906_s4 + $0x48] ss:$12 sps:$4 sm:$0xff]   ;;  %v8083_v35 = vmov 0  }
 0x52d   :  { %v5602_v32 = vld [vmem:[%s7906_s4 + $0x98] ss:$12 sps:$4 sm:$0xff]   ;;  %v5601_v28 = vld [vmem:[%s7906_s4 + $0x90] ss:$12 sps:$4 sm:$0xff]  }
 0x52e   :  { %4960 = vmatprep.subr.bf16.mxu1 %v2304_v50  ;;  %v2182_v16 = vpop.permute.xlu1 %2181  ;;  %v5587_v50 = vld [vmem:[%s7906_s4 + $0x50] ss:$12 sps:$4 sm:$0xff]  }
 0x52f   :  { %4961 = vmatpush3.bf16.msra.mxu1 %v7094_v60  ;;  %v1959_v41 = vpop.permute.xlu0 %1958  ;;  %v2245_v27 = vadd.f32 %v2182_v16, %v2017_v45  ;;  %v5594_v16 = vld [vmem:[%s7906_s4 + $0x68] ss:$12 sps:$4 sm:$0xff]   ;;  %v5595_v45 = vld [vmem:[%s7906_s4 + $0x80] ss:$12 sps:$4 sm:$0xff]  }
 0x530   :  { %v2018_v24 = vmul.f32 %v1959_v41, %v8076_v1  ;;  %v5593_v41 = vld [vmem:[%s7906_s4 + $0x60] ss:$12 sps:$4 sm:$0xff]   ;;  %v5607_v1 = vld [vmem:[%s7906_s4 + $0xc4] ss:$12 sps:$4 sm:$0xff]  }
 0x531   :  { %v2283_v58 = vmax.f32 %v2245_v27, 0.0  ;;  %v5599_v27 = vld [vmem:[%s7906_s4 + $0x94] ss:$12 sps:$4 sm:$0xff]  }
 0x532   :  { %v2192_v25 = vpop.permute.xlu1 %2191 }
 0x533   :  { %v2177_v17 = vpop.permute.xlu0 %2176  ;;  %v2247_v42 = vadd.f32 %v2192_v25, %v2019_v54  ;;  %v5603_v25 = vld [vmem:[%s7906_s4 + $0xb0] ss:$12 sps:$4 sm:$0xff]   ;;  %v5604_v54 = vld [vmem:[%s7906_s4 + $0xac] ss:$12 sps:$4 sm:$0xff]  }
 0x534   :  { %v2244_v44 = vadd.f32 %v2177_v17, %v2016_v33  ;;  %v5598_v33 = vld [vmem:[%s7906_s4 + $0x78] ss:$12 sps:$4 sm:$0xff]   ;;  %v5610_v17 = vld [vmem:[%s7906_s4 + $0xc8] ss:$12 sps:$4 sm:$0xff]  }
 0x535   :  { %v2285_v14 = vmax.f32 %v2247_v42, 0.0  ;;  %v5609_v42 = vld [vmem:[%s7906_s4 + $0xc0] ss:$12 sps:$4 sm:$0xff]  }
 0x536   :  { %v2282_v22 = vmax.f32 %v2244_v44, 0.0  ;;  %v1974_v6 = vpop.permute.xlu1 %1973  ;;  %v5611_v44 = vld [vmem:[%s7906_s4 + $0xe0] ss:$0 sps:$4 sm:$0x77]  }
 0x537   :  { %v2187_v31 = vpop.permute.xlu0 %2186  ;;  %v2021_v23 = vmul.f32 %v1974_v6, %v8077_v3 }
 0x538   :  { %v2305_v48 = vpack.c.bf16 %v2283_v58, %v2282_v22  ;;  %v2246_v60 = vadd.f32 %v2187_v31, %v2018_v24  ;;  %v5606_v58 = vld [vmem:[%s7906_s4 + $0xa8] ss:$12 sps:$4 sm:$0xff]   ;;  %v2345_v24 = vld [vmem:[%s7906_s4 + $0xd8] sm:$0x77]  ;;  %s5766_s4 = scalar_lea.vmem %s4604_s1, 16 }
 0x539   :  { %v4759_v22 = vcombine.high %v2345_v24, %v2345_v24  ;;  %v4758_v6 = vcombine.low %v2345_v24, %v2345_v24  ;;  %p5767_p0 = scmp.ne.s32.totalorder %s4604_s1, %s5766_s4  ;;  %p5772_p2 = scmp.lt.s32.totalorder %s5770_s18, %s5766_s4 }
 0x53a   :  { %v2284_v63 = vmax.f32 %v2246_v60, 0.0  ;;  %4962 = vmatprep.subr.bf16.mxu1 %v2305_v48  ;;  %v2202_v36 = vpop.permute.xlu1 %2201 }
 0x53b   :  { %4963 = vmatpush3.bf16.msra.mxu1 %v7100_v8  ;;  %v1969_v13 = vpop.permute.xlu0 %1968  ;;  %v2249_v20 = vadd.f32 %v2202_v36, %v2021_v23  ;;  %p5773_p3 = por %p5772_p2, %p5771_p1 }
 0x53c   :  { %v2306_v59 = vpack.c.bf16 %v2285_v14, %v2284_v63  ;;  %5404 = vmatprep.subr.mxu1 %v8078_v0  ;;  %v2020_v56 = vmul.f32 %v1969_v13, %v8079_v61 }
 0x53d   :  { %v2287_v29 = vmax.f32 %v2249_v20, 0.0  ;;  %p5774_p4 = pnand %p5773_p3, %p5767_p0 }
 0x53e   :  { %5319 = vmatprep.subr.bf16.mxu0 %v2306_v59  ;;  %v1984_v11 = vpop.permute.xlu1 %1983  ;;  %2560 = vmatmul.mubr.bf16.vlgmr.msra.gmra.mrb[80].mxu1 %v5575_v9 }
 0x53f   :  { %5320 = vmatpush3.bf16.msra.mxu0 %v2306_v59  ;;  %v2197_v21 = vpop.permute.xlu0 %2196  ;;  %2567 = vmatprep.mubr.bf16.mxu1 %v5580_v15  ;;  %v2023_v40 = vmul.f32 %v1984_v11, %v8081_v53 }
 0x540   :  { %v2248_v8 = vadd.f32 %v2197_v21, %v2020_v56  ;;  %5405 = vmatpush3.msra.mxu1 %v8080_v34 }
 0x541   :  { %5486 = vmatprep.subr.mxu1 %v8078_v0 }
 0x542   :  { %v2286_v52 = vmax.f32 %v2248_v8, 0.0  ;;  %v2212_v5 = vpop.permute.xlu1 %2211 }
 0x543   :  { %v1979_v10 = vpop.permute.xlu0 %1978  ;;  %v2251_v37 = vadd.f32 %v2212_v5, %v2023_v40 }
 0x544   :  { %v2307_v47 = vpack.c.bf16 %v2287_v29, %v2286_v52  ;;  %v2022_v55 = vmul.f32 %v1979_v10, %v8082_v18 }
 0x545   :  { %v2289_v30 = vmax.f32 %v2251_v37, 0.0 }
 0x546   :  { %5321 = vmatprep.subr.bf16.mxu0 %v2307_v47  ;;  %2568 = vmatmul.mubr.bf16.gmra.mrb[84].mxu1 %v5582_v46 }
 0x547   :  { %5322 = vmatpush3.bf16.msra.mxu0 %v2307_v47  ;;  %v2207_v12 = vpop.permute.xlu0 %2206  ;;  %2575 = vmatprep.mubr.bf16.mxu1 %v5583_v43 }
 0x548   :  { %v2250_v62 = vadd.f32 %v2207_v12, %v2022_v55 }
 0x54a   :  { %v2288_v49 = vmax.f32 %v2250_v62, 0.0 }
 0x54c   :  { %v2308_v4 = vpack.c.bf16 %v2289_v30, %v2288_v49 }
 0x54e   :  { %5543 = vmatprep.subr.msk.bf16.mxu0 %vm2523_vm7, %v2308_v4  ;;  %v2525_v7 = vsel %vm2523_vm7, %v2308_v4, 0  ;;  %2576 = vmatmul.mubr.bf16.gmra.mrb[88].mxu1 %v5585_v51 }
 0x54f   :  { %5324 = vmatpush3.bf16.msra.mxu0 %v2525_v7  ;;  %2583 = vmatprep.mubr.bf16.mxu1 %v5588_v26 }
 0x550   :  { %5345 = vmatprep.subr.mxu0 %v8078_v0 }
 0x552   :  { %5326 = vmatmul.mubr.msk.bf16.vlgmr.msra.gmra.mrb[80].mxu0 %vm2492_vm6, %v5579_v19 }
 0x553   :  { %5329 = vmatprep.mubr.msk.bf16.mxu0 %vm2492_vm6, %v5586_v2  ;;  %5346 = vmatpush3.msra.mxu0 %v8080_v34 }
 0x554   :  { %3746 = vmatprep.subr.bf16.mxu0 %v8083_v35 }
 0x556   :  { %2584 = vmatmul.mubr.bf16.gmra.mrb[92].mxu1 %v5590_v38 }
 0x557   :  { %2591 = vmatprep.mubr.bf16.mxu1 %v5591_v57 }
 0x55a   :  { %5330 = vmatmul.mubr.msk.bf16.gmra.mrb[84].mxu0 %vm2492_vm6, %v5587_v50 }
 0x55b   :  { %5333 = vmatprep.mubr.msk.bf16.mxu0 %vm2492_vm6, %v5594_v16 }
 0x55e   :  { %2592 = vmatmul.mubr.bf16.gmra.mrb[96].mxu1 %v5593_v41 }
 0x55f   :  { %2599 = vmatprep.mubr.bf16.mxu1 %v5596_v39 }
 0x562   :  { %5334 = vmatmul.mubr.msk.bf16.gmra.mrb[88].mxu0 %vm2492_vm6, %v5595_v45 }
 0x563   :  { %5337 = vmatprep.mubr.msk.bf16.mxu0 %vm2492_vm6, %v5602_v32 }
 0x566   :  { %2600 = vmatmul.mubr.bf16.gmra.mrb[100].mxu1 %v5598_v33 }
 0x567   :  { %2607 = vmatprep.mubr.bf16.mxu1 %v5599_v27 }
 0x56a   :  { %5338 = vmatmul.mubr.msk.bf16.gmra.mrb[92].mxu0 %vm2492_vm6, %v5603_v25 }
 0x56b   :  { %5341 = vmatprep.mubr.msk.bf16.mxu0 %vm2492_vm6, %v5610_v17 }
 0x56e   :  { %2608 = vmatmul.mubr.bf16.gmra.mrb[104].mxu1 %v5601_v28 }
 0x56f   :  { %2615 = vmatprep.mubr.bf16.mxu1 %v5604_v54 }
 0x572   :  { %5342 = vmatmul.mubr.msk.bf16.gmra.mrb[96].mxu0 %vm2492_vm6, %v5611_v44 }
 0x573   :  { %5347 = vmatprep.mubr.msk.f32.mxu0 %vm5791_vm1, %v8078_v0 }
 0x576   :  { %2616 = vmatmul.mubr.bf16.gmra.mrb[108].mxu1 %v5606_v58 }
 0x577   :  { %2623 = vmatprep.mubr.bf16.mxu1 %v5607_v1 }
 0x57e   :  { %2624 = vmatmul.mubr.bf16.gmra.mrb[112].mxu1 %v5609_v42 }
 0x57f   :  { %2631 = vmatprep.mubr.bf16.mxu1 %v4759_v22 }
 0x586   :  { %2632 = vmatmul.mubr.bf16.gmra.mrb[116].mxu1 %v4758_v6 }
 0x587   :  { %5406 = vmatprep.mubr.msk.f32.mxu1 %vm5791_vm1, %v8078_v0 }
 0x611   :  { %v4964_v31 = vpop.f32.mrb[80].mxu1 }
 0x612   :  { %v4965_v48 = vpop.f32.mrb[81].mxu1 }
 0x613   :  { %v4966_v60 = vadd.f32 %v4965_v48, %v4964_v31  ;;  %v4967_v14 = vpop.f32.mrb[82].mxu1 }
 0x614   :  { %v4968_v63 = vpop.f32.mrb[83].mxu1 }
 0x615   :  { %v4969_v36 = vadd.f32 %v4968_v63, %v4967_v14 }
 0x619   :  { %v4970_v9 = vpop.f32.mrb[84].mxu1 }
 0x61a   :  { %v4971_v13 = vpop.f32.mrb[85].mxu1 }
 0x61b   :  { %v4972_v15 = vadd.f32 %v4971_v13, %v4970_v9  ;;  %v4973_v3 = vpop.f32.mrb[86].mxu1 }
 0x61c   :  { %v4974_v23 = vpop.f32.mrb[87].mxu1 }
 0x61d   :  { %v4975_v59 = vadd.f32 %v4974_v23, %v4973_v3 }
 0x621   :  { %v4976_v20 = vpop.f32.mrb[88].mxu1 }
 0x622   :  { %v4977_v61 = vpop.f32.mrb[89].mxu1 }
 0x623   :  { %v4978_v56 = vadd.f32 %v4977_v61, %v4976_v20  ;;  %v4979_v11 = vpop.f32.mrb[90].mxu1 }
 0x624   :  { %v4980_v21 = vpop.f32.mrb[91].mxu1 }
 0x625   :  { %v5327_v8 = vpop.f32.mrb[80].mxu0  ;;  %v4981_v29 = vadd.f32 %v4980_v21, %v4979_v11 }
 0x626   :  { %v2673_v52 = vpop.f32.mrb[81].mxu0  ;;  %v7230_v46 = vadd.f32 %v5327_v8, %v4972_v15 }
 0x627   :  { %v7232_v5 = vadd.f32 %v4966_v60, %v2673_v52  ;;  %v5328_v10 = vpop.f32.mrb[82].mxu0 }
 0x628   :  { %v2676_v43 = vpop.f32.mrb[83].mxu0  ;;  %v7234_v53 = vadd.f32 %v5328_v10, %v4975_v59  ;;  %v2970_v57 = vmul.f32 %v7230_v46, %v7230_v46 }
 0x629   :  { %v2968_v40 = vmul.f32 %v7232_v5, %v7232_v5  ;;  %5348 = vmatmul.mubr.msk.f32.vlgmr.msra.gmra.mrb[100].mxu0 %vm563_vm5, %v7232_v5  ;;  %v7240_v47 = vadd.f32 %v4969_v36, %v2676_v43  ;;  %v4982_v37 = vpop.f32.mrb[92].mxu1 }
 0x62a   :  { %5350 = vmatprep.mubr.msk.f32.mxu0 %vm5791_vm1, %v8078_v0  ;;  %v4983_v18 = vpop.f32.mrb[93].mxu1  ;;  %v2971_v33 = vmul.f32 %v7234_v53, %v7234_v53 }
 0x62b   :  { %5407 = vmatmul.mubr.msk.f32.vlgmr.msra.gmra.mrb[120].mxu1 %vm563_vm5, %v2968_v40  ;;  %v4984_v55 = vadd.f32 %v4983_v18, %v4982_v37  ;;  %v4985_v12 = vpop.f32.mrb[94].mxu1  ;;  %v2969_v30 = vmul.f32 %v7240_v47, %v7240_v47 }
 0x62c   :  { %5409 = vmatprep.mubr.msk.f32.mxu1 %vm5791_vm1, %v8078_v0  ;;  %v4986_v62 = vpop.f32.mrb[95].mxu1  ;;  %5487 = vmatpush3.msra.mxu1 %v8080_v34 }
 0x62d   :  { %5351 = vmatmul.mubr.msk.f32.gmra.mrb[102].mxu0 %vm563_vm5, %v7240_v47  ;;  %v5331_v49 = vpop.f32.mrb[84].mxu0  ;;  %v4987_v51 = vadd.f32 %v4986_v62, %v4985_v12  ;;  %5521 = vmatprep.subr.mxu1 %v8080_v34 }
 0x62e   :  { %5353 = vmatprep.mubr.msk.f32.mxu0 %vm5791_vm1, %v8078_v0  ;;  %v2689_v26 = vpop.f32.mrb[85].mxu0  ;;  %v7255_v4 = vadd.f32 %v5331_v49, %v4984_v55 }
 0x62f   :  { %5410 = vmatmul.mubr.msk.f32.gmra.mrb[122].mxu1 %vm563_vm5, %v2969_v30  ;;  %v7258_v7 = vadd.f32 %v4978_v56, %v2689_v26  ;;  %v5332_v19 = vpop.f32.mrb[86].mxu0 }
 0x630   :  { %5412 = vmatprep.mubr.msk.f32.mxu1 %vm5791_vm1, %v8078_v0  ;;  %v2692_v2 = vpop.f32.mrb[87].mxu0  ;;  %v7262_v38 = vadd.f32 %v5332_v19, %v4987_v51  ;;  %v2974_v3 = vmul.f32 %v7255_v4, %v7255_v4 }
 0x631   :  { %5354 = vmatmul.mubr.msk.f32.gmra.mrb[104].mxu0 %vm563_vm5, %v7230_v46  ;;  %v7268_v50 = vadd.f32 %v4981_v29, %v2692_v2  ;;  %v4988_v16 = vpop.f32.mrb[96].mxu1  ;;  %v2972_v28 = vmul.f32 %v7258_v7, %v7258_v7 }
 0x632   :  { %5356 = vmatprep.mubr.msk.f32.mxu0 %vm5791_vm1, %v8078_v0  ;;  %v4989_v41 = vpop.f32.mrb[97].mxu1  ;;  %v2975_v11 = vmul.f32 %v7262_v38, %v7262_v38 }
 0x633   :  { %5413 = vmatmul.mubr.msk.f32.gmra.mrb[124].mxu1 %vm563_vm5, %v2970_v57  ;;  %v4990_v39 = vadd.f32 %v4989_v41, %v4988_v16  ;;  %v4991_v45 = vpop.f32.mrb[98].mxu1  ;;  %v2973_v48 = vmul.f32 %v7268_v50, %v7268_v50 }
 0x634   :  { %5415 = vmatprep.mubr.msk.f32.mxu1 %vm5791_vm1, %v8078_v0  ;;  %v4992_v32 = vpop.f32.mrb[99].mxu1 }
 0x635   :  { %5357 = vmatmul.mubr.msk.f32.gmra.mrb[106].mxu0 %vm563_vm5, %v7234_v53  ;;  %v5335_v27 = vpop.f32.mrb[88].mxu0  ;;  %v4993_v25 = vadd.f32 %v4992_v32, %v4991_v45 }
 0x636   :  { %5359 = vmatprep.mubr.msk.f32.mxu0 %vm5791_vm1, %v8078_v0  ;;  %v2705_v17 = vpop.f32.mrb[89].mxu0 }
 0x637   :  { %5416 = vmatmul.mubr.msk.f32.gmra.mrb[126].mxu1 %vm563_vm5, %v2971_v33  ;;  %v7284_v54 = vadd.f32 %v4990_v39, %v2705_v17  ;;  %v5336_v44 = vpop.f32.mrb[90].mxu0 }
 0x638   :  { %5418 = vmatprep.mubr.msk.f32.mxu1 %vm5791_vm1, %v8078_v0  ;;  %v2708_v58 = vpop.f32.mrb[91].mxu0 }
 0x639   :  { %5360 = vmatmul.mubr.msk.f32.gmra.mrb[108].mxu0 %vm563_vm5, %v7258_v7  ;;  %v7290_v1 = vadd.f32 %v4993_v25, %v2708_v58  ;;  %v4994_v24 = vpop.f32.mrb[100].mxu1  ;;  %v2976_v10 = vmul.f32 %v7284_v54, %v7284_v54 }
 0x63a   :  { %5362 = vmatprep.mubr.msk.f32.mxu0 %vm5791_vm1, %v8078_v0  ;;  %v4995_v42 = vpop.f32.mrb[101].mxu1 }
 0x63b   :  { %5419 = vmatmul.mubr.msk.f32.gmra.mrb[128].mxu1 %vm563_vm5, %v2972_v28  ;;  %v4996_v22 = vadd.f32 %v4995_v42, %v4994_v24  ;;  %v4997_v6 = vpop.f32.mrb[102].mxu1  ;;  %v2977_v49 = vmul.f32 %v7290_v1, %v7290_v1 }
 0x63c   :  { %5421 = vmatprep.mubr.msk.f32.mxu1 %vm5791_vm1, %v8078_v0  ;;  %v4998_v31 = vpop.f32.mrb[103].mxu1 }
 0x63d   :  { %5363 = vmatmul.mubr.msk.f32.gmra.mrb[110].mxu0 %vm563_vm5, %v7268_v50  ;;  %v7301_v60 = vadd.f32 %v5335_v27, %v4996_v22  ;;  %v4999_v14 = vadd.f32 %v4998_v31, %v4997_v6  ;;  %v5339_v63 = vpop.f32.mrb[92].mxu0 }
 0x63e   :  { %5365 = vmatprep.mubr.msk.f32.mxu0 %vm5791_vm1, %v8078_v0  ;;  %v2721_v36 = vpop.f32.mrb[93].mxu0 }
 0x63f   :  { %5422 = vmatmul.mubr.msk.f32.gmra.mrb[130].mxu1 %vm563_vm5, %v2973_v48  ;;  %v7306_v9 = vadd.f32 %v5336_v44, %v4999_v14  ;;  %v5340_v13 = vpop.f32.mrb[94].mxu0  ;;  %v2978_v2 = vmul.f32 %v7301_v60, %v7301_v60 }
 0x640   :  { %5424 = vmatprep.mubr.msk.f32.mxu1 %vm5791_vm1, %v8078_v0  ;;  %v2724_v15 = vpop.f32.mrb[95].mxu0 }
 0x641   :  { %5366 = vmatmul.mubr.msk.f32.gmra.mrb[112].mxu0 %vm563_vm5, %v7255_v4  ;;  %v5000_v23 = vpop.f32.mrb[104].mxu1  ;;  %v2979_v32 = vmul.f32 %v7306_v9, %v7306_v9 }
 0x642   :  { %5368 = vmatprep.mubr.msk.f32.mxu0 %vm5791_vm1, %v8078_v0  ;;  %v5001_v59 = vpop.f32.mrb[105].mxu1 }
 0x643   :  { %5425 = vmatmul.mubr.msk.f32.gmra.mrb[132].mxu1 %vm563_vm5, %v2974_v3  ;;  %v5002_v20 = vadd.f32 %v5001_v59, %v5000_v23  ;;  %v5003_v61 = vpop.f32.mrb[106].mxu1 }
 0x644   :  { %5427 = vmatprep.mubr.msk.f32.mxu1 %vm5791_vm1, %v8078_v0  ;;  %v5004_v56 = vpop.f32.mrb[107].mxu1 }
 0x645   :  { %5369 = vmatmul.mubr.msk.f32.gmra.mrb[114].mxu0 %vm563_vm5, %v7262_v38  ;;  %v7323_v21 = vadd.f32 %v5002_v20, %v2721_v36  ;;  %v5005_v8 = vadd.f32 %v5004_v56, %v5003_v61  ;;  %v5343_v29 = vpop.f32.mrb[96].mxu0 }
 0x646   :  { %5371 = vmatprep.mubr.msk.f32.mxu0 %vm5791_vm1, %v8078_v0  ;;  %v2737_v52 = vpop.f32.mrb[97].mxu0 }
 0x647   :  { %5428 = vmatmul.mubr.msk.f32.gmra.mrb[134].mxu1 %vm563_vm5, %v2975_v11  ;;  %v7330_v43 = vadd.f32 %v5005_v8, %v2724_v15  ;;  %v5344_v40 = vpop.f32.mrb[98].mxu0  ;;  %v2980_v25 = vmul.f32 %v7323_v21, %v7323_v21 }
 0x648   :  { %5430 = vmatprep.mubr.msk.f32.mxu1 %vm5791_vm1, %v8078_v0  ;;  %v2740_v37 = vpop.f32.mrb[99].mxu0 }
 0x649   :  { %5372 = vmatmul.mubr.msk.f32.gmra.mrb[116].mxu0 %vm563_vm5, %v7284_v54  ;;  %v5006_v18 = vpop.f32.mrb[108].mxu1  ;;  %v2981_v22 = vmul.f32 %v7330_v43, %v7330_v43 }
 0x64a   :  { %5374 = vmatprep.mubr.msk.f32.mxu0 %vm5791_vm1, %v8078_v0  ;;  %v5007_v55 = vpop.f32.mrb[109].mxu1 }
 0x64b   :  { %5431 = vmatmul.mubr.msk.f32.gmra.mrb[136].mxu1 %vm563_vm5, %v2976_v10  ;;  %v5008_v12 = vadd.f32 %v5007_v55, %v5006_v18  ;;  %v5009_v62 = vpop.f32.mrb[110].mxu1 }
 0x64c   :  { %5433 = vmatprep.mubr.msk.f32.mxu1 %vm5791_vm1, %v8078_v0  ;;  %v5010_v30 = vpop.f32.mrb[111].mxu1 }
 0x64d   :  { %5375 = vmatmul.mubr.msk.f32.gmra.mrb[118].mxu0 %vm563_vm5, %v7290_v1  ;;  %v7345_v51 = vadd.f32 %v5339_v63, %v5008_v12  ;;  %v5011_v26 = vadd.f32 %v5010_v30, %v5009_v62 }
 0x64e   :  { %5377 = vmatprep.mubr.msk.f32.mxu0 %vm5791_vm1, %v8078_v0 }
 0x64f   :  { %5434 = vmatmul.mubr.msk.f32.gmra.mrb[138].mxu1 %vm563_vm5, %v2977_v49  ;;  %v7350_v19 = vadd.f32 %v5340_v13, %v5011_v26  ;;  %v2982_v31 = vmul.f32 %v7345_v51, %v7345_v51 }
 0x650   :  { %5436 = vmatprep.mubr.msk.f32.mxu1 %vm5791_vm1, %v8078_v0 }
 0x651   :  { %5378 = vmatmul.mubr.msk.f32.gmra.mrb[120].mxu0 %vm563_vm5, %v7301_v60  ;;  %v5012_v57 = vpop.f32.mrb[112].mxu1  ;;  %v2983_v48 = vmul.f32 %v7350_v19, %v7350_v19 }
 0x652   :  { %5380 = vmatprep.mubr.msk.f32.mxu0 %vm5791_vm1, %v8078_v0  ;;  %v5013_v16 = vpop.f32.mrb[113].mxu1 }
 0x653   :  { %5437 = vmatmul.mubr.msk.f32.gmra.mrb[140].mxu1 %vm563_vm5, %v2978_v2  ;;  %v5014_v41 = vadd.f32 %v5013_v16, %v5012_v57  ;;  %v5015_v39 = vpop.f32.mrb[114].mxu1 }
 0x654   :  { %5439 = vmatprep.mubr.msk.f32.mxu1 %vm5791_vm1, %v8078_v0  ;;  %v5016_v45 = vpop.f32.mrb[115].mxu1 }
 0x655   :  { %5381 = vmatmul.mubr.msk.f32.gmra.mrb[122].mxu0 %vm563_vm5, %v7306_v9  ;;  %v7367_v33 = vadd.f32 %v5014_v41, %v2737_v52  ;;  %v5017_v27 = vadd.f32 %v5016_v45, %v5015_v39 }
 0x656   :  { %5383 = vmatprep.mubr.msk.f32.mxu0 %vm5791_vm1, %v8078_v0 }
 0x657   :  { %5440 = vmatmul.mubr.msk.f32.gmra.mrb[142].mxu1 %vm563_vm5, %v2979_v32  ;;  %v7374_v17 = vadd.f32 %v5017_v27, %v2740_v37  ;;  %v2984_v14 = vmul.f32 %v7367_v33, %v7367_v33 }
 0x658   :  { %5442 = vmatprep.mubr.msk.f32.mxu1 %vm5791_vm1, %v8078_v0 }
 0x659   :  { %5384 = vmatmul.mubr.msk.f32.gmra.mrb[124].mxu0 %vm563_vm5, %v7323_v21  ;;  %v5018_v28 = vpop.f32.mrb[116].mxu1  ;;  %v2985_v63 = vmul.f32 %v7374_v17, %v7374_v17 }
 0x65a   :  { %5386 = vmatprep.mubr.msk.f32.mxu0 %vm5791_vm1, %v8078_v0  ;;  %v5019_v44 = vpop.f32.mrb[117].mxu1 }
 0x65b   :  { %5443 = vmatmul.mubr.msk.f32.gmra.mrb[144].mxu1 %vm563_vm5, %v2980_v25  ;;  %v5020_v58 = vadd.f32 %v5019_v44, %v5018_v28  ;;  %v5021_v24 = vpop.f32.mrb[118].mxu1 }
 0x65c   :  { %5445 = vmatprep.mubr.msk.f32.mxu1 %vm5791_vm1, %v8078_v0  ;;  %v5022_v42 = vpop.f32.mrb[119].mxu1 }
 0x65d   :  { %5387 = vmatmul.mubr.msk.f32.gmra.mrb[126].mxu0 %vm563_vm5, %v7330_v43  ;;  %v7389_v6 = vadd.f32 %v5343_v29, %v5020_v58 }
 0x65e   :  { %5389 = vmatprep.mubr.msk.f32.mxu0 %vm5791_vm1, %v8078_v0 }
 0x65f   :  { %5446 = vmatmul.mubr.msk.f32.gmra.mrb[146].mxu1 %vm563_vm5, %v2981_v22  ;;  %v2986_v36 = vmul.f32 %v7389_v6, %v7389_v6 }
 0x660   :  { %5448 = vmatprep.mubr.msk.f32.mxu1 %vm5791_vm1, %v8078_v0 }
 0x661   :  { %5390 = vmatmul.mubr.msk.f32.gmra.mrb[128].mxu0 %vm563_vm5, %v7345_v51 }
 0x662   :  { %5392 = vmatprep.mubr.msk.f32.mxu0 %vm5791_vm1, %v8078_v0 }
 0x663   :  { %5449 = vmatmul.mubr.msk.f32.gmra.mrb[148].mxu1 %vm563_vm5, %v2982_v31 }
 0x664   :  { %5451 = vmatprep.mubr.msk.f32.mxu1 %vm5791_vm1, %v8078_v0 }
 0x665   :  { %5393 = vmatmul.mubr.msk.f32.gmra.mrb[130].mxu0 %vm563_vm5, %v7350_v19 }
 0x666   :  { %5395 = vmatprep.mubr.msk.f32.mxu0 %vm5791_vm1, %v8078_v0 }
 0x667   :  { %5452 = vmatmul.mubr.msk.f32.gmra.mrb[150].mxu1 %vm563_vm5, %v2983_v48 }
 0x668   :  { %5454 = vmatprep.mubr.msk.f32.mxu1 %vm5791_vm1, %v8078_v0 }
 0x669   :  { %5396 = vmatmul.mubr.msk.f32.gmra.mrb[132].mxu0 %vm563_vm5, %v7367_v33 }
 0x66a   :  { %5398 = vmatprep.mubr.msk.f32.mxu0 %vm5791_vm1, %v8078_v0 }
 0x66b   :  { %5455 = vmatmul.mubr.msk.f32.gmra.mrb[152].mxu1 %vm563_vm5, %v2984_v14 }
 0x66c   :  { %5457 = vmatprep.mubr.msk.f32.mxu1 %vm5791_vm1, %v8078_v0 }
 0x66d   :  { %5399 = vmatmul.mubr.msk.f32.gmra.mrb[134].mxu0 %vm563_vm5, %v7374_v17 }
 0x66e   :  { %5401 = vmatprep.mubr.msk.f32.mxu0 %vm5791_vm1, %v8078_v0 }
 0x66f   :  { %5458 = vmatmul.mubr.msk.f32.gmra.mrb[154].mxu1 %vm563_vm5, %v2985_v63 }
 0x670   :  { %5460 = vmatprep.mubr.msk.f32.mxu1 %vm5791_vm1, %v8078_v0 }
 0x671   :  { %5402 = vmatmul.mubr.msk.f32.gmra.mrb[136].mxu0 %vm563_vm5, %v7389_v6 }
 0x673   :  { %5461 = vmatmul.mubr.msk.f32.gmra.mrb[156].mxu1 %vm563_vm5, %v2986_v36 }
 0x674   :  { %5488 = vmatprep.mubr.msk.f32.mxu1 %vm5791_vm1, %v8078_v0 }
 0x6fc   :  { %v2874_v13 = vpop.f32.mrb[100].mxu0 }
 0x6fd   :  { %v7439_v15 = vmul.f32 0.125, %v2874_v13  ;;  %v5349_v3 = vpop.f32.mrb[101].mxu0 }
 0x6fe   :  { %v3110_v23 = vpop.f32.mrb[120].mxu1 }
 0x6ff   :  { %v3242_v59 = vmul.f32 %v7439_v15, %v7439_v15  ;;  %v3223_v20 = vmul.f32 0.125, %v3110_v23  ;;  %v5408_v61 = vpop.f32.mrb[121].mxu1 }
 0x700   :  { %v2879_v56 = vpop.f32.mrb[102].mxu0 }
 0x701   :  { %v3261_v11 = vsub.f32 %v3223_v20, %v3242_v59  ;;  %v7443_v8 = vmul.f32 0.125, %v2879_v56  ;;  %v5352_v29 = vpop.f32.mrb[103].mxu0  ;;  %v3299_v20 = vld [vmem:[%s7910_s8 + $0x130] sm:$0xff] }
 0x702   :  { %v3115_v52 = vpop.f32.mrb[122].mxu1 }
 0x703   :  { %v3280_v10 = vmax.f32 %v3261_v11, 0.0  ;;  %v3243_v40 = vmul.f32 %v7443_v8, %v7443_v8  ;;  %v3224_v37 = vmul.f32 0.125, %v3115_v52  ;;  %v5411_v18 = vpop.f32.mrb[123].mxu1 }
 0x704   :  { %v2884_v55 = vpop.f32.mrb[104].mxu0 }
 0x705   :  { %v3337_v12 = vadd.f32 1e-05, %v3280_v10  ;;  %v3262_v62 = vsub.f32 %v3224_v37, %v3243_v40  ;;  %v7447_v30 = vmul.f32 0.125, %v2884_v55  ;;  %v5355_v49 = vpop.f32.mrb[105].mxu0 }
 0x706   :  { %v3120_v26 = vpop.f32.mrb[124].mxu1  ;;  %v3318_v49 = vld [vmem:[%s7910_s8 + $0x340] sm:$0xff] }
 0x707   :  { %5708 = vrsqrt.f32 %v3337_v12  ;;  %v3281_v2 = vmax.f32 %v3262_v62, 0.0  ;;  %v3244_v57 = vmul.f32 %v7447_v30, %v7447_v30  ;;  %v3225_v16 = vmul.f32 0.125, %v3120_v26  ;;  %v5414_v41 = vpop.f32.mrb[125].mxu1  ;;  %v3300_v26 = vld [vmem:[%s7910_s8 + $0x138] sm:$0xff] }
 0x708   :  { %v2889_v39 = vpop.f32.mrb[106].mxu0 }
 0x709   :  { %v3338_v45 = vadd.f32 1e-05, %v3281_v2  ;;  %v3263_v32 = vsub.f32 %v3225_v16, %v3244_v57  ;;  %v7451_v27 = vmul.f32 0.125, %v2889_v39  ;;  %v5358_v25 = vpop.f32.mrb[107].mxu0 }
 0x70a   :  { %v3125_v28 = vpop.f32.mrb[126].mxu1 }
 0x70b   :  { %5710 = vrsqrt.f32 %v3338_v45  ;;  %v3282_v44 = vmax.f32 %v3263_v32, 0.0  ;;  %v3245_v58 = vmul.f32 %v7451_v27, %v7451_v27  ;;  %v3226_v24 = vmul.f32 0.125, %v3125_v28  ;;  %v5417_v42 = vpop.f32.mrb[127].mxu1 }
 0x70c   :  { %v2894_v22 = vpop.f32.mrb[108].mxu0 }
 0x70d   :  { %v3339_v31 = vadd.f32 1e-05, %v3282_v44  ;;  %v3264_v48 = vsub.f32 %v3226_v24, %v3245_v58  ;;  %v7455_v14 = vmul.f32 0.125, %v2894_v22  ;;  %v5361_v63 = vpop.f32.mrb[109].mxu0 }
 0x70e   :  { %v3130_v36 = vpop.f32.mrb[128].mxu1 }
 0x70f   :  { %5712 = vrsqrt.f32 %v3339_v31  ;;  %v3283_v13 = vmax.f32 %v3264_v48, 0.0  ;;  %v3246_v3 = vmul.f32 %v7455_v14, %v7455_v14  ;;  %v3227_v23 = vmul.f32 0.125, %v3130_v36  ;;  %v5420_v59 = vpop.f32.mrb[129].mxu1  ;;  %v3301_v31 = vld [vmem:[%s7910_s8 + $0x140] sm:$0xff] }
 0x710   :  { %v2899_v61 = vpop.f32.mrb[110].mxu0 }
 0x711   :  { %v5709_v56 = vpop.eup %5708  ;;  %v3340_v11 = vadd.f32 1e-05, %v3283_v13  ;;  %v3265_v29 = vsub.f32 %v3227_v23, %v3246_v3  ;;  %v7462_v52 = vmul.f32 0.125, %v2899_v61  ;;  %v5364_v10 = vpop.f32.mrb[111].mxu0 }
 0x712   :  { %v3135_v40 = vpop.f32.mrb[130].mxu1  ;;  %v3375_v37 = vmul.f32 %v5709_v56, %v3299_v20 }
 0x713   :  { %5714 = vrsqrt.f32 %v3340_v11  ;;  %v3284_v18 = vmax.f32 %v3265_v29, 0.0  ;;  %v3247_v55 = vmul.f32 %v7462_v52, %v7462_v52  ;;  %v3228_v12 = vmul.f32 0.125, %v3135_v40  ;;  %v5423_v62 = vpop.f32.mrb[131].mxu1 }
 0x714   :  { %3434 = vperm.xlu0 %5552, %v3375_v37   ;;  %v2904_v2 = vpop.f32.mrb[112].mxu0  ;;  %v3394_v57 = vmul.f32 %v3375_v37, %v7439_v15  ;;  %v3319_v15 = vld [vmem:[%s7910_s8 + $0x348] sm:$0xff] }
 0x715   :  { %v5711_v16 = vpop.eup %5710  ;;  %v3341_v41 = vadd.f32 1e-05, %v3284_v18  ;;  %v3266_v39 = vsub.f32 %v3228_v12, %v3247_v55  ;;  %v7473_v45 = vmul.f32 0.125, %v2904_v2  ;;  %v5367_v32 = vpop.f32.mrb[113].mxu0  ;;  %v3302_v37 = vld [vmem:[%s7910_s8 + $0x148] sm:$0xff] }
 0x716   :  { %v3140_v25 = vpop.f32.mrb[132].mxu1  ;;  %v3413_v28 = vsub.f32 %v3318_v49, %v3394_v57  ;;  %v3376_v44 = vmul.f32 %v5711_v16, %v3300_v26 }
 0x717   :  { %5716 = vrsqrt.f32 %v3341_v41  ;;  %v3285_v58 = vmax.f32 %v3266_v39, 0.0  ;;  %v3248_v24 = vmul.f32 %v7473_v45, %v7473_v45  ;;  %v3229_v42 = vmul.f32 0.125, %v3140_v25  ;;  %v5426_v22 = vpop.f32.mrb[133].mxu1 }
 0x718   :  { %3548 = vperm.xlu0 %5552, %v3413_v28   ;;  %3439 = vperm.xlu1 %5551, %v3376_v44   ;;  %v2909_v48 = vpop.f32.mrb[114].mxu0  ;;  %v3395_v63 = vmul.f32 %v3376_v44, %v7443_v8  ;;  %v3320_v8 = vld [vmem:[%s7910_s8 + $0x350] sm:$0xff] }
 0x719   :  { %v5713_v36 = vpop.eup %5712  ;;  %v3342_v13 = vadd.f32 1e-05, %v3285_v58  ;;  %v3267_v3 = vsub.f32 %v3229_v42, %v3248_v24  ;;  %v7484_v23 = vmul.f32 0.125, %v2909_v48  ;;  %v5370_v59 = vpop.f32.mrb[115].mxu0  ;;  %v3303_v44 = vld [vmem:[%s7910_s8 + $0x150] sm:$0xff] }
 0x71a   :  { %v3145_v20 = vpop.f32.mrb[134].mxu1  ;;  %v3414_v61 = vsub.f32 %v3319_v15, %v3395_v63  ;;  %v3377_v56 = vmul.f32 %v5713_v36, %v3301_v31 }
 0x71b   :  { %5718 = vrsqrt.f32 %v3342_v13  ;;  %v3286_v11 = vmax.f32 %v3267_v3, 0.0  ;;  %v3249_v29 = vmul.f32 %v7484_v23, %v7484_v23  ;;  %v3230_v10 = vmul.f32 0.125, %v3145_v20  ;;  %v5429_v40 = vpop.f32.mrb[135].mxu1 }
 0x71c   :  { %3553 = vperm.xlu1 %5551, %v3414_v61   ;;  %3444 = vperm.xlu0 %5552, %v3377_v56   ;;  %v2914_v18 = vpop.f32.mrb[116].mxu0  ;;  %v3396_v55 = vmul.f32 %v3377_v56, %v7447_v30  ;;  %v3321_v30 = vld [vmem:[%s7910_s8 + $0x358] sm:$0xff] }
 0x71d   :  { %v5715_v12 = vpop.eup %5714  ;;  %v3343_v62 = vadd.f32 1e-05, %v3286_v11  ;;  %v3268_v49 = vsub.f32 %v3230_v10, %v3249_v29  ;;  %v7495_v26 = vmul.f32 0.125, %v2914_v18  ;;  %v5373_v2 = vpop.f32.mrb[117].mxu0  ;;  %v3304_v56 = vld [vmem:[%s7910_s8 + $0x158] sm:$0xff] }
 0x71e   :  { %v3150_v57 = vpop.f32.mrb[136].mxu1  ;;  %v3415_v16 = vsub.f32 %v3320_v8, %v3396_v55  ;;  %v3378_v41 = vmul.f32 %v5715_v12, %v3302_v37 }
 0x71f   :  { %5720 = vrsqrt.f32 %v3343_v62  ;;  %v3287_v39 = vmax.f32 %v3268_v49, 0.0  ;;  %v3250_v32 = vmul.f32 %v7495_v26, %v7495_v26  ;;  %v3231_v25 = vmul.f32 0.125, %v3150_v57  ;;  %v5432_v28 = vpop.f32.mrb[137].mxu1 }
 0x720   :  { %3558 = vperm.xlu0 %5552, %v3415_v16   ;;  %3449 = vperm.xlu1 %5551, %v3378_v41   ;;  %v2919_v58 = vpop.f32.mrb[118].mxu0  ;;  %v3397_v24 = vmul.f32 %v3378_v41, %v7451_v27  ;;  %v3322_v27 = vld [vmem:[%s7910_s8 + $0x360] sm:$0xff] }
 0x721   :  { %v5717_v42 = vpop.eup %5716  ;;  %v3344_v22 = vadd.f32 1e-05, %v3287_v39  ;;  %v3269_v15 = vsub.f32 %v3231_v25, %v3250_v32  ;;  %v7506_v31 = vmul.f32 0.125, %v2919_v58  ;;  %v5376_v48 = vpop.f32.mrb[119].mxu0  ;;  %v3305_v41 = vld [vmem:[%s7910_s8 + $0x160] sm:$0xff] }
 0x722   :  { %v3155_v63 = vpop.f32.mrb[138].mxu1  ;;  %v3416_v36 = vsub.f32 %v3321_v30, %v3397_v24  ;;  %v3379_v13 = vmul.f32 %v5717_v42, %v3303_v44 }
 0x723   :  { %5722 = vrsqrt.f32 %v3344_v22  ;;  %v3288_v3 = vmax.f32 %v3269_v15, 0.0  ;;  %v3251_v59 = vmul.f32 %v7506_v31, %v7506_v31  ;;  %v3232_v20 = vmul.f32 0.125, %v3155_v63  ;;  %v5435_v61 = vpop.f32.mrb[139].mxu1 }
 0x724   :  { %3563 = vperm.xlu1 %5551, %v3416_v36   ;;  %3454 = vperm.xlu0 %5552, %v3379_v13   ;;  %v2924_v11 = vpop.f32.mrb[120].mxu0  ;;  %v3398_v29 = vmul.f32 %v3379_v13, %v7455_v14  ;;  %v3323_v14 = vld [vmem:[%s7910_s8 + $0x368] sm:$0xff] }
 0x725   :  { %v5719_v10 = vpop.eup %5718  ;;  %v3345_v40 = vadd.f32 1e-05, %v3288_v3  ;;  %v3270_v8 = vsub.f32 %v3232_v20, %v3251_v59  ;;  %v7517_v37 = vmul.f32 0.125, %v2924_v11  ;;  %v5379_v18 = vpop.f32.mrb[121].mxu0  ;;  %v3306_v13 = vld [vmem:[%s7910_s8 + $0x168] sm:$0xff] }
 0x726   :  { %v3160_v55 = vpop.f32.mrb[140].mxu1  ;;  %v3417_v12 = vsub.f32 %v3322_v27, %v3398_v29  ;;  %v3380_v62 = vmul.f32 %v5719_v10, %v3304_v56 }
 0x727   :  { %5724 = vrsqrt.f32 %v3345_v40  ;;  %v3289_v49 = vmax.f32 %v3270_v8, 0.0  ;;  %v3252_v2 = vmul.f32 %v7517_v37, %v7517_v37  ;;  %v3233_v57 = vmul.f32 0.125, %v3160_v55  ;;  %v5438_v16 = vpop.f32.mrb[141].mxu1 }
 0x728   :  { %3568 = vperm.xlu0 %5552, %v3417_v12   ;;  %3459 = vperm.xlu1 %5551, %v3380_v62   ;;  %v2929_v39 = vpop.f32.mrb[122].mxu0  ;;  %v3399_v32 = vmul.f32 %v3380_v62, %v7462_v52  ;;  %v3324_v52 = vld [vmem:[%s7910_s8 + $0x370] sm:$0xff] }
 0x729   :  { %v5721_v25 = vpop.eup %5720  ;;  %v3346_v28 = vadd.f32 1e-05, %v3289_v49  ;;  %v3271_v30 = vsub.f32 %v3233_v57, %v3252_v2  ;;  %v7528_v44 = vmul.f32 0.125, %v2929_v39  ;;  %v5382_v58 = vpop.f32.mrb[123].mxu0  ;;  %v3307_v62 = vld [vmem:[%s7910_s8 + $0x170] sm:$0xff] }
 0x72a   :  { %v3165_v24 = vpop.f32.mrb[142].mxu1  ;;  %v3418_v42 = vsub.f32 %v3323_v14, %v3399_v32  ;;  %v3381_v22 = vmul.f32 %v5721_v25, %v3305_v41 }
 0x72b   :  { %5726 = vrsqrt.f32 %v3346_v28  ;;  %v3290_v15 = vmax.f32 %v3271_v30, 0.0  ;;  %v3253_v48 = vmul.f32 %v7528_v44, %v7528_v44  ;;  %v3234_v63 = vmul.f32 0.125, %v3165_v24  ;;  %v5441_v36 = vpop.f32.mrb[143].mxu1 }
 0x72c   :  { %3573 = vperm.xlu1 %5551, %v3418_v42   ;;  %3464 = vperm.xlu0 %5552, %v3381_v22   ;;  %v2934_v3 = vpop.f32.mrb[124].mxu0  ;;  %v3400_v59 = vmul.f32 %v3381_v22, %v7473_v45  ;;  %v3325_v45 = vld [vmem:[%s7910_s8 + $0x378] sm:$0xff] }
 0x72d   :  { %v5723_v20 = vpop.eup %5722  ;;  %v3347_v61 = vadd.f32 1e-05, %v3290_v15  ;;  %v3272_v27 = vsub.f32 %v3234_v63, %v3253_v48  ;;  %v7539_v56 = vmul.f32 0.125, %v2934_v3  ;;  %v5385_v11 = vpop.f32.mrb[125].mxu0  ;;  %v3308_v22 = vld [vmem:[%s7910_s8 + $0x178] sm:$0xff] }
 0x72e   :  { %v3170_v29 = vpop.f32.mrb[144].mxu1  ;;  %v3419_v10 = vsub.f32 %v3324_v52, %v3400_v59  ;;  %v3382_v40 = vmul.f32 %v5723_v20, %v3306_v13 }
 0x72f   :  { %5728 = vrsqrt.f32 %v3347_v61  ;;  %v3291_v8 = vmax.f32 %v3272_v27, 0.0  ;;  %v3254_v18 = vmul.f32 %v7539_v56, %v7539_v56  ;;  %v3235_v55 = vmul.f32 0.125, %v3170_v29  ;;  %v5444_v12 = vpop.f32.mrb[145].mxu1 }
 0x730   :  { %3578 = vperm.xlu0 %5552, %v3419_v10   ;;  %3469 = vperm.xlu1 %5551, %v3382_v40   ;;  %v2939_v49 = vpop.f32.mrb[126].mxu0  ;;  %v3401_v2 = vmul.f32 %v3382_v40, %v7484_v23  ;;  %v3326_v23 = vld [vmem:[%s7910_s8 + $0x380] sm:$0xff] }
 0x731   :  { %v5725_v57 = vpop.eup %5724  ;;  %v3348_v16 = vadd.f32 1e-05, %v3291_v8  ;;  %v3273_v14 = vsub.f32 %v3235_v55, %v3254_v18  ;;  %v7550_v41 = vmul.f32 0.125, %v2939_v49  ;;  %v5388_v39 = vpop.f32.mrb[127].mxu0  ;;  %v3309_v40 = vld [vmem:[%s7910_s8 + $0x180] sm:$0xff] }
 0x732   :  { %v3175_v32 = vpop.f32.mrb[146].mxu1  ;;  %v3420_v25 = vsub.f32 %v3325_v45, %v3401_v2  ;;  %v3383_v28 = vmul.f32 %v5725_v57, %v3307_v62 }
 0x733   :  { %5730 = vrsqrt.f32 %v3348_v16  ;;  %v3292_v30 = vmax.f32 %v3273_v14, 0.0  ;;  %v3255_v58 = vmul.f32 %v7550_v41, %v7550_v41  ;;  %v3236_v24 = vmul.f32 0.125, %v3175_v32  ;;  %v5447_v42 = vpop.f32.mrb[147].mxu1 }
 0x734   :  { %3583 = vperm.xlu1 %5551, %v3420_v25   ;;  %3474 = vperm.xlu0 %5552, %v3383_v28   ;;  %v2944_v15 = vpop.f32.mrb[128].mxu0  ;;  %v3402_v48 = vmul.f32 %v3383_v28, %v7495_v26  ;;  %v3327_v26 = vld [vmem:[%s7910_s8 + $0x388] sm:$0xff] }
 0x735   :  { %v5727_v63 = vpop.eup %5726  ;;  %v3349_v36 = vadd.f32 1e-05, %v3292_v30  ;;  %v3274_v52 = vsub.f32 %v3236_v24, %v3255_v58  ;;  %v7561_v13 = vmul.f32 0.125, %v2944_v15  ;;  %v5391_v3 = vpop.f32.mrb[129].mxu0  ;;  %v3310_v28 = vld [vmem:[%s7910_s8 + $0x188] sm:$0xff] }
 0x736   :  { %v3180_v59 = vpop.f32.mrb[148].mxu1  ;;  %v3421_v20 = vsub.f32 %v3326_v23, %v3402_v48  ;;  %v3384_v61 = vmul.f32 %v5727_v63, %v3308_v22 }
 0x737   :  { %5732 = vrsqrt.f32 %v3349_v36  ;;  %v3293_v27 = vmax.f32 %v3274_v52, 0.0  ;;  %v3256_v11 = vmul.f32 %v7561_v13, %v7561_v13  ;;  %v3237_v29 = vmul.f32 0.125, %v3180_v59  ;;  %v5450_v10 = vpop.f32.mrb[149].mxu1 }
 0x738   :  { %3588 = vperm.xlu0 %5552, %v3421_v20   ;;  %3479 = vperm.xlu1 %5551, %v3384_v61   ;;  %v2949_v8 = vpop.f32.mrb[130].mxu0  ;;  %v3403_v18 = vmul.f32 %v3384_v61, %v7506_v31  ;;  %v3328_v31 = vld [vmem:[%s7910_s8 + $0x390] sm:$0xff] }
 0x739   :  { %v5729_v55 = vpop.eup %5728  ;;  %v3350_v12 = vadd.f32 1e-05, %v3293_v27  ;;  %v3275_v45 = vsub.f32 %v3237_v29, %v3256_v11  ;;  %v7572_v62 = vmul.f32 0.125, %v2949_v8  ;;  %v5394_v49 = vpop.f32.mrb[131].mxu0  ;;  %v3311_v61 = vld [vmem:[%s7910_s8 + $0x190] sm:$0xff] }
 0x73a   :  { %v3185_v2 = vpop.f32.mrb[150].mxu1  ;;  %v3422_v57 = vsub.f32 %v3327_v26, %v3403_v18  ;;  %v3385_v16 = vmul.f32 %v5729_v55, %v3309_v40 }
 0x73b   :  { %5734 = vrsqrt.f32 %v3350_v12  ;;  %v3294_v14 = vmax.f32 %v3275_v45, 0.0  ;;  %v3257_v39 = vmul.f32 %v7572_v62, %v7572_v62  ;;  %v3238_v32 = vmul.f32 0.125, %v3185_v2  ;;  %v5453_v25 = vpop.f32.mrb[151].mxu1 }
 0x73c   :  { %3593 = vperm.xlu1 %5551, %v3422_v57   ;;  %3484 = vperm.xlu0 %5552, %v3385_v16   ;;  %v3404_v30 = vmul.f32 %v3385_v16, %v7517_v37  ;;  %v2954_v58 = vpop.f32.mrb[132].mxu0  ;;  %v3329_v37 = vld [vmem:[%s7910_s8 + $0x398] sm:$0xff] }
 0x73d   :  { %v5731_v24 = vpop.eup %5730  ;;  %v3351_v42 = vadd.f32 1e-05, %v3294_v14  ;;  %v3276_v23 = vsub.f32 %v3238_v32, %v3257_v39  ;;  %v7583_v22 = vmul.f32 0.125, %v2954_v58  ;;  %v5397_v15 = vpop.f32.mrb[133].mxu0  ;;  %v3312_v16 = vld [vmem:[%s7910_s8 + $0x198] sm:$0xff] }
 0x73e   :  { %v3190_v48 = vpop.f32.mrb[152].mxu1  ;;  %v3423_v63 = vsub.f32 %v3328_v31, %v3404_v30  ;;  %v3386_v36 = vmul.f32 %v5731_v24, %v3310_v28 }
 0x73f   :  { %5736 = vrsqrt.f32 %v3351_v42  ;;  %v3295_v52 = vmax.f32 %v3276_v23, 0.0  ;;  %v3258_v3 = vmul.f32 %v7583_v22, %v7583_v22  ;;  %v3239_v59 = vmul.f32 0.125, %v3190_v48  ;;  %v5456_v20 = vpop.f32.mrb[153].mxu1 }
 0x740   :  { %3598 = vperm.xlu0 %5552, %v3423_v63   ;;  %3489 = vperm.xlu1 %5551, %v3386_v36   ;;  %v3405_v27 = vmul.f32 %v3386_v36, %v7528_v44  ;;  %v2959_v11 = vpop.f32.mrb[134].mxu0  ;;  %v3330_v44 = vld [vmem:[%s7910_s8 + $0x3a0] sm:$0xff]  ;;  %v3331_v63 = vld [vmem:[%s7910_s8 + $0x3a8] sm:$0xff] }
 0x741   :  { %v5733_v29 = vpop.eup %5732  ;;  %v3352_v10 = vadd.f32 1e-05, %v3295_v52  ;;  %v3277_v26 = vsub.f32 %v3239_v59, %v3258_v3  ;;  %v7594_v40 = vmul.f32 0.125, %v2959_v11  ;;  %v5400_v8 = vpop.f32.mrb[135].mxu0  ;;  %v3332_v11 = vld [vmem:[%s7910_s8 + $0x3b0] sm:$0xff] }
 0x742   :  { %v3195_v18 = vpop.f32.mrb[154].mxu1  ;;  %v3424_v55 = vsub.f32 %v3329_v37, %v3405_v27  ;;  %v3387_v12 = vmul.f32 %v5733_v29, %v3311_v61  ;;  %v3314_v29 = vld [vmem:[%s7910_s8 + $0x1a8] sm:$0xff] }
 0x743   :  { %5738 = vrsqrt.f32 %v3352_v10  ;;  %v3296_v45 = vmax.f32 %v3277_v26, 0.0  ;;  %v3259_v49 = vmul.f32 %v7594_v40, %v7594_v40  ;;  %v3240_v2 = vmul.f32 0.125, %v3195_v18  ;;  %v5459_v57 = vpop.f32.mrb[155].mxu1 }
 0x744   :  { %3603 = vperm.xlu1 %5551, %v3424_v55   ;;  %3494 = vperm.xlu0 %5552, %v3387_v12   ;;  %v2964_v14 = vpop.f32.mrb[136].mxu0  ;;  %v3406_v39 = vmul.f32 %v3387_v12, %v7539_v56  ;;  %v3313_v56 = vld [vmem:[%s7910_s8 + $0x1a0] sm:$0xff]  ;;  %v3333_v55 = vld [vmem:[%s7910_s8 + $0x3b8] sm:$0xff]  ;;  %v3315_v12 = vld [vmem:[%s7910_s8 + $0x1b0] sm:$0xff] }
 0x745   :  { %v5735_v32 = vpop.eup %5734  ;;  %v3353_v25 = vadd.f32 1e-05, %v3296_v45  ;;  %v3278_v31 = vsub.f32 %v3240_v2, %v3259_v49  ;;  %v3222_v28 = vmul.f32 0.125, %v2964_v14  ;;  %v5403_v30 = vpop.f32.mrb[137].mxu0  ;;  %v3334_v57 = vld [vmem:[%s7910_s8 + $0x3c0] sm:$0xff] }
 0x746   :  { %v3200_v58 = vpop.f32.mrb[156].mxu1  ;;  %v3425_v24 = vsub.f32 %v3330_v44, %v3406_v39  ;;  %v3388_v42 = vmul.f32 %v5735_v32, %v3312_v16  ;;  %v3316_v44 = vld [vmem:[%s7910_s8 + $0x1b8] sm:$0xff] }
 0x747   :  { %5740 = vrsqrt.f32 %v3353_v25  ;;  %v3297_v23 = vmax.f32 %v3278_v31, 0.0  ;;  %v3260_v15 = vmul.f32 %v3222_v28, %v3222_v28  ;;  %v3241_v48 = vmul.f32 0.125, %v3200_v58  ;;  %v5462_v36 = vpop.f32.mrb[157].mxu1  ;;  %v3317_v25 = vld [vmem:[%s7910_s8 + $0x1c0] sm:$0x3f] }
 0x748   :  { %3608 = vperm.xlu0 %5552, %v3425_v24   ;;  %3499 = vperm.xlu1 %5551, %v3388_v42   ;;  %v3407_v52 = vmul.f32 %v3388_v42, %v7550_v41 }
 0x749   :  { %v5737_v3 = vpop.eup %5736  ;;  %v3354_v59 = vadd.f32 1e-05, %v3297_v23  ;;  %v3279_v20 = vsub.f32 %v3241_v48, %v3260_v15  ;;  %v5616_v15 = vld [vmem:[%s7907_s5 + $0x4] ss:$8 sps:$4 sm:$0xff]  }
 0x74a   :  { %v3426_v37 = vsub.f32 %v3331_v63, %v3407_v52  ;;  %v3389_v61 = vmul.f32 %v5737_v3, %v3313_v56  ;;  %4817 = vmatprep.mubr.msk.bf16.mxu0 %vm3729_vm8, %v5616_v15 }
 0x74b   :  { %5742 = vrsqrt.f32 %v3354_v59  ;;  %v3298_v27 = vmax.f32 %v3279_v20, 0.0 }
 0x74c   :  { %3613 = vperm.xlu1 %5551, %v3426_v37   ;;  %3504 = vperm.xlu0 %5552, %v3389_v61   ;;  %v3408_v10 = vmul.f32 %v3389_v61, %v7561_v13 }
 0x74d   :  { %v5739_v41 = vpop.eup %5738  ;;  %v3355_v26 = vadd.f32 1e-05, %v3298_v27 }
 0x74e   :  { %v3427_v8 = vsub.f32 %v3332_v11, %v3408_v10  ;;  %v3390_v18 = vmul.f32 %v5739_v41, %v3314_v29 }
 0x74f   :  { %5744 = vrsqrt.f32 %v3355_v26 }
 0x750   :  { %3618 = vperm.xlu0 %5552, %v3427_v8   ;;  %3509 = vperm.xlu1 %5551, %v3390_v18   ;;  %v3409_v45 = vmul.f32 %v3390_v18, %v7572_v62  ;;  %v3335_v62 = vld [vmem:[%s7910_s8 + $0x3c8] sm:$0xff] }
 0x751   :  { %v5741_v49 = vpop.eup %5740 }
 0x752   :  { %v3428_v2 = vsub.f32 %v3333_v55, %v3409_v45  ;;  %v3391_v13 = vmul.f32 %v5741_v49, %v3315_v12 }
 0x754   :  { %3623 = vperm.xlu1 %5551, %v3428_v2   ;;  %3514 = vperm.xlu0 %5552, %v3391_v13   ;;  %v3410_v16 = vmul.f32 %v3391_v13, %v7583_v22  ;;  %v3336_v22 = vld [vmem:[%s7910_s8 + $0x3d0] sm:$0x3f] }
 0x755   :  { %v5743_v14 = vpop.eup %5742 }
 0x756   :  { %v3429_v39 = vsub.f32 %v3334_v57, %v3410_v16  ;;  %v3392_v32 = vmul.f32 %v5743_v14, %v3316_v44 }
 0x758   :  { %3628 = vperm.xlu0 %5552, %v3429_v39   ;;  %3519 = vperm.xlu1 %5551, %v3392_v32   ;;  %v3411_v31 = vmul.f32 %v3392_v32, %v7594_v40 }
 0x759   :  { %v5745_v30 = vpop.eup %5744 }
 0x75a   :  { %v3430_v58 = vsub.f32 %v3335_v62, %v3411_v31  ;;  %v3393_v24 = vmul.f32 %v5745_v30, %v3317_v25 }
 0x75c   :  { %3633 = vperm.xlu1 %5551, %v3430_v58   ;;  %3524 = vperm.xlu0 %5552, %v3393_v24   ;;  %v3412_v42 = vmul.f32 %v3393_v24, %v3222_v28 }
 0x75e   :  { %v3431_v23 = vsub.f32 %v3336_v22, %v3412_v42 }
 0x760   :  { %3638 = vperm.xlu1 %5551, %v3431_v23  }
 0x793   :  { %v3435_v40 = vpop.permute.xlu0 %3434 }
 0x794   :  { %v3527_v56 = vmul.f32 %v3435_v40, %v7232_v5 }
 0x797   :  { %v3549_v48 = vpop.permute.xlu0 %3548  ;;  %v3440_v63 = vpop.permute.xlu1 %3439 }
 0x798   :  { %v3641_v36 = vadd.f32 %v3549_v48, %v3527_v56  ;;  %v3528_v52 = vmul.f32 %v3440_v63, %v7240_v47 }
 0x79a   :  { %v3660_v20 = vmax.f32 %v3641_v36, 0.0 }
 0x79b   :  { %v3554_v3 = vpop.permute.xlu1 %3553  ;;  %v3445_v59 = vpop.permute.xlu0 %3444 }
 0x79c   :  { %v3642_v28 = vadd.f32 %v3554_v3, %v3528_v52  ;;  %v3529_v29 = vmul.f32 %v3445_v59, %v7230_v46 }
 0x79e   :  { %v3661_v37 = vmax.f32 %v3642_v28, 0.0 }
 0x79f   :  { %v3559_v61 = vpop.permute.xlu0 %3558  ;;  %v3450_v27 = vpop.permute.xlu1 %3449 }
 0x7a0   :  { %v3679_v11 = vpack.c.bf16 %v3661_v37, %v3660_v20  ;;  %v3643_v10 = vadd.f32 %v3559_v61, %v3529_v29  ;;  %v3530_v41 = vmul.f32 %v3450_v27, %v7234_v53 }
 0x7a2   :  { %3747 = vmatpush1.bf16.msra.mxu0 %v3679_v11  ;;  %v3662_v47 = vmax.f32 %v3643_v10, 0.0 }
 0x7a3   :  { %v3564_v26 = vpop.permute.xlu1 %3563  ;;  %v3455_v8 = vpop.permute.xlu0 %3454  ;;  %3748 = vmatprep.subr.bf16.mxu0 %v8083_v35 }
 0x7a4   :  { %v3644_v5 = vadd.f32 %v3564_v26, %v3530_v41  ;;  %v3531_v49 = vmul.f32 %v3455_v8, %v7258_v7 }
 0x7a6   :  { %v3663_v18 = vmax.f32 %v3644_v5, 0.0 }
 0x7a7   :  { %v3569_v55 = vpop.permute.xlu0 %3568  ;;  %v3460_v12 = vpop.permute.xlu1 %3459 }
 0x7a8   :  { %v3680_v45 = vpack.c.bf16 %v3663_v18, %v3662_v47  ;;  %v3645_v2 = vadd.f32 %v3569_v55, %v3531_v49  ;;  %v3532_v13 = vmul.f32 %v3460_v12, %v7268_v50 }
 0x7aa   :  { %3749 = vmatpush1.bf16.msra.mxu0 %v3680_v45  ;;  %v3664_v44 = vmax.f32 %v3645_v2, 0.0 }
 0x7ab   :  { %v3574_v46 = vpop.permute.xlu1 %3573  ;;  %v3465_v57 = vpop.permute.xlu0 %3464  ;;  %3750 = vmatprep.subr.bf16.mxu0 %v8083_v35 }
 0x7ac   :  { %v3646_v53 = vadd.f32 %v3574_v46, %v3532_v13  ;;  %v3533_v62 = vmul.f32 %v3465_v57, %v7255_v4 }
 0x7ae   :  { %v3665_v16 = vmax.f32 %v3646_v53, 0.0 }
 0x7af   :  { %v3579_v14 = vpop.permute.xlu0 %3578  ;;  %v3470_v39 = vpop.permute.xlu1 %3469 }
 0x7b0   :  { %v3681_v32 = vpack.c.bf16 %v3665_v16, %v3664_v44  ;;  %v3647_v25 = vadd.f32 %v3579_v14, %v3533_v62  ;;  %v3534_v31 = vmul.f32 %v3470_v39, %v7262_v38 }
 0x7b2   :  { %3751 = vmatpush1.bf16.msra.mxu0 %v3681_v32  ;;  %v3666_v58 = vmax.f32 %v3647_v25, 0.0 }
 0x7b3   :  { %v3584_v7 = vpop.permute.xlu1 %3583  ;;  %v3475_v30 = vpop.permute.xlu0 %3474  ;;  %3752 = vmatprep.subr.bf16.mxu0 %v8083_v35 }
 0x7b4   :  { %v3648_v50 = vadd.f32 %v3584_v7, %v3534_v31  ;;  %v3535_v15 = vmul.f32 %v3475_v30, %v7284_v54 }
 0x7b6   :  { %v3667_v24 = vmax.f32 %v3648_v50, 0.0 }
 0x7b7   :  { %v3589_v22 = vpop.permute.xlu0 %3588  ;;  %v3480_v42 = vpop.permute.xlu1 %3479 }
 0x7b8   :  { %v3682_v23 = vpack.c.bf16 %v3667_v24, %v3666_v58  ;;  %v3649_v40 = vadd.f32 %v3589_v22, %v3535_v15  ;;  %v3536_v48 = vmul.f32 %v3480_v42, %v7290_v1  ;;  %v5617_v15 = vld [vmem:[%s7907_s5 + $0x14] ss:$8 sps:$4 sm:$0xff]  }
 0x7ba   :  { %3753 = vmatpush1.bf16.msra.mxu0 %v3682_v23  ;;  %v3668_v56 = vmax.f32 %v3649_v40, 0.0  ;;  %v5614_v23 = vld [vmem:[%s7907_s5] ss:$8 sps:$4 sm:$0xff]   ;;  %v3695_v40 = vld [vmem:[%s7907_s5 + $0x30] sm:$0x11] }
 0x7bb   :  { %v3594_v4 = vpop.permute.xlu1 %3593  ;;  %v3485_v63 = vpop.permute.xlu0 %3484  ;;  %3754 = vmatprep.subr.bf16.mxu0 %v8083_v35 }
 0x7bc   :  { %v3650_v38 = vadd.f32 %v3594_v4, %v3536_v48  ;;  %v3537_v28 = vmul.f32 %v3485_v63, %v7301_v60  ;;  %v5622_v48 = vld [vmem:[%s7907_s5 + $0x20] ss:$8 sps:$4 sm:$0xff]   ;;  %v4816_v4 = vcombine.high %v3695_v40, %v3695_v40  ;;  %v4815_v63 = vcombine.low %v3695_v40, %v3695_v40 }
 0x7be   :  { %v3669_v36 = vmax.f32 %v3650_v38, 0.0 }
 0x7bf   :  { %v3599_v52 = vpop.permute.xlu0 %3598  ;;  %v3490_v3 = vpop.permute.xlu1 %3489 }
 0x7c0   :  { %v3683_v59 = vpack.c.bf16 %v3669_v36, %v3668_v56  ;;  %v3651_v20 = vadd.f32 %v3599_v52, %v3537_v28  ;;  %v3538_v37 = vmul.f32 %v3490_v3, %v7306_v9 }
 0x7c2   :  { %3755 = vmatpush1.bf16.msra.mxu0 %v3683_v59  ;;  %v3670_v27 = vmax.f32 %v3651_v20, 0.0 }
 0x7c3   :  { %v3604_v54 = vpop.permute.xlu1 %3603  ;;  %v3495_v61 = vpop.permute.xlu0 %3494  ;;  %3756 = vmatprep.subr.bf16.mxu0 %v8083_v35 }
 0x7c4   :  { %v3652_v1 = vadd.f32 %v3604_v54, %v3538_v37  ;;  %v3539_v26 = vmul.f32 %v3495_v61, %v7323_v21 }
 0x7c6   :  { %v3671_v11 = vmax.f32 %v3652_v1, 0.0 }
 0x7c7   :  { %v3609_v29 = vpop.permute.xlu0 %3608  ;;  %v3500_v10 = vpop.permute.xlu1 %3499 }
 0x7c8   :  { %v3684_v41 = vpack.c.bf16 %v3671_v11, %v3670_v27  ;;  %v3653_v8 = vadd.f32 %v3609_v29, %v3539_v26  ;;  %v3540_v5 = vmul.f32 %v3500_v10, %v7330_v43 }
 0x7ca   :  { %3757 = vmatpush1.bf16.msra.mxu0 %v3684_v41  ;;  %v3672_v18 = vmax.f32 %v3653_v8, 0.0 }
 0x7cb   :  { %v3614_v60 = vpop.permute.xlu1 %3613  ;;  %v3505_v47 = vpop.permute.xlu0 %3504  ;;  %3758 = vmatprep.subr.bf16.mxu0 %v8083_v35 }
 0x7cc   :  { %v3654_v9 = vadd.f32 %v3614_v60, %v3540_v5  ;;  %v3541_v2 = vmul.f32 %v3505_v47, %v7345_v51 }
 0x7ce   :  { %v3673_v55 = vmax.f32 %v3654_v9, 0.0 }
 0x7cf   :  { %v3619_v12 = vpop.permute.xlu0 %3618  ;;  %v3510_v45 = vpop.permute.xlu1 %3509 }
 0x7d0   :  { %v3685_v49 = vpack.c.bf16 %v3673_v55, %v3672_v18  ;;  %v3655_v13 = vadd.f32 %v3619_v12, %v3541_v2  ;;  %v3542_v46 = vmul.f32 %v3510_v45, %v7350_v19 }
 0x7d2   :  { %3759 = vmatpush1.bf16.msra.mxu0 %v3685_v49  ;;  %v3674_v53 = vmax.f32 %v3655_v13, 0.0 }
 0x7d3   :  { %v3624_v21 = vpop.permute.xlu1 %3623  ;;  %v3515_v57 = vpop.permute.xlu0 %3514  ;;  %3760 = vmatprep.subr.bf16.mxu0 %v8083_v35 }
 0x7d4   :  { %v3656_v43 = vadd.f32 %v3624_v21, %v3542_v46  ;;  %v3543_v32 = vmul.f32 %v3515_v57, %v7367_v33 }
 0x7d6   :  { %v3675_v44 = vmax.f32 %v3656_v43, 0.0 }
 0x7d7   :  { %v3629_v16 = vpop.permute.xlu0 %3628  ;;  %v3520_v14 = vpop.permute.xlu1 %3519 }
 0x7d8   :  { %v3686_v39 = vpack.c.bf16 %v3675_v44, %v3674_v53  ;;  %v3657_v62 = vadd.f32 %v3629_v16, %v3543_v32  ;;  %v3544_v25 = vmul.f32 %v3520_v14, %v7374_v17 }
 0x7da   :  { %3761 = vmatpush1.bf16.msra.mxu0 %v3686_v39  ;;  %v3676_v7 = vmax.f32 %v3657_v62, 0.0 }
 0x7db   :  { %v3634_v51 = vpop.permute.xlu1 %3633  ;;  %v3525_v31 = vpop.permute.xlu0 %3524  ;;  %3762 = vmatprep.subr.bf16.mxu0 %v8083_v35 }
 0x7dc   :  { %v3658_v19 = vadd.f32 %v3634_v51, %v3544_v25  ;;  %v3545_v50 = vmul.f32 %v3525_v31, %v7389_v6  ;;  %v5620_v6 = vld [vmem:[%s7907_s5 + $0x24] ss:$8 sps:$4 sm:$0xff]  }
 0x7de   :  { %v3677_v30 = vmax.f32 %v3658_v19, 0.0 }
 0x7df   :  { %v3639_v58 = vpop.permute.xlu1 %3638 }
 0x7e0   :  { %v3687_v24 = vpack.c.bf16 %v3677_v30, %v3676_v7  ;;  %v3659_v22 = vadd.f32 %v3639_v58, %v3545_v50 }
 0x7e2   :  { %v3678_v42 = vmax.f32 %v3659_v22, 0.0  ;;  %3763 = vmatpush1.bf16.msra.mxu0 %v3687_v24 }
 0x7e3   :  { %3764 = vmatprep.subr.bf16.mxu0 %v8083_v35  ;;  %v5619_v35 = vld [vmem:[%s7907_s5 + $0x10] ss:$8 sps:$4 sm:$0xff]  }
 0x7e4   :  { %v3688_v33 = vpack.c.bf16 %v3678_v42, %v3678_v42 }
 0x7e6   :  { %v3744_v17 = vsel %vm3742_vm9, %v3688_v33, 0 }
 0x7e7   :  { %3765 = vmatpush1.bf16.msra.mxu0 %v3744_v17 }
 0x7e8   :  { %5463 = vmatprep.subr.mxu0 %v8078_v0 }
 0x7ea   :  { %3779 = vmatmul.mubr.bf16.vlgmr.msra.gmra.mrb[140].mxu0 %v5614_v23 }
 0x7eb   :  { %4818 = vmatprep.mubr.msk.bf16.mxu0 %vm3729_vm8, %v5617_v15  ;;  %5464 = vmatpush3.msra.mxu0 %v8080_v34 }
 0x7ec   :  { %5509 = vmatprep.subr.bf16.mxu0 %v8078_v0 }
 0x7f2   :  { %3787 = vmatmul.mubr.bf16.gmra.mrb[144].mxu0 %v5619_v35 }
 0x7f3   :  { %4819 = vmatprep.mubr.msk.bf16.mxu0 %vm3729_vm8, %v5620_v6 }
 0x7fa   :  { %3795 = vmatmul.mubr.bf16.gmra.mrb[148].mxu0 %v5622_v48 }
 0x7fb   :  { %4820 = vmatprep.mubr.msk.bf16.mxu0 %vm3729_vm8, %v4816_v4 }
 0x802   :  { %3803 = vmatmul.mubr.bf16.gmra.mrb[152].mxu0 %v4815_v63 }
 0x803   :  { %5465 = vmatprep.mubr.msk.f32.mxu0 %vm5791_vm1, %v8078_v0 }
 0x8bd   :  { %v7701_v38 = vpop.f32.mrb[140].mxu0 }
 0x8be   :  { %v3931_v56 = vmul.f32 %v7701_v38, %v7701_v38  ;;  %5466 = vmatmul.mubr.msk.f32.vlgmr.msra.gmra.mrb[138].mxu0 %vm563_vm5, %v7701_v38  ;;  %v3782_v36 = vpop.f32.mrb[141].mxu0 }
 0x8bf   :  { %v7707_v52 = vpop.f32.mrb[142].mxu0  ;;  %5468 = vmatprep.mubr.msk.f32.mxu0 %vm5791_vm1, %v8078_v0 }
 0x8c0   :  { %5489 = vmatmul.mubr.msk.f32.vlgmr.msra.gmra.mrb[158].mxu1 %vm563_vm5, %v3931_v56  ;;  %v3785_v3 = vpop.f32.mrb[143].mxu0  ;;  %v3932_v59 = vmul.f32 %v7707_v52, %v7707_v52 }
 0x8c1   :  { %5491 = vmatprep.mubr.msk.f32.mxu1 %vm5791_vm1, %v8078_v0  ;;  %5522 = vmatpush3.msra.mxu1 %v8080_v34 }
 0x8c2   :  { %5469 = vmatmul.mubr.msk.f32.gmra.mrb[156].mxu0 %vm563_vm5, %v7707_v52 }
 0x8c3   :  { %5471 = vmatprep.mubr.msk.f32.mxu0 %vm5791_vm1, %v8078_v0 }
 0x8c4   :  { %5492 = vmatmul.mubr.msk.f32.gmra.mrb[160].mxu1 %vm563_vm5, %v3932_v59 }
 0x8c5   :  { %v7722_v28 = vpop.f32.mrb[144].mxu0  ;;  %5494 = vmatprep.mubr.msk.f32.mxu1 %vm5791_vm1, %v8078_v0 }
 0x8c6   :  { %v3933_v20 = vmul.f32 %v7722_v28, %v7722_v28  ;;  %5472 = vmatmul.mubr.msk.f32.gmra.mrb[158].mxu0 %vm563_vm5, %v7722_v28  ;;  %v3790_v37 = vpop.f32.mrb[145].mxu0 }
 0x8c7   :  { %v7730_v54 = vpop.f32.mrb[146].mxu0  ;;  %5474 = vmatprep.mubr.msk.f32.mxu0 %vm5791_vm1, %v8078_v0 }
 0x8c8   :  { %5495 = vmatmul.mubr.msk.f32.gmra.mrb[162].mxu1 %vm563_vm5, %v3933_v20  ;;  %v3793_v61 = vpop.f32.mrb[147].mxu0  ;;  %v3934_v1 = vmul.f32 %v7730_v54, %v7730_v54 }
 0x8c9   :  { %5497 = vmatprep.mubr.msk.f32.mxu1 %vm5791_vm1, %v8078_v0 }
 0x8ca   :  { %5475 = vmatmul.mubr.msk.f32.gmra.mrb[160].mxu0 %vm563_vm5, %v7730_v54 }
 0x8cb   :  { %5477 = vmatprep.mubr.msk.f32.mxu0 %vm5791_vm1, %v8078_v0 }
 0x8cc   :  { %5498 = vmatmul.mubr.msk.f32.gmra.mrb[164].mxu1 %vm563_vm5, %v3934_v1  ;;  %v4094_v1 = vld [vmem:[%s7910_s8 + $0x1c8] sm:$0xff] }
 0x8cd   :  { %v7744_v27 = vpop.f32.mrb[148].mxu0  ;;  %5500 = vmatprep.mubr.msk.f32.mxu1 %vm5791_vm1, %v8078_v0 }
 0x8ce   :  { %v3935_v11 = vmul.f32 %v7744_v27, %v7744_v27  ;;  %5478 = vmatmul.mubr.msk.f32.gmra.mrb[162].mxu0 %vm563_vm5, %v7744_v27  ;;  %v3798_v29 = vpop.f32.mrb[149].mxu0 }
 0x8cf   :  { %v7752_v10 = vpop.f32.mrb[150].mxu0  ;;  %5480 = vmatprep.mubr.msk.f32.mxu0 %vm5791_vm1, %v8078_v0 }
 0x8d0   :  { %5501 = vmatmul.mubr.msk.f32.gmra.mrb[166].mxu1 %vm563_vm5, %v3935_v11  ;;  %v3801_v41 = vpop.f32.mrb[151].mxu0  ;;  %v3936_v26 = vmul.f32 %v7752_v10, %v7752_v10 }
 0x8d1   :  { %5503 = vmatprep.mubr.msk.f32.mxu1 %vm5791_vm1, %v8078_v0 }
 0x8d2   :  { %5481 = vmatmul.mubr.msk.f32.gmra.mrb[164].mxu0 %vm563_vm5, %v7752_v10 }
 0x8d3   :  { %5483 = vmatprep.mubr.msk.f32.mxu0 %vm5791_vm1, %v8078_v0 }
 0x8d4   :  { %5504 = vmatmul.mubr.msk.f32.gmra.mrb[168].mxu1 %vm563_vm5, %v3936_v26 }
 0x8d5   :  { %v7766_v8 = vpop.f32.mrb[152].mxu0  ;;  %5506 = vmatprep.mubr.msk.f32.mxu1 %vm5791_vm1, %v8078_v0 }
 0x8d6   :  { %v3937_v5 = vmul.f32 %v7766_v8, %v7766_v8  ;;  %5484 = vmatmul.mubr.msk.f32.gmra.mrb[166].mxu0 %vm563_vm5, %v7766_v8  ;;  %v3806_v60 = vpop.f32.mrb[153].mxu0 }
 0x8d7   :  { %v3807_v47 = vpop.f32.mrb[154].mxu0  ;;  %5517 = vmatprep.mubr.msk.bf16.mxu0 %vm5791_vm1, %v8078_v0 }
 0x8d8   :  { %5507 = vmatmul.mubr.msk.f32.gmra.mrb[170].mxu1 %vm563_vm5, %v3937_v5  ;;  %v3808_v9 = vpop.f32.mrb[155].mxu0 }
 0x991   :  { %v3897_v18 = vpop.f32.mrb[138].mxu0 }
 0x992   :  { %v7777_v55 = vmul.f32 0.125, %v3897_v18  ;;  %v5467_v12 = vpop.f32.mrb[139].mxu0 }
 0x993   :  { %v4025_v45 = vpop.f32.mrb[158].mxu1 }
 0x994   :  { %v4073_v49 = vmul.f32 %v7777_v55, %v7777_v55  ;;  %v4066_v2 = vmul.f32 0.125, %v4025_v45  ;;  %v5490_v13 = vpop.f32.mrb[159].mxu1 }
 0x995   :  { %v3902_v46 = vpop.f32.mrb[156].mxu0  ;;  %v4095_v13 = vld [vmem:[%s7910_s8 + $0x1d0] sm:$0xff] }
 0x996   :  { %v4080_v21 = vsub.f32 %v4066_v2, %v4073_v49  ;;  %v7781_v57 = vmul.f32 0.125, %v3902_v46  ;;  %v5470_v43 = vpop.f32.mrb[157].mxu0  ;;  %v4101_v2 = vld [vmem:[%s7910_s8 + $0x3d8] sm:$0xff] }
 0x997   :  { %v4030_v53 = vpop.f32.mrb[160].mxu1 }
 0x998   :  { %v4087_v44 = vmax.f32 %v4080_v21, 0.0  ;;  %v4074_v16 = vmul.f32 %v7781_v57, %v7781_v57  ;;  %v4067_v14 = vmul.f32 0.125, %v4030_v53  ;;  %v5493_v39 = vpop.f32.mrb[161].mxu1 }
 0x999   :  { %v3907_v32 = vpop.f32.mrb[158].mxu0 }
 0x99a   :  { %v4108_v62 = vadd.f32 1e-05, %v4087_v44  ;;  %v4081_v25 = vsub.f32 %v4067_v14, %v4074_v16  ;;  %v7785_v51 = vmul.f32 0.125, %v3907_v32  ;;  %v5473_v31 = vpop.f32.mrb[159].mxu0 }
 0x99b   :  { %v4035_v19 = vpop.f32.mrb[162].mxu1 }
 0x99c   :  { %5746 = vrsqrt.f32 %v4108_v62  ;;  %v4088_v7 = vmax.f32 %v4081_v25, 0.0  ;;  %v4075_v30 = vmul.f32 %v7785_v51, %v7785_v51  ;;  %v4068_v50 = vmul.f32 0.125, %v4035_v19  ;;  %v5496_v58 = vpop.f32.mrb[163].mxu1 }
 0x99d   :  { %v3912_v24 = vpop.f32.mrb[160].mxu0 }
 0x99e   :  { %v4109_v22 = vadd.f32 1e-05, %v4088_v7  ;;  %v4082_v42 = vsub.f32 %v4068_v50, %v4075_v30  ;;  %v7789_v33 = vmul.f32 0.125, %v3912_v24  ;;  %v5476_v17 = vpop.f32.mrb[161].mxu0  ;;  %v4102_v7 = vld [vmem:[%s7910_s8 + $0x3e0] sm:$0xff] }
 0x99f   :  { %v4040_v23 = vpop.f32.mrb[164].mxu1 }
 0x9a0   :  { %5748 = vrsqrt.f32 %v4109_v22  ;;  %v4089_v15 = vmax.f32 %v4082_v42, 0.0  ;;  %v4076_v35 = vmul.f32 %v7789_v33, %v7789_v33  ;;  %v4069_v6 = vmul.f32 0.125, %v4040_v23  ;;  %v5499_v40 = vpop.f32.mrb[165].mxu1 }
 0x9a1   :  { %v3917_v48 = vpop.f32.mrb[162].mxu0 }
 0x9a2   :  { %v4110_v4 = vadd.f32 1e-05, %v4089_v15  ;;  %v4083_v63 = vsub.f32 %v4069_v6, %v4076_v35  ;;  %v7793_v56 = vmul.f32 0.125, %v3917_v48  ;;  %v5479_v36 = vpop.f32.mrb[163].mxu0  ;;  %v4103_v15 = vld [vmem:[%s7910_s8 + $0x3e8] sm:$0xff]  ;;  %v4097_v35 = vld [vmem:[%s7910_s8 + $0x1e0] sm:$0xff] }
 0x9a3   :  { %v4045_v3 = vpop.f32.mrb[166].mxu1  ;;  %v4098_v36 = vld [vmem:[%s7910_s8 + $0x1e8] sm:$0xff] }
 0x9a4   :  { %5750 = vrsqrt.f32 %v4110_v4  ;;  %v4090_v59 = vmax.f32 %v4083_v63, 0.0  ;;  %v4077_v20 = vmul.f32 %v7793_v56, %v7793_v56  ;;  %v4070_v37 = vmul.f32 0.125, %v4045_v3  ;;  %v5502_v61 = vpop.f32.mrb[167].mxu1  ;;  %v4104_v63 = vld [vmem:[%s7910_s8 + $0x3f0] sm:$0xff] }
 0x9a5   :  { %v3922_v11 = vpop.f32.mrb[164].mxu0  ;;  %v4099_v61 = vld [vmem:[%s7910_s8 + $0x1f0] sm:$0xff] }
 0x9a6   :  { %v5747_v29 = vpop.eup %5746  ;;  %v4111_v41 = vadd.f32 1e-05, %v4090_v59  ;;  %v4084_v26 = vsub.f32 %v4070_v37, %v4077_v20  ;;  %v7800_v5 = vmul.f32 0.125, %v3922_v11  ;;  %v5482_v60 = vpop.f32.mrb[165].mxu0  ;;  %v4105_v37 = vld [vmem:[%s7910_s8 + $0x3f8] sm:$0xff] }
 0x9a7   :  { %v4050_v47 = vpop.f32.mrb[168].mxu1  ;;  %v4122_v9 = vmul.f32 %v5747_v29, %v4094_v1 }
 0x9a8   :  { %5752 = vrsqrt.f32 %v4111_v41  ;;  %v4091_v18 = vmax.f32 %v4084_v26, 0.0  ;;  %v4078_v12 = vmul.f32 %v7800_v5, %v7800_v5  ;;  %v4071_v45 = vmul.f32 0.125, %v4050_v47  ;;  %v5505_v49 = vpop.f32.mrb[169].mxu1  ;;  %v4100_v26 = vld [vmem:[%s7910_s8 + $0x1f8] sm:$0x3] }
 0x9a9   :  { %4145 = vperm.xlu0 %5552, %v4122_v9   ;;  %v3927_v46 = vpop.f32.mrb[166].mxu0  ;;  %v4129_v21 = vmul.f32 %v4122_v9, %v7777_v55  ;;  %v4096_v55 = vld [vmem:[%s7910_s8 + $0x1d8] sm:$0xff] }
 0x9aa   :  { %v5749_v43 = vpop.eup %5748  ;;  %v4112_v53 = vadd.f32 1e-05, %v4091_v18  ;;  %v4085_v44 = vsub.f32 %v4071_v45, %v4078_v12  ;;  %v4065_v16 = vmul.f32 0.125, %v3927_v46  ;;  %v5485_v14 = vpop.f32.mrb[167].mxu0 }
 0x9ab   :  { %v4055_v39 = vpop.f32.mrb[170].mxu1  ;;  %v4136_v32 = vsub.f32 %v4101_v2, %v4129_v21  ;;  %v4123_v62 = vmul.f32 %v5749_v43, %v4095_v13 }
 0x9ac   :  { %5754 = vrsqrt.f32 %v4112_v53  ;;  %v4092_v25 = vmax.f32 %v4085_v44, 0.0  ;;  %v4079_v31 = vmul.f32 %v4065_v16, %v4065_v16  ;;  %v4072_v19 = vmul.f32 0.125, %v4055_v39  ;;  %v5508_v30 = vpop.f32.mrb[171].mxu1 }
 0x9ad   :  { %4187 = vperm.xlu0 %5552, %v4136_v32   ;;  %4150 = vperm.xlu1 %5551, %v4123_v62   ;;  %v4130_v50 = vmul.f32 %v4123_v62, %v7781_v57 }
 0x9ae   :  { %v5751_v58 = vpop.eup %5750  ;;  %v4113_v24 = vadd.f32 1e-05, %v4092_v25  ;;  %v4086_v22 = vsub.f32 %v4072_v19, %v4079_v31 }
 0x9af   :  { %v4137_v42 = vsub.f32 %v4102_v7, %v4130_v50  ;;  %v4124_v17 = vmul.f32 %v5751_v58, %v4096_v55 }
 0x9b0   :  { %5756 = vrsqrt.f32 %v4113_v24  ;;  %v4093_v23 = vmax.f32 %v4086_v22, 0.0 }
 0x9b1   :  { %4192 = vperm.xlu1 %5551, %v4137_v42   ;;  %4155 = vperm.xlu0 %5552, %v4124_v17   ;;  %v4131_v6 = vmul.f32 %v4124_v17, %v7785_v51 }
 0x9b2   :  { %v5753_v57 = vpop.eup %5752  ;;  %v4114_v40 = vadd.f32 1e-05, %v4093_v23 }
 0x9b3   :  { %v4138_v48 = vsub.f32 %v4103_v15, %v4131_v6  ;;  %v4125_v4 = vmul.f32 %v5753_v57, %v4097_v35 }
 0x9b4   :  { %5758 = vrsqrt.f32 %v4114_v40 }
 0x9b5   :  { %4197 = vperm.xlu0 %5552, %v4138_v48   ;;  %4160 = vperm.xlu1 %5551, %v4125_v4   ;;  %v4132_v3 = vmul.f32 %v4125_v4, %v7789_v33  ;;  %v4106_v33 = vld [vmem:[%s7910_s8 + $0x400] sm:$0xff] }
 0x9b6   :  { %v5755_v59 = vpop.eup %5754 }
 0x9b7   :  { %v4139_v20 = vsub.f32 %v4104_v63, %v4132_v3  ;;  %v4126_v51 = vmul.f32 %v5755_v59, %v4098_v36  ;;  %v5625_v63 = vld [vmem:[%s7908_s6] sm:$0x1f]  }
 0x9b9   :  { %4202 = vperm.xlu1 %5551, %v4139_v20   ;;  %4165 = vperm.xlu0 %5552, %v4126_v51   ;;  %v4133_v1 = vmul.f32 %v4126_v51, %v7793_v56  ;;  %v4107_v56 = vld [vmem:[%s7910_s8 + $0x408] sm:$0x3] }
 0x9ba   :  { %v5757_v11 = vpop.eup %5756 }
 0x9bb   :  { %v4140_v29 = vsub.f32 %v4105_v37, %v4133_v1  ;;  %v4127_v41 = vmul.f32 %v5757_v11, %v4099_v61 }
 0x9bd   :  { %4207 = vperm.xlu0 %5552, %v4140_v29   ;;  %4170 = vperm.xlu1 %5551, %v4127_v41   ;;  %v4134_v60 = vmul.f32 %v4127_v41, %v7800_v5 }
 0x9be   :  { %v5759_v47 = vpop.eup %5758 }
 0x9bf   :  { %v4141_v9 = vsub.f32 %v4106_v33, %v4134_v60  ;;  %v4128_v18 = vmul.f32 %v5759_v47, %v4100_v26 }
 0x9c1   :  { %4212 = vperm.xlu1 %5551, %v4141_v9   ;;  %4175 = vperm.xlu0 %5552, %v4128_v18   ;;  %v4135_v12 = vmul.f32 %v4128_v18, %v4065_v16 }
 0x9c3   :  { %v4142_v45 = vsub.f32 %v4107_v56, %v4135_v12 }
 0x9c5   :  { %4217 = vperm.xlu1 %5551, %v4142_v45  }
 0xa28   :  { %v4146_v49 = vpop.permute.xlu0 %4145 }
 0xa29   :  { %v4178_v46 = vmul.f32 %v4146_v49, %v7701_v38  ;;  %v4468_v49 = vld [vmem:[%s7910_s8 + $0x200] sm:$0xff] }
 0xa2c   :  { %v4188_v2 = vpop.permute.xlu0 %4187  ;;  %v4151_v13 = vpop.permute.xlu1 %4150 }
 0xa2d   :  { %v4220_v21 = vadd.f32 %v4188_v2, %v4178_v46  ;;  %v4179_v5 = vmul.f32 %v4151_v13, %v7707_v52 }
 0xa2f   :  { %v4227_v14 = vmax.f32 %v4220_v21, 0.0 }
 0xa30   :  { %v4193_v43 = vpop.permute.xlu1 %4192  ;;  %v4156_v53 = vpop.permute.xlu0 %4155 }
 0xa31   :  { %v4221_v44 = vadd.f32 %v4193_v43, %v4179_v5  ;;  %v4180_v16 = vmul.f32 %v4156_v53, %v7722_v28  ;;  %v4471_v5 = vld [vmem:[%s7910_s8 + $0x418] sm:$0x3]  ;;  %v4470_v53 = vld [vmem:[%s7910_s8 + $0x410] sm:$0xff] }
 0xa33   :  { %v4228_v39 = vmax.f32 %v4221_v44, 0.0 }
 0xa34   :  { %v4198_v32 = vpop.permute.xlu0 %4197  ;;  %v4161_v62 = vpop.permute.xlu1 %4160 }
 0xa35   :  { %v4234_v25 = vpack.c.bf16 %v4228_v39, %v4227_v14  ;;  %v4222_v31 = vadd.f32 %v4198_v32, %v4180_v16  ;;  %v4181_v19 = vmul.f32 %v4161_v62, %v7730_v54  ;;  %v4508_v32 = vld [vmem:[%s7910_s8 + $0x420] sm:$0x1]  ;;  %v5794_v62 = vmov 0.0|0.0  }
 0xa36   :  { %5538 = vmatprep.subr.bf16.mxu1 %v5794_v62 }
 0xa37   :  { %5510 = vmatpush3.bf16.msra.mxu0 %v4234_v25  ;;  %v4229_v52 = vmax.f32 %v4222_v31, 0.0 }
 0xa38   :  { %v4203_v7 = vpop.permute.xlu1 %4202  ;;  %v4166_v55 = vpop.permute.xlu0 %4165  ;;  %5511 = vmatprep.subr.bf16.mxu0 %v8078_v0 }
 0xa39   :  { %v4223_v38 = vadd.f32 %v4203_v7, %v4181_v19  ;;  %v4182_v22 = vmul.f32 %v4166_v55, %v7744_v27 }
 0xa3b   :  { %v4230_v30 = vmax.f32 %v4223_v38, 0.0 }
 0xa3c   :  { %v4208_v50 = vpop.permute.xlu0 %4207  ;;  %v4171_v58 = vpop.permute.xlu1 %4170 }
 0xa3d   :  { %v4235_v24 = vpack.c.bf16 %v4230_v30, %v4229_v52  ;;  %v4224_v42 = vadd.f32 %v4208_v50, %v4182_v22  ;;  %v4183_v17 = vmul.f32 %v4171_v58, %v7752_v10 }
 0xa3f   :  { %5512 = vmatpush3.bf16.msra.mxu0 %v4235_v24  ;;  %v4231_v15 = vmax.f32 %v4224_v42, 0.0  ;;  %v4509_v24 = vld [vmem:[%s7909_s7] sm:$0x1] }
 0xa40   :  { %v4213_v28 = vpop.permute.xlu1 %4212  ;;  %v4176_v23 = vpop.permute.xlu0 %4175  ;;  %5513 = vmatprep.subr.bf16.mxu0 %v8078_v0 }
 0xa41   :  { %v4225_v54 = vadd.f32 %v4213_v28, %v4183_v17  ;;  %v4184_v6 = vmul.f32 %v4176_v23, %v7766_v8 }
 0xa43   :  { %v4232_v35 = vmax.f32 %v4225_v54, 0.0 }
 0xa44   :  { %v4218_v57 = vpop.permute.xlu1 %4217 }
 0xa45   :  { %v4236_v40 = vpack.c.bf16 %v4232_v35, %v4231_v15  ;;  %v4226_v48 = vadd.f32 %v4218_v57, %v4184_v6 }
 0xa47   :  { %v4233_v4 = vmax.f32 %v4226_v48, 0.0  ;;  %5514 = vmatpush3.bf16.msra.mxu0 %v4236_v40 }
 0xa48   :  { %5515 = vmatprep.subr.bf16.mxu0 %v8078_v0 }
 0xa49   :  { %v4237_v27 = vpack.c.bf16 %v4233_v4, %v4233_v4 }
 0xa4b   :  { %v4251_v10 = vsel %vm4249_vm10, %v4237_v27, 0 }
 0xa4c   :  { %5516 = vmatpush3.bf16.msra.mxu0 %v4251_v10 }
 0xa4d   :  { %5526 = vmatprep.subr.mxu0 %v8080_v34 }
 0xa4f   :  { %5518 = vmatmul.mubr.msk.bf16.vlgmr.msra.gmra.mrb[168].mxu0 %vm4245_vm11, %v5625_v63 }
 0xa50   :  { %5527 = vmatpush3.msra.mxu0 %v8080_v34 }
 0xb22   :  { %v4287_v8 = vpop.f32.mrb[168].mxu0 }
 0xb23   :  { %v4375_v36 = vmul.f32 %v4287_v8, %v4287_v8  ;;  %v5519_v3 = vpop.f32.mrb[169].mxu0  ;;  %5523 = vmatprep.mubr.msk.f32.mxu1 %vm563_vm5, %v4287_v8 }
 0xb24   :  { %v4290_v59 = vpop.f32.mrb[170].mxu0 }
 0xb25   :  { %v4376_v20 = vmul.f32 %v4290_v59, %v4290_v59  ;;  %5524 = vmatmul.mubr.msk.f32.vlgmr.msra.gmra.mrb[172].mxu1 %vm563_vm5, %v4290_v59  ;;  %5528 = vmatprep.mubr.msk.f32.mxu0 %vm563_vm5, %v4375_v36  ;;  %v5520_v51 = vpop.f32.mrb[171].mxu0 }
 0xb26   :  { %5535 = vmatprep.mubr.msk.f32.mxu1 %vm5791_vm1, %v8078_v0  ;;  %v4469_v0 = vld [vmem:[%s7910_s8 + $0x208] sm:$0x3] }
 0xb27   :  { %5529 = vmatmul.mubr.msk.f32.vlgmr.msra.gmra.mrb[172].mxu0 %vm563_vm5, %v4376_v20 }
 0xbf8   :  { %v5525_v37 = vpop.f32.mrb[172].mxu1 }
 0xbf9   :  { %v4459_v61 = vmul.f32 0.125, %v5525_v37  ;;  %v4366_v34 = vpop.f32.mrb[173].mxu1 }
 0xbfa   :  { %v4458_v1 = vmul.f32 0.125, %v4366_v34  ;;  %v5530_v11 = vpop.f32.mrb[172].mxu0 }
 0xbfb   :  { %v4463_v29 = vmul.f32 %v4459_v61, %v4459_v61  ;;  %v4461_v41 = vmul.f32 0.125, %v5530_v11  ;;  %v4449_v33 = vpop.f32.mrb[173].mxu0 }
 0xbfc   :  { %v4462_v26 = vmul.f32 %v4458_v1, %v4458_v1  ;;  %v4460_v60 = vmul.f32 0.125, %v4449_v33 }
 0xbfd   :  { %v4465_v47 = vsub.f32 %v4461_v41, %v4463_v29 }
 0xbfe   :  { %v4464_v9 = vsub.f32 %v4460_v60, %v4462_v26 }
 0xbff   :  { %v4467_v18 = vmax.f32 %v4465_v47, 0.0 }
 0xc00   :  { %v4466_v56 = vmax.f32 %v4464_v9, 0.0 }
 0xc01   :  { %v4473_v12 = vadd.f32 1e-05, %v4467_v18 }
 0xc02   :  { %v4472_v45 = vadd.f32 1e-05, %v4466_v56 }
 0xc03   :  { %5760 = vrsqrt.f32 %v4473_v12 }
 0xc04   :  { %5762 = vrsqrt.f32 %v4472_v45 }
 0xc0d   :  { %v5761_v2 = vpop.eup %5760 }
 0xc0e   :  { %v5763_v13 = vpop.eup %5762  ;;  %v4477_v46 = vmul.f32 %v5761_v2, %v4469_v0 }
 0xc0f   :  { %v4476_v21 = vmul.f32 %v5763_v13, %v4468_v49 }
 0xc10   :  { %4489 = vperm.xlu1 %5551, %v4477_v46   ;;  %v4479_v43 = vmul.f32 %v4477_v46, %v4459_v61 }
 0xc11   :  { %4484 = vperm.xlu0 %5552, %v4476_v21   ;;  %v4478_v44 = vmul.f32 %v4476_v21, %v4458_v1 }
 0xc12   :  { %v4481_v14 = vsub.f32 %v4471_v5, %v4479_v43 }
 0xc13   :  { %v4480_v39 = vsub.f32 %v4470_v53, %v4478_v44 }
 0xc14   :  { %4501 = vperm.xlu1 %5551, %v4481_v14  }
 0xc15   :  { %4496 = vperm.xlu0 %5552, %v4480_v39  }
 0xc19   :  { %4512 = vperm.xlu0 %5552, %v4508_v32  }
 0xc8f   :  { %v4490_v25 = vpop.permute.xlu1 %4489 }
 0xc90   :  { %v4485_v16 = vpop.permute.xlu0 %4484  ;;  %v4493_v31 = vmul.f32 %v4490_v25, %v4290_v59 }
 0xc91   :  { %v4492_v19 = vmul.f32 %v4485_v16, %v4287_v8 }
 0xc93   :  { %v4502_v7 = vpop.permute.xlu1 %4501 }
 0xc94   :  { %v4505_v55 = vadd.f32 %v4502_v7, %v4493_v31  ;;  %v4497_v38 = vpop.permute.xlu0 %4496 }
 0xc95   :  { %v4504_v52 = vadd.f32 %v4497_v38, %v4492_v19 }
 0xc96   :  { %v4507_v30 = vmax.f32 %v4505_v55, 0.0 }
 0xc97   :  { %v4506_v50 = vmax.f32 %v4504_v52, 0.0 }
 0xc98   :  { %v4513_v22 = vpop.permute.xlu0 %4512 }
 0xc99   :  { %v5539_v58 = vpack.c.bf16 %v4507_v30, %v4506_v50 }
 0xc9b   :  { %5541 = vmatpush3.bf16.msk.msra.mxu1 %vm5540_vm13, %v5539_v58 }
 0xc9e   :  { %5536 = vmatmul.mubr.msk.f32.vlgmr.msra.gmra.mrb[174].mxu1 %vm109_vm3, %v4509_v24 }
 0xd71   :  { %v4587_v42 = vpop.f32.mrb[174].mxu1 }
 0xd72   :  { %v4588_v17 = vadd.f32 %v4587_v42, %v4513_v22  ;;  %v5537_v28 = vpop.f32.mrb[175].mxu1 }
 0xd74   :  { %v4591_v23 = vmul.f32 0.5, %v4588_v17 }
 0xd76   :  { %5764 = vtanh.f32 %v4591_v23 }
 0xd80   :  { %v5765_v54 = vpop.eup %5764 }
 0xd81   :  { %v4593_v15 = vmul.f32 0.5, %v5765_v54 }
 0xd83   :  { %v4594_v35 = vadd.f32 0.5, %v4593_v15 }
 0xd85   :  { %4596 = vst.msk [vmem:[#allocation2] sm:$0x1] %vm4595_vm14, %v4594_v35 }
 0xd86   :  { %5777 = shalt.err (!%p5774_p4)
}
 0xd87   :  { %s5778_s19 = scalar_lea.hbm %s7911_s9, 16 }
 0xd88   :  { %p5779_p5 = scmp.ne.s32.totalorder %s7911_s9, %s5778_s19  ;;  %p5782_p6 = scmp.lt.u32.totalorder %s5778_s19, %s7911_s9 }
 0xd8a   :  { %p5784_p7 = pnand %p5782_p6, %p5779_p5 }
 0xd8c   :  { %5787 = shalt.err (!%p5784_p7)
}
 0xd8d   :  { %4606 = dma.vmem_to_hbm [thread:$0]  %s4604_s1, 16, %s7911_s9, [#allocation3]  }
 0xd8e   :  { %5788 = dma.done.wait [#allocation3], 16  }
 0xd8f   :  { %5789 = vsyncadd [#allocation3], 4294967280 }
 0xd90   :  { %4610 = vsyncpa [#allocation3], 1 }

</bundles_post_ra>
